<compile_context>
chip_gen: v7x
topology: tpu7x:2x2x1
jax: 0.10.0
libtpu: 0.0.40
codegen_flags: <defaults>
</compile_context>

<pallas_src>
import functools
import numpy as np
import jax
import jax.numpy as jnp
from jax.experimental import pallas as pl
from jax.experimental.pallas import tpu as pltpu  # noqa: F401  (kept for TPU-specific tuning hooks)


# ---------------------------------------------------------------------------
# Model hyper-parameters (small, consistent with the module's structure)
# ---------------------------------------------------------------------------
D_MODEL = 32
D_INNER = 64
N_HEAD = 4
D_K = 8
D_V = 8
N_LAYERS = 2
N_POSITION = 256
BATCH = 2
SEQ = 8

_PER_LAYER_REFS = 12   # wq, wk, wv, wo, ln1_g, ln1_b, w1, b1, w2, b2, ln2_g, ln2_b


# ---------------------------------------------------------------------------
# Fused kernel
# ---------------------------------------------------------------------------
def _layer_norm(x, gamma, beta, eps=1e-6):
    mu = jnp.mean(x, axis=-1, keepdims=True)
    var = jnp.mean((x - mu) ** 2, axis=-1, keepdims=True)
    return (x - mu) * jax.lax.rsqrt(var + eps) * gamma + beta


def fused_encoder_kernel(x_ref, pos_ref, *refs, n_layers, n_head, seq_len, batch):
    """Entire TransformEncoder forward in one kernel invocation.

    x_ref:   (B*L, D) flattened activations
    pos_ref: (L, D)   sinusoidal table slice
    refs:    n_layers * 12 per-layer weight refs, final-LN gamma/beta, then the output ref.
    """
    out_ref = refs[-1]
    fln_g_ref, fln_b_ref = refs[-3], refs[-2]

    L = seq_len

    # positional-encoding add fused in (dropout == identity at inference);
    # tile (L, D) table along the (sublane) batch axis.
    pos = pos_ref[...]
    enc = x_ref[...].astype(jnp.float32) + jnp.concatenate([pos] * batch, axis=0)   # (N, D)

    for layer in range(n_layers):                                   # static unroll (2)
        base = layer * _PER_LAYER_REFS
        (wq_ref, wk_ref, wv_ref, wo_ref,
         ln1_g_ref, ln1_b_ref,
         w1_ref, b1_ref, w2_ref, b2_ref,
         ln2_g_ref, ln2_b_ref) = refs[base:base + _PER_LAYER_REFS]

        # ----- multi-head self attention (heads via stacked weights, no lane slicing) -----
        attn = jnp.zeros_like(enc)
        for h in range(n_head):                                     # static unroll (4)
            # 1/sqrt(d_k) is folded into wq at packing time.
            q_h = jnp.dot(enc, wq_ref[h], preferred_element_type=jnp.float32)   # (N, dk)
            k_h = jnp.dot(enc, wk_ref[h], preferred_element_type=jnp.float32)   # (N, dk)
            v_h = jnp.dot(enc, wv_ref[h], preferred_element_type=jnp.float32)   # (N, dv)
            ctx_rows = []
            for b in range(batch):                                  # static unroll (2); sublane-aligned rows
                rows = slice(b * L, (b + 1) * L)
                s = jnp.dot(q_h[rows], k_h[rows].T, preferred_element_type=jnp.float32)  # (L, L)
                s = s - jnp.max(s, axis=-1, keepdims=True)
                p = jnp.exp(s)
                p = p * pl.reciprocal(jnp.sum(p, axis=-1, keepdims=True), approx=True)
                ctx_rows.append(jnp.dot(p, v_h[rows], preferred_element_type=jnp.float32))  # (L, dv)
            ctx_h = jnp.concatenate(ctx_rows, axis=0)                # (N, dv)  (sublane concat only)
            # output projection distributed over heads -> no lane-axis concat of head outputs
            attn = attn + jnp.dot(ctx_h, wo_ref[h], preferred_element_type=jnp.float32)     # (N, D)

        attn = _layer_norm(attn + enc, ln1_g_ref[...], ln1_b_ref[...])

        # ----- position-wise feed forward -----
        hdn = jnp.dot(attn, w1_ref[...], preferred_element_type=jnp.float32) + b1_ref[...]
        hdn = jnp.maximum(hdn, 0.0)                                  # ReLU
        ffn = jnp.dot(hdn, w2_ref[...], preferred_element_type=jnp.float32) + b2_ref[...]
        enc = _layer_norm(ffn + attn, ln2_g_ref[...], ln2_b_ref[...])

    out_ref[...] = _layer_norm(enc, fln_g_ref[...], fln_b_ref[...]).astype(out_ref.dtype)


# ---------------------------------------------------------------------------
# Wrapper: weight packing + single pallas_call
# ---------------------------------------------------------------------------
def _pack_layer(lp):
    """Stack per-head weights: (D, H*dk) -> (H, D, dk); (H*dv, D) -> (H, dv, D).
    The 1/sqrt(d_k) attention scale is folded into wq."""
    scale = 1.0 / (D_K ** 0.5)
    wq = (lp['wq'] * scale).reshape(D_MODEL, N_HEAD, D_K).transpose(1, 0, 2)
    wk = lp['wk'].reshape(D_MODEL, N_HEAD, D_K).transpose(1, 0, 2)
    wv = lp['wv'].reshape(D_MODEL, N_HEAD, D_V).transpose(1, 0, 2)
    wo = lp['wo'].reshape(N_HEAD, D_V, D_MODEL)
    return [wq, wk, wv, wo,
            lp['ln1_g'], lp['ln1_b'],
            lp['w1'], lp['b1'], lp['w2'], lp['b2'],
            lp['ln2_g'], lp['ln2_b']]


def transform_encoder_forward(x, layer_params, final_ln, pos_table):
    B, L, D = x.shape
    x2 = x.reshape(B * L, D)                      # flatten batch into sublanes (free, outside kernel)
    pos = pos_table[:L, :]

    flat = []
    for lp in layer_params:
        flat.extend(_pack_layer(lp))
    flat.extend([final_ln[0], final_ln[1]])

    kernel = functools.partial(
        fused_encoder_kernel,
        n_layers=len(layer_params), n_head=N_HEAD, seq_len=L, batch=B)

    # Single fused invocation: no grid, every operand fully resident in VMEM
    # (total footprint ~20 KB of weights + ~6 KB activations — fits every generation).
    out = pl.pallas_call(
        kernel,
        out_shape=jax.ShapeDtypeStruct((B * L, D), x.dtype),
    )(x2, pos, *flat)
    return out.reshape(B, L, D)


# ---------------------------------------------------------------------------
# Parameter / positional-encoding setup (deterministic, synthetic)
# ---------------------------------------------------------------------------
def sinusoid_table(n_position, d_hid):
    pos = np.arange(n_position, dtype=np.float64)[:, None]
    i = np.arange(d_hid)
    angle = pos / np.power(10000.0, 2.0 * (i // 2) / d_hid)
    table = np.zeros((n_position, d_hid), dtype=np.float64)
    table[:, 0::2] = np.sin(angle[:, 0::2])
    table[:, 1::2] = np.cos(angle[:, 1::2])
    return jnp.asarray(table, dtype=jnp.float32)


def init_params(key):
    layer_params = []
    for _ in range(N_LAYERS):
        key, *ks = jax.random.split(key, 7)
        lp = {
            'wq': jax.random.normal(ks[0], (D_MODEL, N_HEAD * D_K), jnp.float32) * 0.05,
            'wk': jax.random.normal(ks[1], (D_MODEL, N_HEAD * D_K), jnp.float32) * 0.05,
            'wv': jax.random.normal(ks[2], (D_MODEL, N_HEAD * D_V), jnp.float32) * 0.05,
            'wo': jax.random.normal(ks[3], (N_HEAD * D_V, D_MODEL), jnp.float32) * 0.05,
            'ln1_g': jnp.ones((1, D_MODEL), jnp.float32),
            'ln1_b': jnp.zeros((1, D_MODEL), jnp.float32),
            'w1': jax.random.normal(ks[4], (D_MODEL, D_INNER), jnp.float32) * 0.05,
            'b1': jnp.zeros((1, D_INNER), jnp.float32),
            'w2': jax.random.normal(ks[5], (D_INNER, D_MODEL), jnp.float32) * 0.05,
            'b2': jnp.zeros((1, D_MODEL), jnp.float32),
            'ln2_g': jnp.ones((1, D_MODEL), jnp.float32),
            'ln2_b': jnp.zeros((1, D_MODEL), jnp.float32),
        }
        layer_params.append(lp)
    final_ln = (jnp.ones((1, D_MODEL), jnp.float32), jnp.zeros((1, D_MODEL), jnp.float32))
    return layer_params, final_ln


# ---------------------------------------------------------------------------
# Pure-JAX reference (operates on the original, unpacked weights)
# ---------------------------------------------------------------------------
def reference_forward(x, layer_params, final_ln, pos_table):
    def ln(v, g, b):
        mu = jnp.mean(v, axis=-1, keepdims=True)
        var = jnp.mean((v - mu) ** 2, axis=-1, keepdims=True)
        return (v - mu) / jnp.sqrt(var + 1e-6) * g + b

    B, L, D = x.shape
    enc = x + pos_table[None, :L, :]
    for lp in layer_params:
        q = (enc @ lp['wq']).reshape(B, L, N_HEAD, D_K).transpose(0, 2, 1, 3)
        k = (enc @ lp['wk']).reshape(B, L, N_HEAD, D_K).transpose(0, 2, 1, 3)
        v = (enc @ lp['wv']).reshape(B, L, N_HEAD, D_V).transpose(0, 2, 1, 3)
        s = jnp.einsum('bhld,bhmd->bhlm', q / (D_K ** 0.5), k)
        p = jax.nn.softmax(s, axis=-1)
        ctx = jnp.einsum('bhlm,bhmd->bhld', p, v).transpose(0, 2, 1, 3).reshape(B, L, N_HEAD * D_V)
        a = ln(ctx @ lp['wo'] + enc, lp['ln1_g'], lp['ln1_b'])
        f = jax.nn.relu(a @ lp['w1'] + lp['b1']) @ lp['w2'] + lp['b2'] + a
        enc = ln(f, lp['ln2_g'], lp['ln2_b'])
    return ln(enc, final_ln[0], final_ln[1])


# ---------------------------------------------------------------------------
if __name__ == "__main__":
    key = jax.random.PRNGKey(0)
    key, k_x, k_p = jax.random.split(key, 3)

    # cnn_feature: (B, L, d_model) sequence of flattened CNN features
    x = jax.random.normal(k_x, (BATCH, SEQ, D_MODEL), jnp.float32)

    layer_params, final_ln = init_params(k_p)
    pos_table = sinusoid_table(N_POSITION, D_MODEL)

    fwd = jax.jit(transform_encoder_forward)
    out = jax.block_until_ready(fwd(x, layer_params, final_ln, pos_table))

    ref = reference_forward(x, layer_params, final_ln, pos_table)
    # tolerance relaxed slightly vs f32 exact because softmax uses the EUP
    # approximate reciprocal (pl.reciprocal(..., approx=True)).
    np.testing.assert_allclose(np.asarray(out), np.asarray(ref), rtol=5e-3, atol=5e-3)

    print("KERNEL_OK")
</pallas_src>

<mosaic_0001>
module attributes {stable_mosaic.version = 11 : i64} {
  func.func @fused_encoder_kernel(%arg0: memref<16x32xf32, #tpu.memory_space<vmem>>, %arg1: memref<8x32xf32, #tpu.memory_space<vmem>>, %arg2: memref<4x32x8xf32, #tpu.memory_space<vmem>>, %arg3: memref<4x32x8xf32, #tpu.memory_space<vmem>>, %arg4: memref<4x32x8xf32, #tpu.memory_space<vmem>>, %arg5: memref<4x8x32xf32, #tpu.memory_space<vmem>>, %arg6: memref<1x32xf32, #tpu.memory_space<vmem>>, %arg7: memref<1x32xf32, #tpu.memory_space<vmem>>, %arg8: memref<32x64xf32, #tpu.memory_space<vmem>>, %arg9: memref<1x64xf32, #tpu.memory_space<vmem>>, %arg10: memref<64x32xf32, #tpu.memory_space<vmem>>, %arg11: memref<1x32xf32, #tpu.memory_space<vmem>>, %arg12: memref<1x32xf32, #tpu.memory_space<vmem>>, %arg13: memref<1x32xf32, #tpu.memory_space<vmem>>, %arg14: memref<4x32x8xf32, #tpu.memory_space<vmem>>, %arg15: memref<4x32x8xf32, #tpu.memory_space<vmem>>, %arg16: memref<4x32x8xf32, #tpu.memory_space<vmem>>, %arg17: memref<4x8x32xf32, #tpu.memory_space<vmem>>, %arg18: memref<1x32xf32, #tpu.memory_space<vmem>>, %arg19: memref<1x32xf32, #tpu.memory_space<vmem>>, %arg20: memref<32x64xf32, #tpu.memory_space<vmem>>, %arg21: memref<1x64xf32, #tpu.memory_space<vmem>>, %arg22: memref<64x32xf32, #tpu.memory_space<vmem>>, %arg23: memref<1x32xf32, #tpu.memory_space<vmem>>, %arg24: memref<1x32xf32, #tpu.memory_space<vmem>>, %arg25: memref<1x32xf32, #tpu.memory_space<vmem>>, %arg26: memref<1x32xf32, #tpu.memory_space<vmem>>, %arg27: memref<1x32xf32, #tpu.memory_space<vmem>>, %arg28: memref<16x32xf32, #tpu.memory_space<vmem>>) attributes {dimension_semantics = [], scalar_prefetch = 0 : i64, scratch_operands = 0 : i64, tpu.core_type = #tpu.core_type<tc>} {
    %c0 = arith.constant 0 : index
    %c0_0 = arith.constant 0 : index
    %0 = vector.load %arg1[%c0, %c0_0] : memref<8x32xf32, #tpu.memory_space<vmem>>, vector<8x32xf32>
    %c0_1 = arith.constant 0 : index
    %c0_2 = arith.constant 0 : index
    %1 = vector.load %arg0[%c0_1, %c0_2] : memref<16x32xf32, #tpu.memory_space<vmem>>, vector<16x32xf32>
    %2 = tpu.concatenate %0, %0 in 0 : vector<8x32xf32>, vector<8x32xf32> -> vector<16x32xf32>
    %3 = arith.addf %1, %2 : vector<16x32xf32>
    %cst = arith.constant 0.000000e+00 : f32
    %4 = vector.broadcast %cst : f32 to vector<16x32xf32>
    %c0_3 = arith.constant 0 : index
    %c0_4 = arith.constant 0 : index
    %c0_5 = arith.constant 0 : index
    %5 = vector.load %arg2[%c0_3, %c0_4, %c0_5] : memref<4x32x8xf32, #tpu.memory_space<vmem>>, vector<1x32x8xf32>
    %6 = vector.shape_cast %5 : vector<1x32x8xf32> to vector<32x8xf32>
    %cst_6 = arith.constant dense<0.000000e+00> : vector<16x8xf32>
    %7 = tpu.matmul %3, %6, %cst_6 {dimension_numbers = #tpu.dot_dimension_numbers<[1], [0], [0], [1], [0, 0, 1, 1], [], []>} : vector<16x32xf32>, vector<32x8xf32>, vector<16x8xf32> -> vector<16x8xf32>
    %c0_7 = arith.constant 0 : index
    %c0_8 = arith.constant 0 : index
    %c0_9 = arith.constant 0 : index
    %8 = vector.load %arg3[%c0_7, %c0_8, %c0_9] : memref<4x32x8xf32, #tpu.memory_space<vmem>>, vector<1x32x8xf32>
    %9 = vector.shape_cast %8 : vector<1x32x8xf32> to vector<32x8xf32>
    %cst_10 = arith.constant dense<0.000000e+00> : vector<16x8xf32>
    %10 = tpu.matmul %3, %9, %cst_10 {dimension_numbers = #tpu.dot_dimension_numbers<[1], [0], [0], [1], [0, 0, 1, 1], [], []>} : vector<16x32xf32>, vector<32x8xf32>, vector<16x8xf32> -> vector<16x8xf32>
    %c0_11 = arith.constant 0 : index
    %c0_12 = arith.constant 0 : index
    %c0_13 = arith.constant 0 : index
    %11 = vector.load %arg4[%c0_11, %c0_12, %c0_13] : memref<4x32x8xf32, #tpu.memory_space<vmem>>, vector<1x32x8xf32>
    %12 = vector.shape_cast %11 : vector<1x32x8xf32> to vector<32x8xf32>
    %cst_14 = arith.constant dense<0.000000e+00> : vector<16x8xf32>
    %13 = tpu.matmul %3, %12, %cst_14 {dimension_numbers = #tpu.dot_dimension_numbers<[1], [0], [0], [1], [0, 0, 1, 1], [], []>} : vector<16x32xf32>, vector<32x8xf32>, vector<16x8xf32> -> vector<16x8xf32>
    %14 = vector.extract_strided_slice %7 {offsets = [0, 0], sizes = [8, 8], strides = [1, 1]} : vector<16x8xf32> to vector<8x8xf32>
    %15 = vector.extract_strided_slice %10 {offsets = [0, 0], sizes = [8, 8], strides = [1, 1]} : vector<16x8xf32> to vector<8x8xf32>
    %16 = tpu.transpose %15, [1, 0] : vector<8x8xf32> -> vector<8x8xf32>
    %cst_15 = arith.constant dense<0.000000e+00> : vector<8x8xf32>
    %17 = tpu.matmul %14, %16, %cst_15 {dimension_numbers = #tpu.dot_dimension_numbers<[1], [0], [0], [1], [0, 0, 1, 1], [], []>} : vector<8x8xf32>, vector<8x8xf32>, vector<8x8xf32> -> vector<8x8xf32>
    %cst_16 = arith.constant dense<0xFF800000> : vector<8xf32>
    %18 = vector.multi_reduction <maximumf>, %17, %cst_16 [1] : vector<8x8xf32> to vector<8xf32>
    %19 = vector.shape_cast %18 : vector<8xf32> to vector<8x1xf32>
    %20 = vector.broadcast %19 : vector<8x1xf32> to vector<8x8xf32>
    %21 = arith.subf %17, %20 : vector<8x8xf32>
    %22 = math.exp %21 : vector<8x8xf32>
    %cst_17 = arith.constant dense<0.000000e+00> : vector<8xf32>
    %23 = vector.multi_reduction <add>, %22, %cst_17 [1] : vector<8x8xf32> to vector<8xf32>
    %24 = vector.shape_cast %23 : vector<8xf32> to vector<8x1xf32>
    %25 = tpu.reciprocal %24 {approx = true} : vector<8x1xf32> -> vector<8x1xf32>
    %26 = vector.broadcast %25 : vector<8x1xf32> to vector<8x8xf32>
    %27 = arith.mulf %22, %26 : vector<8x8xf32>
    %28 = vector.extract_strided_slice %13 {offsets = [0, 0], sizes = [8, 8], strides = [1, 1]} : vector<16x8xf32> to vector<8x8xf32>
    %cst_18 = arith.constant dense<0.000000e+00> : vector<8x8xf32>
    %29 = tpu.matmul %27, %28, %cst_18 {dimension_numbers = #tpu.dot_dimension_numbers<[1], [0], [0], [1], [0, 0, 1, 1], [], []>} : vector<8x8xf32>, vector<8x8xf32>, vector<8x8xf32> -> vector<8x8xf32>
    %30 = vector.extract_strided_slice %7 {offsets = [8, 0], sizes = [8, 8], strides = [1, 1]} : vector<16x8xf32> to vector<8x8xf32>
    %31 = vector.extract_strided_slice %10 {offsets = [8, 0], sizes = [8, 8], strides = [1, 1]} : vector<16x8xf32> to vector<8x8xf32>
    %32 = tpu.transpose %31, [1, 0] : vector<8x8xf32> -> vector<8x8xf32>
    %cst_19 = arith.constant dense<0.000000e+00> : vector<8x8xf32>
    %33 = tpu.matmul %30, %32, %cst_19 {dimension_numbers = #tpu.dot_dimension_numbers<[1], [0], [0], [1], [0, 0, 1, 1], [], []>} : vector<8x8xf32>, vector<8x8xf32>, vector<8x8xf32> -> vector<8x8xf32>
    %cst_20 = arith.constant dense<0xFF800000> : vector<8xf32>
    %34 = vector.multi_reduction <maximumf>, %33, %cst_20 [1] : vector<8x8xf32> to vector<8xf32>
    %35 = vector.shape_cast %34 : vector<8xf32> to vector<8x1xf32>
    %36 = vector.broadcast %35 : vector<8x1xf32> to vector<8x8xf32>
    %37 = arith.subf %33, %36 : vector<8x8xf32>
    %38 = math.exp %37 : vector<8x8xf32>
    %cst_21 = arith.constant dense<0.000000e+00> : vector<8xf32>
    %39 = vector.multi_reduction <add>, %38, %cst_21 [1] : vector<8x8xf32> to vector<8xf32>
    %40 = vector.shape_cast %39 : vector<8xf32> to vector<8x1xf32>
    %41 = tpu.reciprocal %40 {approx = true} : vector<8x1xf32> -> vector<8x1xf32>
    %42 = vector.broadcast %41 : vector<8x1xf32> to vector<8x8xf32>
    %43 = arith.mulf %38, %42 : vector<8x8xf32>
    %44 = vector.extract_strided_slice %13 {offsets = [8, 0], sizes = [8, 8], strides = [1, 1]} : vector<16x8xf32> to vector<8x8xf32>
    %cst_22 = arith.constant dense<0.000000e+00> : vector<8x8xf32>
    %45 = tpu.matmul %43, %44, %cst_22 {dimension_numbers = #tpu.dot_dimension_numbers<[1], [0], [0], [1], [0, 0, 1, 1], [], []>} : vector<8x8xf32>, vector<8x8xf32>, vector<8x8xf32> -> vector<8x8xf32>
    %46 = tpu.concatenate %29, %45 in 0 : vector<8x8xf32>, vector<8x8xf32> -> vector<16x8xf32>
    %c0_23 = arith.constant 0 : index
    %c0_24 = arith.constant 0 : index
    %c0_25 = arith.constant 0 : index
    %47 = vector.load %arg5[%c0_23, %c0_24, %c0_25] : memref<4x8x32xf32, #tpu.memory_space<vmem>>, vector<1x8x32xf32>
    %48 = vector.shape_cast %47 : vector<1x8x32xf32> to vector<8x32xf32>
    %cst_26 = arith.constant dense<0.000000e+00> : vector<16x32xf32>
    %49 = tpu.matmul %46, %48, %cst_26 {dimension_numbers = #tpu.dot_dimension_numbers<[1], [0], [0], [1], [0, 0, 1, 1], [], []>} : vector<16x8xf32>, vector<8x32xf32>, vector<16x32xf32> -> vector<16x32xf32>
    %50 = arith.addf %4, %49 : vector<16x32xf32>
    %c1 = arith.constant 1 : index
    %c0_27 = arith.constant 0 : index
    %c0_28 = arith.constant 0 : index
    %51 = vector.load %arg2[%c1, %c0_27, %c0_28] : memref<4x32x8xf32, #tpu.memory_space<vmem>>, vector<1x32x8xf32>
    %52 = vector.shape_cast %51 : vector<1x32x8xf32> to vector<32x8xf32>
    %cst_29 = arith.constant dense<0.000000e+00> : vector<16x8xf32>
    %53 = tpu.matmul %3, %52, %cst_29 {dimension_numbers = #tpu.dot_dimension_numbers<[1], [0], [0], [1], [0, 0, 1, 1], [], []>} : vector<16x32xf32>, vector<32x8xf32>, vector<16x8xf32> -> vector<16x8xf32>
    %c1_30 = arith.constant 1 : index
    %c0_31 = arith.constant 0 : index
    %c0_32 = arith.constant 0 : index
    %54 = vector.load %arg3[%c1_30, %c0_31, %c0_32] : memref<4x32x8xf32, #tpu.memory_space<vmem>>, vector<1x32x8xf32>
    %55 = vector.shape_cast %54 : vector<1x32x8xf32> to vector<32x8xf32>
    %cst_33 = arith.constant dense<0.000000e+00> : vector<16x8xf32>
    %56 = tpu.matmul %3, %55, %cst_33 {dimension_numbers = #tpu.dot_dimension_numbers<[1], [0], [0], [1], [0, 0, 1, 1], [], []>} : vector<16x32xf32>, vector<32x8xf32>, vector<16x8xf32> -> vector<16x8xf32>
    %c1_34 = arith.constant 1 : index
    %c0_35 = arith.constant 0 : index
    %c0_36 = arith.constant 0 : index
    %57 = vector.load %arg4[%c1_34, %c0_35, %c0_36] : memref<4x32x8xf32, #tpu.memory_space<vmem>>, vector<1x32x8xf32>
    %58 = vector.shape_cast %57 : vector<1x32x8xf32> to vector<32x8xf32>
    %cst_37 = arith.constant dense<0.000000e+00> : vector<16x8xf32>
    %59 = tpu.matmul %3, %58, %cst_37 {dimension_numbers = #tpu.dot_dimension_numbers<[1], [0], [0], [1], [0, 0, 1, 1], [], []>} : vector<16x32xf32>, vector<32x8xf32>, vector<16x8xf32> -> vector<16x8xf32>
    %60 = vector.extract_strided_slice %53 {offsets = [0, 0], sizes = [8, 8], strides = [1, 1]} : vector<16x8xf32> to vector<8x8xf32>
    %61 = vector.extract_strided_slice %56 {offsets = [0, 0], sizes = [8, 8], strides = [1, 1]} : vector<16x8xf32> to vector<8x8xf32>
    %62 = tpu.transpose %61, [1, 0] : vector<8x8xf32> -> vector<8x8xf32>
    %cst_38 = arith.constant dense<0.000000e+00> : vector<8x8xf32>
    %63 = tpu.matmul %60, %62, %cst_38 {dimension_numbers = #tpu.dot_dimension_numbers<[1], [0], [0], [1], [0, 0, 1, 1], [], []>} : vector<8x8xf32>, vector<8x8xf32>, vector<8x8xf32> -> vector<8x8xf32>
    %cst_39 = arith.constant dense<0xFF800000> : vector<8xf32>
    %64 = vector.multi_reduction <maximumf>, %63, %cst_39 [1] : vector<8x8xf32> to vector<8xf32>
    %65 = vector.shape_cast %64 : vector<8xf32> to vector<8x1xf32>
    %66 = vector.broadcast %65 : vector<8x1xf32> to vector<8x8xf32>
    %67 = arith.subf %63, %66 : vector<8x8xf32>
    %68 = math.exp %67 : vector<8x8xf32>
    %cst_40 = arith.constant dense<0.000000e+00> : vector<8xf32>
    %69 = vector.multi_reduction <add>, %68, %cst_40 [1] : vector<8x8xf32> to vector<8xf32>
    %70 = vector.shape_cast %69 : vector<8xf32> to vector<8x1xf32>
    %71 = tpu.reciprocal %70 {approx = true} : vector<8x1xf32> -> vector<8x1xf32>
    %72 = vector.broadcast %71 : vector<8x1xf32> to vector<8x8xf32>
    %73 = arith.mulf %68, %72 : vector<8x8xf32>
    %74 = vector.extract_strided_slice %59 {offsets = [0, 0], sizes = [8, 8], strides = [1, 1]} : vector<16x8xf32> to vector<8x8xf32>
    %cst_41 = arith.constant dense<0.000000e+00> : vector<8x8xf32>
    %75 = tpu.matmul %73, %74, %cst_41 {dimension_numbers = #tpu.dot_dimension_numbers<[1], [0], [0], [1], [0, 0, 1, 1], [], []>} : vector<8x8xf32>, vector<8x8xf32>, vector<8x8xf32> -> vector<8x8xf32>
    %76 = vector.extract_strided_slice %53 {offsets = [8, 0], sizes = [8, 8], strides = [1, 1]} : vector<16x8xf32> to vector<8x8xf32>
    %77 = vector.extract_strided_slice %56 {offsets = [8, 0], sizes = [8, 8], strides = [1, 1]} : vector<16x8xf32> to vector<8x8xf32>
    %78 = tpu.transpose %77, [1, 0] : vector<8x8xf32> -> vector<8x8xf32>
    %cst_42 = arith.constant dense<0.000000e+00> : vector<8x8xf32>
    %79 = tpu.matmul %76, %78, %cst_42 {dimension_numbers = #tpu.dot_dimension_numbers<[1], [0], [0], [1], [0, 0, 1, 1], [], []>} : vector<8x8xf32>, vector<8x8xf32>, vector<8x8xf32> -> vector<8x8xf32>
    %cst_43 = arith.constant dense<0xFF800000> : vector<8xf32>
    %80 = vector.multi_reduction <maximumf>, %79, %cst_43 [1] : vector<8x8xf32> to vector<8xf32>
    %81 = vector.shape_cast %80 : vector<8xf32> to vector<8x1xf32>
    %82 = vector.broadcast %81 : vector<8x1xf32> to vector<8x8xf32>
    %83 = arith.subf %79, %82 : vector<8x8xf32>
    %84 = math.exp %83 : vector<8x8xf32>
    %cst_44 = arith.constant dense<0.000000e+00> : vector<8xf32>
    %85 = vector.multi_reduction <add>, %84, %cst_44 [1] : vector<8x8xf32> to vector<8xf32>
    %86 = vector.shape_cast %85 : vector<8xf32> to vector<8x1xf32>
    %87 = tpu.reciprocal %86 {approx = true} : vector<8x1xf32> -> vector<8x1xf32>
    %88 = vector.broadcast %87 : vector<8x1xf32> to vector<8x8xf32>
    %89 = arith.mulf %84, %88 : vector<8x8xf32>
    %90 = vector.extract_strided_slice %59 {offsets = [8, 0], sizes = [8, 8], strides = [1, 1]} : vector<16x8xf32> to vector<8x8xf32>
    %cst_45 = arith.constant dense<0.000000e+00> : vector<8x8xf32>
    %91 = tpu.matmul %89, %90, %cst_45 {dimension_numbers = #tpu.dot_dimension_numbers<[1], [0], [0], [1], [0, 0, 1, 1], [], []>} : vector<8x8xf32>, vector<8x8xf32>, vector<8x8xf32> -> vector<8x8xf32>
    %92 = tpu.concatenate %75, %91 in 0 : vector<8x8xf32>, vector<8x8xf32> -> vector<16x8xf32>
    %c1_46 = arith.constant 1 : index
    %c0_47 = arith.constant 0 : index
    %c0_48 = arith.constant 0 : index
    %93 = vector.load %arg5[%c1_46, %c0_47, %c0_48] : memref<4x8x32xf32, #tpu.memory_space<vmem>>, vector<1x8x32xf32>
    %94 = vector.shape_cast %93 : vector<1x8x32xf32> to vector<8x32xf32>
    %cst_49 = arith.constant dense<0.000000e+00> : vector<16x32xf32>
    %95 = tpu.matmul %92, %94, %cst_49 {dimension_numbers = #tpu.dot_dimension_numbers<[1], [0], [0], [1], [0, 0, 1, 1], [], []>} : vector<16x8xf32>, vector<8x32xf32>, vector<16x32xf32> -> vector<16x32xf32>
    %96 = arith.addf %50, %95 : vector<16x32xf32>
    %c2 = arith.constant 2 : index
    %c0_50 = arith.constant 0 : index
    %c0_51 = arith.constant 0 : index
    %97 = vector.load %arg2[%c2, %c0_50, %c0_51] : memref<4x32x8xf32, #tpu.memory_space<vmem>>, vector<1x32x8xf32>
    %98 = vector.shape_cast %97 : vector<1x32x8xf32> to vector<32x8xf32>
    %cst_52 = arith.constant dense<0.000000e+00> : vector<16x8xf32>
    %99 = tpu.matmul %3, %98, %cst_52 {dimension_numbers = #tpu.dot_dimension_numbers<[1], [0], [0], [1], [0, 0, 1, 1], [], []>} : vector<16x32xf32>, vector<32x8xf32>, vector<16x8xf32> -> vector<16x8xf32>
    %c2_53 = arith.constant 2 : index
    %c0_54 = arith.constant 0 : index
    %c0_55 = arith.constant 0 : index
    %100 = vector.load %arg3[%c2_53, %c0_54, %c0_55] : memref<4x32x8xf32, #tpu.memory_space<vmem>>, vector<1x32x8xf32>
    %101 = vector.shape_cast %100 : vector<1x32x8xf32> to vector<32x8xf32>
    %cst_56 = arith.constant dense<0.000000e+00> : vector<16x8xf32>
    %102 = tpu.matmul %3, %101, %cst_56 {dimension_numbers = #tpu.dot_dimension_numbers<[1], [0], [0], [1], [0, 0, 1, 1], [], []>} : vector<16x32xf32>, vector<32x8xf32>, vector<16x8xf32> -> vector<16x8xf32>
    %c2_57 = arith.constant 2 : index
    %c0_58 = arith.constant 0 : index
    %c0_59 = arith.constant 0 : index
    %103 = vector.load %arg4[%c2_57, %c0_58, %c0_59] : memref<4x32x8xf32, #tpu.memory_space<vmem>>, vector<1x32x8xf32>
    %104 = vector.shape_cast %103 : vector<1x32x8xf32> to vector<32x8xf32>
    %cst_60 = arith.constant dense<0.000000e+00> : vector<16x8xf32>
    %105 = tpu.matmul %3, %104, %cst_60 {dimension_numbers = #tpu.dot_dimension_numbers<[1], [0], [0], [1], [0, 0, 1, 1], [], []>} : vector<16x32xf32>, vector<32x8xf32>, vector<16x8xf32> -> vector<16x8xf32>
    %106 = vector.extract_strided_slice %99 {offsets = [0, 0], sizes = [8, 8], strides = [1, 1]} : vector<16x8xf32> to vector<8x8xf32>
    %107 = vector.extract_strided_slice %102 {offsets = [0, 0], sizes = [8, 8], strides = [1, 1]} : vector<16x8xf32> to vector<8x8xf32>
    %108 = tpu.transpose %107, [1, 0] : vector<8x8xf32> -> vector<8x8xf32>
    %cst_61 = arith.constant dense<0.000000e+00> : vector<8x8xf32>
    %109 = tpu.matmul %106, %108, %cst_61 {dimension_numbers = #tpu.dot_dimension_numbers<[1], [0], [0], [1], [0, 0, 1, 1], [], []>} : vector<8x8xf32>, vector<8x8xf32>, vector<8x8xf32> -> vector<8x8xf32>
    %cst_62 = arith.constant dense<0xFF800000> : vector<8xf32>
    %110 = vector.multi_reduction <maximumf>, %109, %cst_62 [1] : vector<8x8xf32> to vector<8xf32>
    %111 = vector.shape_cast %110 : vector<8xf32> to vector<8x1xf32>
    %112 = vector.broadcast %111 : vector<8x1xf32> to vector<8x8xf32>
    %113 = arith.subf %109, %112 : vector<8x8xf32>
    %114 = math.exp %113 : vector<8x8xf32>
    %cst_63 = arith.constant dense<0.000000e+00> : vector<8xf32>
    %115 = vector.multi_reduction <add>, %114, %cst_63 [1] : vector<8x8xf32> to vector<8xf32>
    %116 = vector.shape_cast %115 : vector<8xf32> to vector<8x1xf32>
    %117 = tpu.reciprocal %116 {approx = true} : vector<8x1xf32> -> vector<8x1xf32>
    %118 = vector.broadcast %117 : vector<8x1xf32> to vector<8x8xf32>
    %119 = arith.mulf %114, %118 : vector<8x8xf32>
    %120 = vector.extract_strided_slice %105 {offsets = [0, 0], sizes = [8, 8], strides = [1, 1]} : vector<16x8xf32> to vector<8x8xf32>
    %cst_64 = arith.constant dense<0.000000e+00> : vector<8x8xf32>
    %121 = tpu.matmul %119, %120, %cst_64 {dimension_numbers = #tpu.dot_dimension_numbers<[1], [0], [0], [1], [0, 0, 1, 1], [], []>} : vector<8x8xf32>, vector<8x8xf32>, vector<8x8xf32> -> vector<8x8xf32>
    %122 = vector.extract_strided_slice %99 {offsets = [8, 0], sizes = [8, 8], strides = [1, 1]} : vector<16x8xf32> to vector<8x8xf32>
    %123 = vector.extract_strided_slice %102 {offsets = [8, 0], sizes = [8, 8], strides = [1, 1]} : vector<16x8xf32> to vector<8x8xf32>
    %124 = tpu.transpose %123, [1, 0] : vector<8x8xf32> -> vector<8x8xf32>
    %cst_65 = arith.constant dense<0.000000e+00> : vector<8x8xf32>
    %125 = tpu.matmul %122, %124, %cst_65 {dimension_numbers = #tpu.dot_dimension_numbers<[1], [0], [0], [1], [0, 0, 1, 1], [], []>} : vector<8x8xf32>, vector<8x8xf32>, vector<8x8xf32> -> vector<8x8xf32>
    %cst_66 = arith.constant dense<0xFF800000> : vector<8xf32>
    %126 = vector.multi_reduction <maximumf>, %125, %cst_66 [1] : vector<8x8xf32> to vector<8xf32>
    %127 = vector.shape_cast %126 : vector<8xf32> to vector<8x1xf32>
    %128 = vector.broadcast %127 : vector<8x1xf32> to vector<8x8xf32>
    %129 = arith.subf %125, %128 : vector<8x8xf32>
    %130 = math.exp %129 : vector<8x8xf32>
    %cst_67 = arith.constant dense<0.000000e+00> : vector<8xf32>
    %131 = vector.multi_reduction <add>, %130, %cst_67 [1] : vector<8x8xf32> to vector<8xf32>
    %132 = vector.shape_cast %131 : vector<8xf32> to vector<8x1xf32>
    %133 = tpu.reciprocal %132 {approx = true} : vector<8x1xf32> -> vector<8x1xf32>
    %134 = vector.broadcast %133 : vector<8x1xf32> to vector<8x8xf32>
    %135 = arith.mulf %130, %134 : vector<8x8xf32>
    %136 = vector.extract_strided_slice %105 {offsets = [8, 0], sizes = [8, 8], strides = [1, 1]} : vector<16x8xf32> to vector<8x8xf32>
    %cst_68 = arith.constant dense<0.000000e+00> : vector<8x8xf32>
    %137 = tpu.matmul %135, %136, %cst_68 {dimension_numbers = #tpu.dot_dimension_numbers<[1], [0], [0], [1], [0, 0, 1, 1], [], []>} : vector<8x8xf32>, vector<8x8xf32>, vector<8x8xf32> -> vector<8x8xf32>
    %138 = tpu.concatenate %121, %137 in 0 : vector<8x8xf32>, vector<8x8xf32> -> vector<16x8xf32>
    %c2_69 = arith.constant 2 : index
    %c0_70 = arith.constant 0 : index
    %c0_71 = arith.constant 0 : index
    %139 = vector.load %arg5[%c2_69, %c0_70, %c0_71] : memref<4x8x32xf32, #tpu.memory_space<vmem>>, vector<1x8x32xf32>
    %140 = vector.shape_cast %139 : vector<1x8x32xf32> to vector<8x32xf32>
    %cst_72 = arith.constant dense<0.000000e+00> : vector<16x32xf32>
    %141 = tpu.matmul %138, %140, %cst_72 {dimension_numbers = #tpu.dot_dimension_numbers<[1], [0], [0], [1], [0, 0, 1, 1], [], []>} : vector<16x8xf32>, vector<8x32xf32>, vector<16x32xf32> -> vector<16x32xf32>
    %142 = arith.addf %96, %141 : vector<16x32xf32>
    %c3 = arith.constant 3 : index
    %c0_73 = arith.constant 0 : index
    %c0_74 = arith.constant 0 : index
    %143 = vector.load %arg2[%c3, %c0_73, %c0_74] : memref<4x32x8xf32, #tpu.memory_space<vmem>>, vector<1x32x8xf32>
    %144 = vector.shape_cast %143 : vector<1x32x8xf32> to vector<32x8xf32>
    %cst_75 = arith.constant dense<0.000000e+00> : vector<16x8xf32>
    %145 = tpu.matmul %3, %144, %cst_75 {dimension_numbers = #tpu.dot_dimension_numbers<[1], [0], [0], [1], [0, 0, 1, 1], [], []>} : vector<16x32xf32>, vector<32x8xf32>, vector<16x8xf32> -> vector<16x8xf32>
    %c3_76 = arith.constant 3 : index
    %c0_77 = arith.constant 0 : index
    %c0_78 = arith.constant 0 : index
    %146 = vector.load %arg3[%c3_76, %c0_77, %c0_78] : memref<4x32x8xf32, #tpu.memory_space<vmem>>, vector<1x32x8xf32>
    %147 = vector.shape_cast %146 : vector<1x32x8xf32> to vector<32x8xf32>
    %cst_79 = arith.constant dense<0.000000e+00> : vector<16x8xf32>
    %148 = tpu.matmul %3, %147, %cst_79 {dimension_numbers = #tpu.dot_dimension_numbers<[1], [0], [0], [1], [0, 0, 1, 1], [], []>} : vector<16x32xf32>, vector<32x8xf32>, vector<16x8xf32> -> vector<16x8xf32>
    %c3_80 = arith.constant 3 : index
    %c0_81 = arith.constant 0 : index
    %c0_82 = arith.constant 0 : index
    %149 = vector.load %arg4[%c3_80, %c0_81, %c0_82] : memref<4x32x8xf32, #tpu.memory_space<vmem>>, vector<1x32x8xf32>
    %150 = vector.shape_cast %149 : vector<1x32x8xf32> to vector<32x8xf32>
    %cst_83 = arith.constant dense<0.000000e+00> : vector<16x8xf32>
    %151 = tpu.matmul %3, %150, %cst_83 {dimension_numbers = #tpu.dot_dimension_numbers<[1], [0], [0], [1], [0, 0, 1, 1], [], []>} : vector<16x32xf32>, vector<32x8xf32>, vector<16x8xf32> -> vector<16x8xf32>
    %152 = vector.extract_strided_slice %145 {offsets = [0, 0], sizes = [8, 8], strides = [1, 1]} : vector<16x8xf32> to vector<8x8xf32>
    %153 = vector.extract_strided_slice %148 {offsets = [0, 0], sizes = [8, 8], strides = [1, 1]} : vector<16x8xf32> to vector<8x8xf32>
    %154 = tpu.transpose %153, [1, 0] : vector<8x8xf32> -> vector<8x8xf32>
    %cst_84 = arith.constant dense<0.000000e+00> : vector<8x8xf32>
    %155 = tpu.matmul %152, %154, %cst_84 {dimension_numbers = #tpu.dot_dimension_numbers<[1], [0], [0], [1], [0, 0, 1, 1], [], []>} : vector<8x8xf32>, vector<8x8xf32>, vector<8x8xf32> -> vector<8x8xf32>
    %cst_85 = arith.constant dense<0xFF800000> : vector<8xf32>
    %156 = vector.multi_reduction <maximumf>, %155, %cst_85 [1] : vector<8x8xf32> to vector<8xf32>
    %157 = vector.shape_cast %156 : vector<8xf32> to vector<8x1xf32>
    %158 = vector.broadcast %157 : vector<8x1xf32> to vector<8x8xf32>
    %159 = arith.subf %155, %158 : vector<8x8xf32>
    %160 = math.exp %159 : vector<8x8xf32>
    %cst_86 = arith.constant dense<0.000000e+00> : vector<8xf32>
    %161 = vector.multi_reduction <add>, %160, %cst_86 [1] : vector<8x8xf32> to vector<8xf32>
    %162 = vector.shape_cast %161 : vector<8xf32> to vector<8x1xf32>
    %163 = tpu.reciprocal %162 {approx = true} : vector<8x1xf32> -> vector<8x1xf32>
    %164 = vector.broadcast %163 : vector<8x1xf32> to vector<8x8xf32>
    %165 = arith.mulf %160, %164 : vector<8x8xf32>
    %166 = vector.extract_strided_slice %151 {offsets = [0, 0], sizes = [8, 8], strides = [1, 1]} : vector<16x8xf32> to vector<8x8xf32>
    %cst_87 = arith.constant dense<0.000000e+00> : vector<8x8xf32>
    %167 = tpu.matmul %165, %166, %cst_87 {dimension_numbers = #tpu.dot_dimension_numbers<[1], [0], [0], [1], [0, 0, 1, 1], [], []>} : vector<8x8xf32>, vector<8x8xf32>, vector<8x8xf32> -> vector<8x8xf32>
    %168 = vector.extract_strided_slice %145 {offsets = [8, 0], sizes = [8, 8], strides = [1, 1]} : vector<16x8xf32> to vector<8x8xf32>
    %169 = vector.extract_strided_slice %148 {offsets = [8, 0], sizes = [8, 8], strides = [1, 1]} : vector<16x8xf32> to vector<8x8xf32>
    %170 = tpu.transpose %169, [1, 0] : vector<8x8xf32> -> vector<8x8xf32>
    %cst_88 = arith.constant dense<0.000000e+00> : vector<8x8xf32>
    %171 = tpu.matmul %168, %170, %cst_88 {dimension_numbers = #tpu.dot_dimension_numbers<[1], [0], [0], [1], [0, 0, 1, 1], [], []>} : vector<8x8xf32>, vector<8x8xf32>, vector<8x8xf32> -> vector<8x8xf32>
    %cst_89 = arith.constant dense<0xFF800000> : vector<8xf32>
    %172 = vector.multi_reduction <maximumf>, %171, %cst_89 [1] : vector<8x8xf32> to vector<8xf32>
    %173 = vector.shape_cast %172 : vector<8xf32> to vector<8x1xf32>
    %174 = vector.broadcast %173 : vector<8x1xf32> to vector<8x8xf32>
    %175 = arith.subf %171, %174 : vector<8x8xf32>
    %176 = math.exp %175 : vector<8x8xf32>
    %cst_90 = arith.constant dense<0.000000e+00> : vector<8xf32>
    %177 = vector.multi_reduction <add>, %176, %cst_90 [1] : vector<8x8xf32> to vector<8xf32>
    %178 = vector.shape_cast %177 : vector<8xf32> to vector<8x1xf32>
    %179 = tpu.reciprocal %178 {approx = true} : vector<8x1xf32> -> vector<8x1xf32>
    %180 = vector.broadcast %179 : vector<8x1xf32> to vector<8x8xf32>
    %181 = arith.mulf %176, %180 : vector<8x8xf32>
    %182 = vector.extract_strided_slice %151 {offsets = [8, 0], sizes = [8, 8], strides = [1, 1]} : vector<16x8xf32> to vector<8x8xf32>
    %cst_91 = arith.constant dense<0.000000e+00> : vector<8x8xf32>
    %183 = tpu.matmul %181, %182, %cst_91 {dimension_numbers = #tpu.dot_dimension_numbers<[1], [0], [0], [1], [0, 0, 1, 1], [], []>} : vector<8x8xf32>, vector<8x8xf32>, vector<8x8xf32> -> vector<8x8xf32>
    %184 = tpu.concatenate %167, %183 in 0 : vector<8x8xf32>, vector<8x8xf32> -> vector<16x8xf32>
    %c3_92 = arith.constant 3 : index
    %c0_93 = arith.constant 0 : index
    %c0_94 = arith.constant 0 : index
    %185 = vector.load %arg5[%c3_92, %c0_93, %c0_94] : memref<4x8x32xf32, #tpu.memory_space<vmem>>, vector<1x8x32xf32>
    %186 = vector.shape_cast %185 : vector<1x8x32xf32> to vector<8x32xf32>
    %cst_95 = arith.constant dense<0.000000e+00> : vector<16x32xf32>
    %187 = tpu.matmul %184, %186, %cst_95 {dimension_numbers = #tpu.dot_dimension_numbers<[1], [0], [0], [1], [0, 0, 1, 1], [], []>} : vector<16x8xf32>, vector<8x32xf32>, vector<16x32xf32> -> vector<16x32xf32>
    %188 = arith.addf %142, %187 : vector<16x32xf32>
    %189 = arith.addf %188, %3 : vector<16x32xf32>
    %c0_96 = arith.constant 0 : index
    %c0_97 = arith.constant 0 : index
    %190 = vector.load %arg6[%c0_96, %c0_97] : memref<1x32xf32, #tpu.memory_space<vmem>>, vector<1x32xf32>
    %c0_98 = arith.constant 0 : index
    %c0_99 = arith.constant 0 : index
    %191 = vector.load %arg7[%c0_98, %c0_99] : memref<1x32xf32, #tpu.memory_space<vmem>>, vector<1x32xf32>
    %cst_100 = arith.constant dense<0.000000e+00> : vector<16xf32>
    %192 = vector.multi_reduction <add>, %189, %cst_100 [1] : vector<16x32xf32> to vector<16xf32>
    %193 = vector.shape_cast %192 : vector<16xf32> to vector<16x1xf32>
    %cst_101 = arith.constant 3.200000e+01 : f32
    %194 = vector.broadcast %cst_101 : f32 to vector<16x1xf32>
    %195 = arith.divf %193, %194 : vector<16x1xf32>
    %196 = vector.broadcast %195 : vector<16x1xf32> to vector<16x32xf32>
    %197 = arith.subf %189, %196 : vector<16x32xf32>
    %198 = arith.mulf %197, %197 : vector<16x32xf32>
    %cst_102 = arith.constant dense<0.000000e+00> : vector<16xf32>
    %199 = vector.multi_reduction <add>, %198, %cst_102 [1] : vector<16x32xf32> to vector<16xf32>
    %200 = vector.shape_cast %199 : vector<16xf32> to vector<16x1xf32>
    %cst_103 = arith.constant 3.200000e+01 : f32
    %201 = vector.broadcast %cst_103 : f32 to vector<16x1xf32>
    %202 = arith.divf %200, %201 : vector<16x1xf32>
    %203 = vector.broadcast %195 : vector<16x1xf32> to vector<16x32xf32>
    %204 = arith.subf %189, %203 : vector<16x32xf32>
    %cst_104 = arith.constant 9.99999997E-7 : f32
    %205 = vector.broadcast %cst_104 : f32 to vector<16x1xf32>
    %206 = arith.addf %202, %205 : vector<16x1xf32>
    %207 = math.rsqrt %206 : vector<16x1xf32>
    %208 = vector.broadcast %207 : vector<16x1xf32> to vector<16x32xf32>
    %209 = arith.mulf %204, %208 : vector<16x32xf32>
    %210 = vector.broadcast %190 : vector<1x32xf32> to vector<16x32xf32>
    %211 = arith.mulf %209, %210 : vector<16x32xf32>
    %212 = vector.broadcast %191 : vector<1x32xf32> to vector<16x32xf32>
    %213 = arith.addf %211, %212 : vector<16x32xf32>
    %c0_105 = arith.constant 0 : index
    %c0_106 = arith.constant 0 : index
    %214 = vector.load %arg8[%c0_105, %c0_106] : memref<32x64xf32, #tpu.memory_space<vmem>>, vector<32x64xf32>
    %cst_107 = arith.constant dense<0.000000e+00> : vector<16x64xf32>
    %215 = tpu.matmul %213, %214, %cst_107 {dimension_numbers = #tpu.dot_dimension_numbers<[1], [0], [0], [1], [0, 0, 1, 1], [], []>} : vector<16x32xf32>, vector<32x64xf32>, vector<16x64xf32> -> vector<16x64xf32>
    %c0_108 = arith.constant 0 : index
    %c0_109 = arith.constant 0 : index
    %216 = vector.load %arg9[%c0_108, %c0_109] : memref<1x64xf32, #tpu.memory_space<vmem>>, vector<1x64xf32>
    %217 = vector.broadcast %216 : vector<1x64xf32> to vector<16x64xf32>
    %218 = arith.addf %215, %217 : vector<16x64xf32>
    %cst_110 = arith.constant 0.000000e+00 : f32
    %219 = vector.broadcast %cst_110 : f32 to vector<16x64xf32>
    %220 = arith.maximumf %218, %219 : vector<16x64xf32>
    %c0_111 = arith.constant 0 : index
    %c0_112 = arith.constant 0 : index
    %221 = vector.load %arg10[%c0_111, %c0_112] : memref<64x32xf32, #tpu.memory_space<vmem>>, vector<64x32xf32>
    %cst_113 = arith.constant dense<0.000000e+00> : vector<16x32xf32>
    %222 = tpu.matmul %220, %221, %cst_113 {dimension_numbers = #tpu.dot_dimension_numbers<[1], [0], [0], [1], [0, 0, 1, 1], [], []>} : vector<16x64xf32>, vector<64x32xf32>, vector<16x32xf32> -> vector<16x32xf32>
    %c0_114 = arith.constant 0 : index
    %c0_115 = arith.constant 0 : index
    %223 = vector.load %arg11[%c0_114, %c0_115] : memref<1x32xf32, #tpu.memory_space<vmem>>, vector<1x32xf32>
    %224 = vector.broadcast %223 : vector<1x32xf32> to vector<16x32xf32>
    %225 = arith.addf %222, %224 : vector<16x32xf32>
    %226 = arith.addf %225, %213 : vector<16x32xf32>
    %c0_116 = arith.constant 0 : index
    %c0_117 = arith.constant 0 : index
    %227 = vector.load %arg12[%c0_116, %c0_117] : memref<1x32xf32, #tpu.memory_space<vmem>>, vector<1x32xf32>
    %c0_118 = arith.constant 0 : index
    %c0_119 = arith.constant 0 : index
    %228 = vector.load %arg13[%c0_118, %c0_119] : memref<1x32xf32, #tpu.memory_space<vmem>>, vector<1x32xf32>
    %cst_120 = arith.constant dense<0.000000e+00> : vector<16xf32>
    %229 = vector.multi_reduction <add>, %226, %cst_120 [1] : vector<16x32xf32> to vector<16xf32>
    %230 = vector.shape_cast %229 : vector<16xf32> to vector<16x1xf32>
    %cst_121 = arith.constant 3.200000e+01 : f32
    %231 = vector.broadcast %cst_121 : f32 to vector<16x1xf32>
    %232 = arith.divf %230, %231 : vector<16x1xf32>
    %233 = vector.broadcast %232 : vector<16x1xf32> to vector<16x32xf32>
    %234 = arith.subf %226, %233 : vector<16x32xf32>
    %235 = arith.mulf %234, %234 : vector<16x32xf32>
    %cst_122 = arith.constant dense<0.000000e+00> : vector<16xf32>
    %236 = vector.multi_reduction <add>, %235, %cst_122 [1] : vector<16x32xf32> to vector<16xf32>
    %237 = vector.shape_cast %236 : vector<16xf32> to vector<16x1xf32>
    %cst_123 = arith.constant 3.200000e+01 : f32
    %238 = vector.broadcast %cst_123 : f32 to vector<16x1xf32>
    %239 = arith.divf %237, %238 : vector<16x1xf32>
    %240 = vector.broadcast %232 : vector<16x1xf32> to vector<16x32xf32>
    %241 = arith.subf %226, %240 : vector<16x32xf32>
    %cst_124 = arith.constant 9.99999997E-7 : f32
    %242 = vector.broadcast %cst_124 : f32 to vector<16x1xf32>
    %243 = arith.addf %239, %242 : vector<16x1xf32>
    %244 = math.rsqrt %243 : vector<16x1xf32>
    %245 = vector.broadcast %244 : vector<16x1xf32> to vector<16x32xf32>
    %246 = arith.mulf %241, %245 : vector<16x32xf32>
    %247 = vector.broadcast %227 : vector<1x32xf32> to vector<16x32xf32>
    %248 = arith.mulf %246, %247 : vector<16x32xf32>
    %249 = vector.broadcast %228 : vector<1x32xf32> to vector<16x32xf32>
    %250 = arith.addf %248, %249 : vector<16x32xf32>
    %cst_125 = arith.constant 0.000000e+00 : f32
    %251 = vector.broadcast %cst_125 : f32 to vector<16x32xf32>
    %c0_126 = arith.constant 0 : index
    %c0_127 = arith.constant 0 : index
    %c0_128 = arith.constant 0 : index
    %252 = vector.load %arg14[%c0_126, %c0_127, %c0_128] : memref<4x32x8xf32, #tpu.memory_space<vmem>>, vector<1x32x8xf32>
    %253 = vector.shape_cast %252 : vector<1x32x8xf32> to vector<32x8xf32>
    %cst_129 = arith.constant dense<0.000000e+00> : vector<16x8xf32>
    %254 = tpu.matmul %250, %253, %cst_129 {dimension_numbers = #tpu.dot_dimension_numbers<[1], [0], [0], [1], [0, 0, 1, 1], [], []>} : vector<16x32xf32>, vector<32x8xf32>, vector<16x8xf32> -> vector<16x8xf32>
    %c0_130 = arith.constant 0 : index
    %c0_131 = arith.constant 0 : index
    %c0_132 = arith.constant 0 : index
    %255 = vector.load %arg15[%c0_130, %c0_131, %c0_132] : memref<4x32x8xf32, #tpu.memory_space<vmem>>, vector<1x32x8xf32>
    %256 = vector.shape_cast %255 : vector<1x32x8xf32> to vector<32x8xf32>
    %cst_133 = arith.constant dense<0.000000e+00> : vector<16x8xf32>
    %257 = tpu.matmul %250, %256, %cst_133 {dimension_numbers = #tpu.dot_dimension_numbers<[1], [0], [0], [1], [0, 0, 1, 1], [], []>} : vector<16x32xf32>, vector<32x8xf32>, vector<16x8xf32> -> vector<16x8xf32>
    %c0_134 = arith.constant 0 : index
    %c0_135 = arith.constant 0 : index
    %c0_136 = arith.constant 0 : index
    %258 = vector.load %arg16[%c0_134, %c0_135, %c0_136] : memref<4x32x8xf32, #tpu.memory_space<vmem>>, vector<1x32x8xf32>
    %259 = vector.shape_cast %258 : vector<1x32x8xf32> to vector<32x8xf32>
    %cst_137 = arith.constant dense<0.000000e+00> : vector<16x8xf32>
    %260 = tpu.matmul %250, %259, %cst_137 {dimension_numbers = #tpu.dot_dimension_numbers<[1], [0], [0], [1], [0, 0, 1, 1], [], []>} : vector<16x32xf32>, vector<32x8xf32>, vector<16x8xf32> -> vector<16x8xf32>
    %261 = vector.extract_strided_slice %254 {offsets = [0, 0], sizes = [8, 8], strides = [1, 1]} : vector<16x8xf32> to vector<8x8xf32>
    %262 = vector.extract_strided_slice %257 {offsets = [0, 0], sizes = [8, 8], strides = [1, 1]} : vector<16x8xf32> to vector<8x8xf32>
    %263 = tpu.transpose %262, [1, 0] : vector<8x8xf32> -> vector<8x8xf32>
    %cst_138 = arith.constant dense<0.000000e+00> : vector<8x8xf32>
    %264 = tpu.matmul %261, %263, %cst_138 {dimension_numbers = #tpu.dot_dimension_numbers<[1], [0], [0], [1], [0, 0, 1, 1], [], []>} : vector<8x8xf32>, vector<8x8xf32>, vector<8x8xf32> -> vector<8x8xf32>
    %cst_139 = arith.constant dense<0xFF800000> : vector<8xf32>
    %265 = vector.multi_reduction <maximumf>, %264, %cst_139 [1] : vector<8x8xf32> to vector<8xf32>
    %266 = vector.shape_cast %265 : vector<8xf32> to vector<8x1xf32>
    %267 = vector.broadcast %266 : vector<8x1xf32> to vector<8x8xf32>
    %268 = arith.subf %264, %267 : vector<8x8xf32>
    %269 = math.exp %268 : vector<8x8xf32>
    %cst_140 = arith.constant dense<0.000000e+00> : vector<8xf32>
    %270 = vector.multi_reduction <add>, %269, %cst_140 [1] : vector<8x8xf32> to vector<8xf32>
    %271 = vector.shape_cast %270 : vector<8xf32> to vector<8x1xf32>
    %272 = tpu.reciprocal %271 {approx = true} : vector<8x1xf32> -> vector<8x1xf32>
    %273 = vector.broadcast %272 : vector<8x1xf32> to vector<8x8xf32>
    %274 = arith.mulf %269, %273 : vector<8x8xf32>
    %275 = vector.extract_strided_slice %260 {offsets = [0, 0], sizes = [8, 8], strides = [1, 1]} : vector<16x8xf32> to vector<8x8xf32>
    %cst_141 = arith.constant dense<0.000000e+00> : vector<8x8xf32>
    %276 = tpu.matmul %274, %275, %cst_141 {dimension_numbers = #tpu.dot_dimension_numbers<[1], [0], [0], [1], [0, 0, 1, 1], [], []>} : vector<8x8xf32>, vector<8x8xf32>, vector<8x8xf32> -> vector<8x8xf32>
    %277 = vector.extract_strided_slice %254 {offsets = [8, 0], sizes = [8, 8], strides = [1, 1]} : vector<16x8xf32> to vector<8x8xf32>
    %278 = vector.extract_strided_slice %257 {offsets = [8, 0], sizes = [8, 8], strides = [1, 1]} : vector<16x8xf32> to vector<8x8xf32>
    %279 = tpu.transpose %278, [1, 0] : vector<8x8xf32> -> vector<8x8xf32>
    %cst_142 = arith.constant dense<0.000000e+00> : vector<8x8xf32>
    %280 = tpu.matmul %277, %279, %cst_142 {dimension_numbers = #tpu.dot_dimension_numbers<[1], [0], [0], [1], [0, 0, 1, 1], [], []>} : vector<8x8xf32>, vector<8x8xf32>, vector<8x8xf32> -> vector<8x8xf32>
    %cst_143 = arith.constant dense<0xFF800000> : vector<8xf32>
    %281 = vector.multi_reduction <maximumf>, %280, %cst_143 [1] : vector<8x8xf32> to vector<8xf32>
    %282 = vector.shape_cast %281 : vector<8xf32> to vector<8x1xf32>
    %283 = vector.broadcast %282 : vector<8x1xf32> to vector<8x8xf32>
    %284 = arith.subf %280, %283 : vector<8x8xf32>
    %285 = math.exp %284 : vector<8x8xf32>
    %cst_144 = arith.constant dense<0.000000e+00> : vector<8xf32>
    %286 = vector.multi_reduction <add>, %285, %cst_144 [1] : vector<8x8xf32> to vector<8xf32>
    %287 = vector.shape_cast %286 : vector<8xf32> to vector<8x1xf32>
    %288 = tpu.reciprocal %287 {approx = true} : vector<8x1xf32> -> vector<8x1xf32>
    %289 = vector.broadcast %288 : vector<8x1xf32> to vector<8x8xf32>
    %290 = arith.mulf %285, %289 : vector<8x8xf32>
    %291 = vector.extract_strided_slice %260 {offsets = [8, 0], sizes = [8, 8], strides = [1, 1]} : vector<16x8xf32> to vector<8x8xf32>
    %cst_145 = arith.constant dense<0.000000e+00> : vector<8x8xf32>
    %292 = tpu.matmul %290, %291, %cst_145 {dimension_numbers = #tpu.dot_dimension_numbers<[1], [0], [0], [1], [0, 0, 1, 1], [], []>} : vector<8x8xf32>, vector<8x8xf32>, vector<8x8xf32> -> vector<8x8xf32>
    %293 = tpu.concatenate %276, %292 in 0 : vector<8x8xf32>, vector<8x8xf32> -> vector<16x8xf32>
    %c0_146 = arith.constant 0 : index
    %c0_147 = arith.constant 0 : index
    %c0_148 = arith.constant 0 : index
    %294 = vector.load %arg17[%c0_146, %c0_147, %c0_148] : memref<4x8x32xf32, #tpu.memory_space<vmem>>, vector<1x8x32xf32>
    %295 = vector.shape_cast %294 : vector<1x8x32xf32> to vector<8x32xf32>
    %cst_149 = arith.constant dense<0.000000e+00> : vector<16x32xf32>
    %296 = tpu.matmul %293, %295, %cst_149 {dimension_numbers = #tpu.dot_dimension_numbers<[1], [0], [0], [1], [0, 0, 1, 1], [], []>} : vector<16x8xf32>, vector<8x32xf32>, vector<16x32xf32> -> vector<16x32xf32>
    %297 = arith.addf %251, %296 : vector<16x32xf32>
    %c1_150 = arith.constant 1 : index
    %c0_151 = arith.constant 0 : index
    %c0_152 = arith.constant 0 : index
    %298 = vector.load %arg14[%c1_150, %c0_151, %c0_152] : memref<4x32x8xf32, #tpu.memory_space<vmem>>, vector<1x32x8xf32>
    %299 = vector.shape_cast %298 : vector<1x32x8xf32> to vector<32x8xf32>
    %cst_153 = arith.constant dense<0.000000e+00> : vector<16x8xf32>
    %300 = tpu.matmul %250, %299, %cst_153 {dimension_numbers = #tpu.dot_dimension_numbers<[1], [0], [0], [1], [0, 0, 1, 1], [], []>} : vector<16x32xf32>, vector<32x8xf32>, vector<16x8xf32> -> vector<16x8xf32>
    %c1_154 = arith.constant 1 : index
    %c0_155 = arith.constant 0 : index
    %c0_156 = arith.constant 0 : index
    %301 = vector.load %arg15[%c1_154, %c0_155, %c0_156] : memref<4x32x8xf32, #tpu.memory_space<vmem>>, vector<1x32x8xf32>
    %302 = vector.shape_cast %301 : vector<1x32x8xf32> to vector<32x8xf32>
    %cst_157 = arith.constant dense<0.000000e+00> : vector<16x8xf32>
    %303 = tpu.matmul %250, %302, %cst_157 {dimension_numbers = #tpu.dot_dimension_numbers<[1], [0], [0], [1], [0, 0, 1, 1], [], []>} : vector<16x32xf32>, vector<32x8xf32>, vector<16x8xf32> -> vector<16x8xf32>
    %c1_158 = arith.constant 1 : index
    %c0_159 = arith.constant 0 : index
    %c0_160 = arith.constant 0 : index
    %304 = vector.load %arg16[%c1_158, %c0_159, %c0_160] : memref<4x32x8xf32, #tpu.memory_space<vmem>>, vector<1x32x8xf32>
    %305 = vector.shape_cast %304 : vector<1x32x8xf32> to vector<32x8xf32>
    %cst_161 = arith.constant dense<0.000000e+00> : vector<16x8xf32>
    %306 = tpu.matmul %250, %305, %cst_161 {dimension_numbers = #tpu.dot_dimension_numbers<[1], [0], [0], [1], [0, 0, 1, 1], [], []>} : vector<16x32xf32>, vector<32x8xf32>, vector<16x8xf32> -> vector<16x8xf32>
    %307 = vector.extract_strided_slice %300 {offsets = [0, 0], sizes = [8, 8], strides = [1, 1]} : vector<16x8xf32> to vector<8x8xf32>
    %308 = vector.extract_strided_slice %303 {offsets = [0, 0], sizes = [8, 8], strides = [1, 1]} : vector<16x8xf32> to vector<8x8xf32>
    %309 = tpu.transpose %308, [1, 0] : vector<8x8xf32> -> vector<8x8xf32>
    %cst_162 = arith.constant dense<0.000000e+00> : vector<8x8xf32>
    %310 = tpu.matmul %307, %309, %cst_162 {dimension_numbers = #tpu.dot_dimension_numbers<[1], [0], [0], [1], [0, 0, 1, 1], [], []>} : vector<8x8xf32>, vector<8x8xf32>, vector<8x8xf32> -> vector<8x8xf32>
    %cst_163 = arith.constant dense<0xFF800000> : vector<8xf32>
    %311 = vector.multi_reduction <maximumf>, %310, %cst_163 [1] : vector<8x8xf32> to vector<8xf32>
    %312 = vector.shape_cast %311 : vector<8xf32> to vector<8x1xf32>
    %313 = vector.broadcast %312 : vector<8x1xf32> to vector<8x8xf32>
    %314 = arith.subf %310, %313 : vector<8x8xf32>
    %315 = math.exp %314 : vector<8x8xf32>
    %cst_164 = arith.constant dense<0.000000e+00> : vector<8xf32>
    %316 = vector.multi_reduction <add>, %315, %cst_164 [1] : vector<8x8xf32> to vector<8xf32>
    %317 = vector.shape_cast %316 : vector<8xf32> to vector<8x1xf32>
    %318 = tpu.reciprocal %317 {approx = true} : vector<8x1xf32> -> vector<8x1xf32>
    %319 = vector.broadcast %318 : vector<8x1xf32> to vector<8x8xf32>
    %320 = arith.mulf %315, %319 : vector<8x8xf32>
    %321 = vector.extract_strided_slice %306 {offsets = [0, 0], sizes = [8, 8], strides = [1, 1]} : vector<16x8xf32> to vector<8x8xf32>
    %cst_165 = arith.constant dense<0.000000e+00> : vector<8x8xf32>
    %322 = tpu.matmul %320, %321, %cst_165 {dimension_numbers = #tpu.dot_dimension_numbers<[1], [0], [0], [1], [0, 0, 1, 1], [], []>} : vector<8x8xf32>, vector<8x8xf32>, vector<8x8xf32> -> vector<8x8xf32>
    %323 = vector.extract_strided_slice %300 {offsets = [8, 0], sizes = [8, 8], strides = [1, 1]} : vector<16x8xf32> to vector<8x8xf32>
    %324 = vector.extract_strided_slice %303 {offsets = [8, 0], sizes = [8, 8], strides = [1, 1]} : vector<16x8xf32> to vector<8x8xf32>
    %325 = tpu.transpose %324, [1, 0] : vector<8x8xf32> -> vector<8x8xf32>
    %cst_166 = arith.constant dense<0.000000e+00> : vector<8x8xf32>
    %326 = tpu.matmul %323, %325, %cst_166 {dimension_numbers = #tpu.dot_dimension_numbers<[1], [0], [0], [1], [0, 0, 1, 1], [], []>} : vector<8x8xf32>, vector<8x8xf32>, vector<8x8xf32> -> vector<8x8xf32>
    %cst_167 = arith.constant dense<0xFF800000> : vector<8xf32>
    %327 = vector.multi_reduction <maximumf>, %326, %cst_167 [1] : vector<8x8xf32> to vector<8xf32>
    %328 = vector.shape_cast %327 : vector<8xf32> to vector<8x1xf32>
    %329 = vector.broadcast %328 : vector<8x1xf32> to vector<8x8xf32>
    %330 = arith.subf %326, %329 : vector<8x8xf32>
    %331 = math.exp %330 : vector<8x8xf32>
    %cst_168 = arith.constant dense<0.000000e+00> : vector<8xf32>
    %332 = vector.multi_reduction <add>, %331, %cst_168 [1] : vector<8x8xf32> to vector<8xf32>
    %333 = vector.shape_cast %332 : vector<8xf32> to vector<8x1xf32>
    %334 = tpu.reciprocal %333 {approx = true} : vector<8x1xf32> -> vector<8x1xf32>
    %335 = vector.broadcast %334 : vector<8x1xf32> to vector<8x8xf32>
    %336 = arith.mulf %331, %335 : vector<8x8xf32>
    %337 = vector.extract_strided_slice %306 {offsets = [8, 0], sizes = [8, 8], strides = [1, 1]} : vector<16x8xf32> to vector<8x8xf32>
    %cst_169 = arith.constant dense<0.000000e+00> : vector<8x8xf32>
    %338 = tpu.matmul %336, %337, %cst_169 {dimension_numbers = #tpu.dot_dimension_numbers<[1], [0], [0], [1], [0, 0, 1, 1], [], []>} : vector<8x8xf32>, vector<8x8xf32>, vector<8x8xf32> -> vector<8x8xf32>
    %339 = tpu.concatenate %322, %338 in 0 : vector<8x8xf32>, vector<8x8xf32> -> vector<16x8xf32>
    %c1_170 = arith.constant 1 : index
    %c0_171 = arith.constant 0 : index
    %c0_172 = arith.constant 0 : index
    %340 = vector.load %arg17[%c1_170, %c0_171, %c0_172] : memref<4x8x32xf32, #tpu.memory_space<vmem>>, vector<1x8x32xf32>
    %341 = vector.shape_cast %340 : vector<1x8x32xf32> to vector<8x32xf32>
    %cst_173 = arith.constant dense<0.000000e+00> : vector<16x32xf32>
    %342 = tpu.matmul %339, %341, %cst_173 {dimension_numbers = #tpu.dot_dimension_numbers<[1], [0], [0], [1], [0, 0, 1, 1], [], []>} : vector<16x8xf32>, vector<8x32xf32>, vector<16x32xf32> -> vector<16x32xf32>
    %343 = arith.addf %297, %342 : vector<16x32xf32>
    %c2_174 = arith.constant 2 : index
    %c0_175 = arith.constant 0 : index
    %c0_176 = arith.constant 0 : index
    %344 = vector.load %arg14[%c2_174, %c0_175, %c0_176] : memref<4x32x8xf32, #tpu.memory_space<vmem>>, vector<1x32x8xf32>
    %345 = vector.shape_cast %344 : vector<1x32x8xf32> to vector<32x8xf32>
    %cst_177 = arith.constant dense<0.000000e+00> : vector<16x8xf32>
    %346 = tpu.matmul %250, %345, %cst_177 {dimension_numbers = #tpu.dot_dimension_numbers<[1], [0], [0], [1], [0, 0, 1, 1], [], []>} : vector<16x32xf32>, vector<32x8xf32>, vector<16x8xf32> -> vector<16x8xf32>
    %c2_178 = arith.constant 2 : index
    %c0_179 = arith.constant 0 : index
    %c0_180 = arith.constant 0 : index
    %347 = vector.load %arg15[%c2_178, %c0_179, %c0_180] : memref<4x32x8xf32, #tpu.memory_space<vmem>>, vector<1x32x8xf32>
    %348 = vector.shape_cast %347 : vector<1x32x8xf32> to vector<32x8xf32>
    %cst_181 = arith.constant dense<0.000000e+00> : vector<16x8xf32>
    %349 = tpu.matmul %250, %348, %cst_181 {dimension_numbers = #tpu.dot_dimension_numbers<[1], [0], [0], [1], [0, 0, 1, 1], [], []>} : vector<16x32xf32>, vector<32x8xf32>, vector<16x8xf32> -> vector<16x8xf32>
    %c2_182 = arith.constant 2 : index
    %c0_183 = arith.constant 0 : index
    %c0_184 = arith.constant 0 : index
    %350 = vector.load %arg16[%c2_182, %c0_183, %c0_184] : memref<4x32x8xf32, #tpu.memory_space<vmem>>, vector<1x32x8xf32>
    %351 = vector.shape_cast %350 : vector<1x32x8xf32> to vector<32x8xf32>
    %cst_185 = arith.constant dense<0.000000e+00> : vector<16x8xf32>
    %352 = tpu.matmul %250, %351, %cst_185 {dimension_numbers = #tpu.dot_dimension_numbers<[1], [0], [0], [1], [0, 0, 1, 1], [], []>} : vector<16x32xf32>, vector<32x8xf32>, vector<16x8xf32> -> vector<16x8xf32>
    %353 = vector.extract_strided_slice %346 {offsets = [0, 0], sizes = [8, 8], strides = [1, 1]} : vector<16x8xf32> to vector<8x8xf32>
    %354 = vector.extract_strided_slice %349 {offsets = [0, 0], sizes = [8, 8], strides = [1, 1]} : vector<16x8xf32> to vector<8x8xf32>
    %355 = tpu.transpose %354, [1, 0] : vector<8x8xf32> -> vector<8x8xf32>
    %cst_186 = arith.constant dense<0.000000e+00> : vector<8x8xf32>
    %356 = tpu.matmul %353, %355, %cst_186 {dimension_numbers = #tpu.dot_dimension_numbers<[1], [0], [0], [1], [0, 0, 1, 1], [], []>} : vector<8x8xf32>, vector<8x8xf32>, vector<8x8xf32> -> vector<8x8xf32>
    %cst_187 = arith.constant dense<0xFF800000> : vector<8xf32>
    %357 = vector.multi_reduction <maximumf>, %356, %cst_187 [1] : vector<8x8xf32> to vector<8xf32>
    %358 = vector.shape_cast %357 : vector<8xf32> to vector<8x1xf32>
    %359 = vector.broadcast %358 : vector<8x1xf32> to vector<8x8xf32>
    %360 = arith.subf %356, %359 : vector<8x8xf32>
    %361 = math.exp %360 : vector<8x8xf32>
    %cst_188 = arith.constant dense<0.000000e+00> : vector<8xf32>
    %362 = vector.multi_reduction <add>, %361, %cst_188 [1] : vector<8x8xf32> to vector<8xf32>
    %363 = vector.shape_cast %362 : vector<8xf32> to vector<8x1xf32>
    %364 = tpu.reciprocal %363 {approx = true} : vector<8x1xf32> -> vector<8x1xf32>
    %365 = vector.broadcast %364 : vector<8x1xf32> to vector<8x8xf32>
    %366 = arith.mulf %361, %365 : vector<8x8xf32>
    %367 = vector.extract_strided_slice %352 {offsets = [0, 0], sizes = [8, 8], strides = [1, 1]} : vector<16x8xf32> to vector<8x8xf32>
    %cst_189 = arith.constant dense<0.000000e+00> : vector<8x8xf32>
    %368 = tpu.matmul %366, %367, %cst_189 {dimension_numbers = #tpu.dot_dimension_numbers<[1], [0], [0], [1], [0, 0, 1, 1], [], []>} : vector<8x8xf32>, vector<8x8xf32>, vector<8x8xf32> -> vector<8x8xf32>
    %369 = vector.extract_strided_slice %346 {offsets = [8, 0], sizes = [8, 8], strides = [1, 1]} : vector<16x8xf32> to vector<8x8xf32>
    %370 = vector.extract_strided_slice %349 {offsets = [8, 0], sizes = [8, 8], strides = [1, 1]} : vector<16x8xf32> to vector<8x8xf32>
    %371 = tpu.transpose %370, [1, 0] : vector<8x8xf32> -> vector<8x8xf32>
    %cst_190 = arith.constant dense<0.000000e+00> : vector<8x8xf32>
    %372 = tpu.matmul %369, %371, %cst_190 {dimension_numbers = #tpu.dot_dimension_numbers<[1], [0], [0], [1], [0, 0, 1, 1], [], []>} : vector<8x8xf32>, vector<8x8xf32>, vector<8x8xf32> -> vector<8x8xf32>
    %cst_191 = arith.constant dense<0xFF800000> : vector<8xf32>
    %373 = vector.multi_reduction <maximumf>, %372, %cst_191 [1] : vector<8x8xf32> to vector<8xf32>
    %374 = vector.shape_cast %373 : vector<8xf32> to vector<8x1xf32>
    %375 = vector.broadcast %374 : vector<8x1xf32> to vector<8x8xf32>
    %376 = arith.subf %372, %375 : vector<8x8xf32>
    %377 = math.exp %376 : vector<8x8xf32>
    %cst_192 = arith.constant dense<0.000000e+00> : vector<8xf32>
    %378 = vector.multi_reduction <add>, %377, %cst_192 [1] : vector<8x8xf32> to vector<8xf32>
    %379 = vector.shape_cast %378 : vector<8xf32> to vector<8x1xf32>
    %380 = tpu.reciprocal %379 {approx = true} : vector<8x1xf32> -> vector<8x1xf32>
    %381 = vector.broadcast %380 : vector<8x1xf32> to vector<8x8xf32>
    %382 = arith.mulf %377, %381 : vector<8x8xf32>
    %383 = vector.extract_strided_slice %352 {offsets = [8, 0], sizes = [8, 8], strides = [1, 1]} : vector<16x8xf32> to vector<8x8xf32>
    %cst_193 = arith.constant dense<0.000000e+00> : vector<8x8xf32>
    %384 = tpu.matmul %382, %383, %cst_193 {dimension_numbers = #tpu.dot_dimension_numbers<[1], [0], [0], [1], [0, 0, 1, 1], [], []>} : vector<8x8xf32>, vector<8x8xf32>, vector<8x8xf32> -> vector<8x8xf32>
    %385 = tpu.concatenate %368, %384 in 0 : vector<8x8xf32>, vector<8x8xf32> -> vector<16x8xf32>
    %c2_194 = arith.constant 2 : index
    %c0_195 = arith.constant 0 : index
    %c0_196 = arith.constant 0 : index
    %386 = vector.load %arg17[%c2_194, %c0_195, %c0_196] : memref<4x8x32xf32, #tpu.memory_space<vmem>>, vector<1x8x32xf32>
    %387 = vector.shape_cast %386 : vector<1x8x32xf32> to vector<8x32xf32>
    %cst_197 = arith.constant dense<0.000000e+00> : vector<16x32xf32>
    %388 = tpu.matmul %385, %387, %cst_197 {dimension_numbers = #tpu.dot_dimension_numbers<[1], [0], [0], [1], [0, 0, 1, 1], [], []>} : vector<16x8xf32>, vector<8x32xf32>, vector<16x32xf32> -> vector<16x32xf32>
    %389 = arith.addf %343, %388 : vector<16x32xf32>
    %c3_198 = arith.constant 3 : index
    %c0_199 = arith.constant 0 : index
    %c0_200 = arith.constant 0 : index
    %390 = vector.load %arg14[%c3_198, %c0_199, %c0_200] : memref<4x32x8xf32, #tpu.memory_space<vmem>>, vector<1x32x8xf32>
    %391 = vector.shape_cast %390 : vector<1x32x8xf32> to vector<32x8xf32>
    %cst_201 = arith.constant dense<0.000000e+00> : vector<16x8xf32>
    %392 = tpu.matmul %250, %391, %cst_201 {dimension_numbers = #tpu.dot_dimension_numbers<[1], [0], [0], [1], [0, 0, 1, 1], [], []>} : vector<16x32xf32>, vector<32x8xf32>, vector<16x8xf32> -> vector<16x8xf32>
    %c3_202 = arith.constant 3 : index
    %c0_203 = arith.constant 0 : index
    %c0_204 = arith.constant 0 : index
    %393 = vector.load %arg15[%c3_202, %c0_203, %c0_204] : memref<4x32x8xf32, #tpu.memory_space<vmem>>, vector<1x32x8xf32>
    %394 = vector.shape_cast %393 : vector<1x32x8xf32> to vector<32x8xf32>
    %cst_205 = arith.constant dense<0.000000e+00> : vector<16x8xf32>
    %395 = tpu.matmul %250, %394, %cst_205 {dimension_numbers = #tpu.dot_dimension_numbers<[1], [0], [0], [1], [0, 0, 1, 1], [], []>} : vector<16x32xf32>, vector<32x8xf32>, vector<16x8xf32> -> vector<16x8xf32>
    %c3_206 = arith.constant 3 : index
    %c0_207 = arith.constant 0 : index
    %c0_208 = arith.constant 0 : index
    %396 = vector.load %arg16[%c3_206, %c0_207, %c0_208] : memref<4x32x8xf32, #tpu.memory_space<vmem>>, vector<1x32x8xf32>
    %397 = vector.shape_cast %396 : vector<1x32x8xf32> to vector<32x8xf32>
    %cst_209 = arith.constant dense<0.000000e+00> : vector<16x8xf32>
    %398 = tpu.matmul %250, %397, %cst_209 {dimension_numbers = #tpu.dot_dimension_numbers<[1], [0], [0], [1], [0, 0, 1, 1], [], []>} : vector<16x32xf32>, vector<32x8xf32>, vector<16x8xf32> -> vector<16x8xf32>
    %399 = vector.extract_strided_slice %392 {offsets = [0, 0], sizes = [8, 8], strides = [1, 1]} : vector<16x8xf32> to vector<8x8xf32>
    %400 = vector.extract_strided_slice %395 {offsets = [0, 0], sizes = [8, 8], strides = [1, 1]} : vector<16x8xf32> to vector<8x8xf32>
    %401 = tpu.transpose %400, [1, 0] : vector<8x8xf32> -> vector<8x8xf32>
    %cst_210 = arith.constant dense<0.000000e+00> : vector<8x8xf32>
    %402 = tpu.matmul %399, %401, %cst_210 {dimension_numbers = #tpu.dot_dimension_numbers<[1], [0], [0], [1], [0, 0, 1, 1], [], []>} : vector<8x8xf32>, vector<8x8xf32>, vector<8x8xf32> -> vector<8x8xf32>
    %cst_211 = arith.constant dense<0xFF800000> : vector<8xf32>
    %403 = vector.multi_reduction <maximumf>, %402, %cst_211 [1] : vector<8x8xf32> to vector<8xf32>
    %404 = vector.shape_cast %403 : vector<8xf32> to vector<8x1xf32>
    %405 = vector.broadcast %404 : vector<8x1xf32> to vector<8x8xf32>
    %406 = arith.subf %402, %405 : vector<8x8xf32>
    %407 = math.exp %406 : vector<8x8xf32>
    %cst_212 = arith.constant dense<0.000000e+00> : vector<8xf32>
    %408 = vector.multi_reduction <add>, %407, %cst_212 [1] : vector<8x8xf32> to vector<8xf32>
    %409 = vector.shape_cast %408 : vector<8xf32> to vector<8x1xf32>
    %410 = tpu.reciprocal %409 {approx = true} : vector<8x1xf32> -> vector<8x1xf32>
    %411 = vector.broadcast %410 : vector<8x1xf32> to vector<8x8xf32>
    %412 = arith.mulf %407, %411 : vector<8x8xf32>
    %413 = vector.extract_strided_slice %398 {offsets = [0, 0], sizes = [8, 8], strides = [1, 1]} : vector<16x8xf32> to vector<8x8xf32>
    %cst_213 = arith.constant dense<0.000000e+00> : vector<8x8xf32>
    %414 = tpu.matmul %412, %413, %cst_213 {dimension_numbers = #tpu.dot_dimension_numbers<[1], [0], [0], [1], [0, 0, 1, 1], [], []>} : vector<8x8xf32>, vector<8x8xf32>, vector<8x8xf32> -> vector<8x8xf32>
    %415 = vector.extract_strided_slice %392 {offsets = [8, 0], sizes = [8, 8], strides = [1, 1]} : vector<16x8xf32> to vector<8x8xf32>
    %416 = vector.extract_strided_slice %395 {offsets = [8, 0], sizes = [8, 8], strides = [1, 1]} : vector<16x8xf32> to vector<8x8xf32>
    %417 = tpu.transpose %416, [1, 0] : vector<8x8xf32> -> vector<8x8xf32>
    %cst_214 = arith.constant dense<0.000000e+00> : vector<8x8xf32>
    %418 = tpu.matmul %415, %417, %cst_214 {dimension_numbers = #tpu.dot_dimension_numbers<[1], [0], [0], [1], [0, 0, 1, 1], [], []>} : vector<8x8xf32>, vector<8x8xf32>, vector<8x8xf32> -> vector<8x8xf32>
    %cst_215 = arith.constant dense<0xFF800000> : vector<8xf32>
    %419 = vector.multi_reduction <maximumf>, %418, %cst_215 [1] : vector<8x8xf32> to vector<8xf32>
    %420 = vector.shape_cast %419 : vector<8xf32> to vector<8x1xf32>
    %421 = vector.broadcast %420 : vector<8x1xf32> to vector<8x8xf32>
    %422 = arith.subf %418, %421 : vector<8x8xf32>
    %423 = math.exp %422 : vector<8x8xf32>
    %cst_216 = arith.constant dense<0.000000e+00> : vector<8xf32>
    %424 = vector.multi_reduction <add>, %423, %cst_216 [1] : vector<8x8xf32> to vector<8xf32>
    %425 = vector.shape_cast %424 : vector<8xf32> to vector<8x1xf32>
    %426 = tpu.reciprocal %425 {approx = true} : vector<8x1xf32> -> vector<8x1xf32>
    %427 = vector.broadcast %426 : vector<8x1xf32> to vector<8x8xf32>
    %428 = arith.mulf %423, %427 : vector<8x8xf32>
    %429 = vector.extract_strided_slice %398 {offsets = [8, 0], sizes = [8, 8], strides = [1, 1]} : vector<16x8xf32> to vector<8x8xf32>
    %cst_217 = arith.constant dense<0.000000e+00> : vector<8x8xf32>
    %430 = tpu.matmul %428, %429, %cst_217 {dimension_numbers = #tpu.dot_dimension_numbers<[1], [0], [0], [1], [0, 0, 1, 1], [], []>} : vector<8x8xf32>, vector<8x8xf32>, vector<8x8xf32> -> vector<8x8xf32>
    %431 = tpu.concatenate %414, %430 in 0 : vector<8x8xf32>, vector<8x8xf32> -> vector<16x8xf32>
    %c3_218 = arith.constant 3 : index
    %c0_219 = arith.constant 0 : index
    %c0_220 = arith.constant 0 : index
    %432 = vector.load %arg17[%c3_218, %c0_219, %c0_220] : memref<4x8x32xf32, #tpu.memory_space<vmem>>, vector<1x8x32xf32>
    %433 = vector.shape_cast %432 : vector<1x8x32xf32> to vector<8x32xf32>
    %cst_221 = arith.constant dense<0.000000e+00> : vector<16x32xf32>
    %434 = tpu.matmul %431, %433, %cst_221 {dimension_numbers = #tpu.dot_dimension_numbers<[1], [0], [0], [1], [0, 0, 1, 1], [], []>} : vector<16x8xf32>, vector<8x32xf32>, vector<16x32xf32> -> vector<16x32xf32>
    %435 = arith.addf %389, %434 : vector<16x32xf32>
    %436 = arith.addf %435, %250 : vector<16x32xf32>
    %c0_222 = arith.constant 0 : index
    %c0_223 = arith.constant 0 : index
    %437 = vector.load %arg18[%c0_222, %c0_223] : memref<1x32xf32, #tpu.memory_space<vmem>>, vector<1x32xf32>
    %c0_224 = arith.constant 0 : index
    %c0_225 = arith.constant 0 : index
    %438 = vector.load %arg19[%c0_224, %c0_225] : memref<1x32xf32, #tpu.memory_space<vmem>>, vector<1x32xf32>
    %cst_226 = arith.constant dense<0.000000e+00> : vector<16xf32>
    %439 = vector.multi_reduction <add>, %436, %cst_226 [1] : vector<16x32xf32> to vector<16xf32>
    %440 = vector.shape_cast %439 : vector<16xf32> to vector<16x1xf32>
    %cst_227 = arith.constant 3.200000e+01 : f32
    %441 = vector.broadcast %cst_227 : f32 to vector<16x1xf32>
    %442 = arith.divf %440, %441 : vector<16x1xf32>
    %443 = vector.broadcast %442 : vector<16x1xf32> to vector<16x32xf32>
    %444 = arith.subf %436, %443 : vector<16x32xf32>
    %445 = arith.mulf %444, %444 : vector<16x32xf32>
    %cst_228 = arith.constant dense<0.000000e+00> : vector<16xf32>
    %446 = vector.multi_reduction <add>, %445, %cst_228 [1] : vector<16x32xf32> to vector<16xf32>
    %447 = vector.shape_cast %446 : vector<16xf32> to vector<16x1xf32>
    %cst_229 = arith.constant 3.200000e+01 : f32
    %448 = vector.broadcast %cst_229 : f32 to vector<16x1xf32>
    %449 = arith.divf %447, %448 : vector<16x1xf32>
    %450 = vector.broadcast %442 : vector<16x1xf32> to vector<16x32xf32>
    %451 = arith.subf %436, %450 : vector<16x32xf32>
    %cst_230 = arith.constant 9.99999997E-7 : f32
    %452 = vector.broadcast %cst_230 : f32 to vector<16x1xf32>
    %453 = arith.addf %449, %452 : vector<16x1xf32>
    %454 = math.rsqrt %453 : vector<16x1xf32>
    %455 = vector.broadcast %454 : vector<16x1xf32> to vector<16x32xf32>
    %456 = arith.mulf %451, %455 : vector<16x32xf32>
    %457 = vector.broadcast %437 : vector<1x32xf32> to vector<16x32xf32>
    %458 = arith.mulf %456, %457 : vector<16x32xf32>
    %459 = vector.broadcast %438 : vector<1x32xf32> to vector<16x32xf32>
    %460 = arith.addf %458, %459 : vector<16x32xf32>
    %c0_231 = arith.constant 0 : index
    %c0_232 = arith.constant 0 : index
    %461 = vector.load %arg20[%c0_231, %c0_232] : memref<32x64xf32, #tpu.memory_space<vmem>>, vector<32x64xf32>
    %cst_233 = arith.constant dense<0.000000e+00> : vector<16x64xf32>
    %462 = tpu.matmul %460, %461, %cst_233 {dimension_numbers = #tpu.dot_dimension_numbers<[1], [0], [0], [1], [0, 0, 1, 1], [], []>} : vector<16x32xf32>, vector<32x64xf32>, vector<16x64xf32> -> vector<16x64xf32>
    %c0_234 = arith.constant 0 : index
    %c0_235 = arith.constant 0 : index
    %463 = vector.load %arg21[%c0_234, %c0_235] : memref<1x64xf32, #tpu.memory_space<vmem>>, vector<1x64xf32>
    %464 = vector.broadcast %463 : vector<1x64xf32> to vector<16x64xf32>
    %465 = arith.addf %462, %464 : vector<16x64xf32>
    %cst_236 = arith.constant 0.000000e+00 : f32
    %466 = vector.broadcast %cst_236 : f32 to vector<16x64xf32>
    %467 = arith.maximumf %465, %466 : vector<16x64xf32>
    %c0_237 = arith.constant 0 : index
    %c0_238 = arith.constant 0 : index
    %468 = vector.load %arg22[%c0_237, %c0_238] : memref<64x32xf32, #tpu.memory_space<vmem>>, vector<64x32xf32>
    %cst_239 = arith.constant dense<0.000000e+00> : vector<16x32xf32>
    %469 = tpu.matmul %467, %468, %cst_239 {dimension_numbers = #tpu.dot_dimension_numbers<[1], [0], [0], [1], [0, 0, 1, 1], [], []>} : vector<16x64xf32>, vector<64x32xf32>, vector<16x32xf32> -> vector<16x32xf32>
    %c0_240 = arith.constant 0 : index
    %c0_241 = arith.constant 0 : index
    %470 = vector.load %arg23[%c0_240, %c0_241] : memref<1x32xf32, #tpu.memory_space<vmem>>, vector<1x32xf32>
    %471 = vector.broadcast %470 : vector<1x32xf32> to vector<16x32xf32>
    %472 = arith.addf %469, %471 : vector<16x32xf32>
    %473 = arith.addf %472, %460 : vector<16x32xf32>
    %c0_242 = arith.constant 0 : index
    %c0_243 = arith.constant 0 : index
    %474 = vector.load %arg24[%c0_242, %c0_243] : memref<1x32xf32, #tpu.memory_space<vmem>>, vector<1x32xf32>
    %c0_244 = arith.constant 0 : index
    %c0_245 = arith.constant 0 : index
    %475 = vector.load %arg25[%c0_244, %c0_245] : memref<1x32xf32, #tpu.memory_space<vmem>>, vector<1x32xf32>
    %cst_246 = arith.constant dense<0.000000e+00> : vector<16xf32>
    %476 = vector.multi_reduction <add>, %473, %cst_246 [1] : vector<16x32xf32> to vector<16xf32>
    %477 = vector.shape_cast %476 : vector<16xf32> to vector<16x1xf32>
    %cst_247 = arith.constant 3.200000e+01 : f32
    %478 = vector.broadcast %cst_247 : f32 to vector<16x1xf32>
    %479 = arith.divf %477, %478 : vector<16x1xf32>
    %480 = vector.broadcast %479 : vector<16x1xf32> to vector<16x32xf32>
    %481 = arith.subf %473, %480 : vector<16x32xf32>
    %482 = arith.mulf %481, %481 : vector<16x32xf32>
    %cst_248 = arith.constant dense<0.000000e+00> : vector<16xf32>
    %483 = vector.multi_reduction <add>, %482, %cst_248 [1] : vector<16x32xf32> to vector<16xf32>
    %484 = vector.shape_cast %483 : vector<16xf32> to vector<16x1xf32>
    %cst_249 = arith.constant 3.200000e+01 : f32
    %485 = vector.broadcast %cst_249 : f32 to vector<16x1xf32>
    %486 = arith.divf %484, %485 : vector<16x1xf32>
    %487 = vector.broadcast %479 : vector<16x1xf32> to vector<16x32xf32>
    %488 = arith.subf %473, %487 : vector<16x32xf32>
    %cst_250 = arith.constant 9.99999997E-7 : f32
    %489 = vector.broadcast %cst_250 : f32 to vector<16x1xf32>
    %490 = arith.addf %486, %489 : vector<16x1xf32>
    %491 = math.rsqrt %490 : vector<16x1xf32>
    %492 = vector.broadcast %491 : vector<16x1xf32> to vector<16x32xf32>
    %493 = arith.mulf %488, %492 : vector<16x32xf32>
    %494 = vector.broadcast %474 : vector<1x32xf32> to vector<16x32xf32>
    %495 = arith.mulf %493, %494 : vector<16x32xf32>
    %496 = vector.broadcast %475 : vector<1x32xf32> to vector<16x32xf32>
    %497 = arith.addf %495, %496 : vector<16x32xf32>
    %c0_251 = arith.constant 0 : index
    %c0_252 = arith.constant 0 : index
    %498 = vector.load %arg26[%c0_251, %c0_252] : memref<1x32xf32, #tpu.memory_space<vmem>>, vector<1x32xf32>
    %c0_253 = arith.constant 0 : index
    %c0_254 = arith.constant 0 : index
    %499 = vector.load %arg27[%c0_253, %c0_254] : memref<1x32xf32, #tpu.memory_space<vmem>>, vector<1x32xf32>
    %cst_255 = arith.constant dense<0.000000e+00> : vector<16xf32>
    %500 = vector.multi_reduction <add>, %497, %cst_255 [1] : vector<16x32xf32> to vector<16xf32>
    %501 = vector.shape_cast %500 : vector<16xf32> to vector<16x1xf32>
    %cst_256 = arith.constant 3.200000e+01 : f32
    %502 = vector.broadcast %cst_256 : f32 to vector<16x1xf32>
    %503 = arith.divf %501, %502 : vector<16x1xf32>
    %504 = vector.broadcast %503 : vector<16x1xf32> to vector<16x32xf32>
    %505 = arith.subf %497, %504 : vector<16x32xf32>
    %506 = arith.mulf %505, %505 : vector<16x32xf32>
    %cst_257 = arith.constant dense<0.000000e+00> : vector<16xf32>
    %507 = vector.multi_reduction <add>, %506, %cst_257 [1] : vector<16x32xf32> to vector<16xf32>
    %508 = vector.shape_cast %507 : vector<16xf32> to vector<16x1xf32>
    %cst_258 = arith.constant 3.200000e+01 : f32
    %509 = vector.broadcast %cst_258 : f32 to vector<16x1xf32>
    %510 = arith.divf %508, %509 : vector<16x1xf32>
    %511 = vector.broadcast %503 : vector<16x1xf32> to vector<16x32xf32>
    %512 = arith.subf %497, %511 : vector<16x32xf32>
    %cst_259 = arith.constant 9.99999997E-7 : f32
    %513 = vector.broadcast %cst_259 : f32 to vector<16x1xf32>
    %514 = arith.addf %510, %513 : vector<16x1xf32>
    %515 = math.rsqrt %514 : vector<16x1xf32>
    %516 = vector.broadcast %515 : vector<16x1xf32> to vector<16x32xf32>
    %517 = arith.mulf %512, %516 : vector<16x32xf32>
    %518 = vector.broadcast %498 : vector<1x32xf32> to vector<16x32xf32>
    %519 = arith.mulf %517, %518 : vector<16x32xf32>
    %520 = vector.broadcast %499 : vector<1x32xf32> to vector<16x32xf32>
    %521 = arith.addf %519, %520 : vector<16x32xf32>
    %c0_260 = arith.constant 0 : index
    %c0_261 = arith.constant 0 : index
    %522 = vector.load %arg28[%c0_260, %c0_261] : memref<16x32xf32, #tpu.memory_space<vmem>>, vector<16x32xf32>
    tpu.vector_store %arg28[%c0_260, %c0_261], %521 {strides = array<i32>} : memref<16x32xf32, #tpu.memory_space<vmem>>, vector<16x32xf32>,
    return
  }
}

</mosaic_0001>

<bundles_post_ra>
// kernel: transform_encoder_forward.1
= control target key start
LH: loop header
LB: loop body
LE: loop exit
PB: predicated region body
PF: predicated region fallthrough
CT: control target
= control target key end

     0   :  { %s8194_s0 = inlined_call_operand.vmem [shape: f32[16,32], index: 0, kind: input, shape index: {}]   ;;  %s8195_s1 = inlined_call_operand.vmem [shape: f32[8,32], index: 1, kind: input, shape index: {}]   ;;  %s8196_s2 = inlined_call_operand.vmem [shape: f32[4,32,8], index: 2, kind: input, shape index: {}]   ;;  %s8197_s3 = inlined_call_operand.vmem [shape: f32[4,32,8], index: 3, kind: input, shape index: {}]   ;;  %s8198_s4 = inlined_call_operand.vmem [shape: f32[4,32,8], index: 4, kind: input, shape index: {}]   ;;  %s8199_s5 = inlined_call_operand.vmem [shape: f32[4,8,32], index: 5, kind: input, shape index: {}]   ;;  %s8200_s6 = inlined_call_operand.vmem [shape: f32[1,32], index: 6, kind: input, shape index: {}]   ;;  %s8201_s7 = inlined_call_operand.vmem [shape: f32[1,32], index: 7, kind: input, shape index: {}]   ;;  %s8202_s8 = inlined_call_operand.vmem [shape: f32[32,64], index: 8, kind: input, shape index: {}]   ;;  %s8203_s9 = inlined_call_operand.vmem [shape: f32[1,64], index: 9, kind: input, shape index: {}]   ;;  %s8204_s10 = inlined_call_operand.vmem [shape: f32[64,32], index: 10, kind: input, shape index: {}]   ;;  %s8205_s11 = inlined_call_operand.vmem [shape: f32[1,32], index: 11, kind: input, shape index: {}]   ;;  %s8206_s12 = inlined_call_operand.vmem [shape: f32[1,32], index: 12, kind: input, shape index: {}]   ;;  %s8207_s13 = inlined_call_operand.vmem [shape: f32[1,32], index: 13, kind: input, shape index: {}]   ;;  %s8208_s14 = inlined_call_operand.vmem [shape: f32[4,32,8], index: 14, kind: input, shape index: {}]   ;;  %s8209_s15 = inlined_call_operand.vmem [shape: f32[4,32,8], index: 15, kind: input, shape index: {}]   ;;  %s8210_s16 = inlined_call_operand.vmem [shape: f32[4,32,8], index: 16, kind: input, shape index: {}]   ;;  %s8211_s17 = inlined_call_operand.vmem [shape: f32[4,8,32], index: 17, kind: input, shape index: {}]   ;;  %s8212_s18 = inlined_call_operand.vmem [shape: f32[1,32], index: 18, kind: input, shape index: {}]   ;;  %s8213_s19 = inlined_call_operand.vmem [shape: f32[1,32], index: 19, kind: input, shape index: {}]   ;;  %s8214_s20 = inlined_call_operand.vmem [shape: f32[32,64], index: 20, kind: input, shape index: {}]   ;;  %s8215_s21 = inlined_call_operand.vmem [shape: f32[1,64], index: 21, kind: input, shape index: {}]   ;;  %s8216_s22 = inlined_call_operand.vmem [shape: f32[64,32], index: 22, kind: input, shape index: {}]   ;;  %s8217_s23 = inlined_call_operand.vmem [shape: f32[1,32], index: 23, kind: input, shape index: {}]   ;;  %s8218_s24 = inlined_call_operand.vmem [shape: f32[1,32], index: 24, kind: input, shape index: {}]   ;;  %s8219_s25 = inlined_call_operand.vmem [shape: f32[1,32], index: 25, kind: input, shape index: {}]   ;;  %s8220_s26 = inlined_call_operand.vmem [shape: f32[1,32], index: 26, kind: input, shape index: {}]   ;;  %s8221_s27 = inlined_call_operand.vmem [shape: f32[1,32], index: 27, kind: input, shape index: {}]   ;;  %s8222_s28 = inlined_call_operand.hbm [shape: f32[16,32], index: 28, kind: output, shape index: {}]  }
   0x1   :  { %8230 = sst [smem:[#allocation5_spill]] %s8194_s0 }
   0x2   :  { %8231 = sst [smem:[#allocation6_spill]] %s8195_s1 }
   0x3   :  { %8232 = sst [smem:[#allocation7_spill]] %s8196_s2 }
   0x4   :  { %8233 = sst [smem:[#allocation8_spill]] %s8197_s3 }
   0x5   :  { %8234 = sst [smem:[#allocation9_spill]] %s8198_s4 }
   0x6   :  { %8235 = sst [smem:[#allocation10_spill]] %s8199_s5 }
   0x7   :  { %8236 = sst [smem:[#allocation11_spill]] %s8200_s6 }
   0x8   :  { %8237 = sst [smem:[#allocation12_spill]] %s8201_s7 }
   0x9   :  { %8238 = sst [smem:[#allocation13_spill]] %s8202_s8 }
   0xa   :  { %8239 = sst [smem:[#allocation14_spill]] %s8203_s9 }
   0xb   :  { %8240 = sst [smem:[#allocation15_spill]] %s8204_s10 }
   0xc   :  { %8241 = sst [smem:[#allocation16_spill]] %s8205_s11 }
   0xd   :  { %8242 = sst [smem:[#allocation17_spill]] %s8206_s12 }
   0xe   :  { %s8243_s9 = sld [smem:[#allocation7_spill]]  ;;  %s8244_s7 = sld [smem:[#allocation6_spill]]  ;;  %vm99_vm0 = vcmask 261120  }
   0xf   :  { %s8245_s4 = sld [smem:[#allocation5_spill]]  ;;  %s8246_s30 = sld [smem:[#allocation8_spill]] }
  0x10   :  { %s8247_s2 = sld [smem:[#allocation9_spill]] }
  0x14   :  { %v95_v0 = vld [vmem:[%s8243_s9] sm:$0xff]  ;;  %v96_v1 = vld [vmem:[%s8243_s9 + $0x8] sm:$0xff]  ;;  %v97_v2 = vld [vmem:[%s8243_s9 + $0x10] sm:$0xff] }
  0x15   :  { %v6881_v3 = vpack.c.bf16 %v96_v1, %v95_v0  ;;  %v98_v4 = vld [vmem:[%s8243_s9 + $0x18] sm:$0xff]  ;;  %v90_v5 = vld [vmem:[%s8244_s7] sm:$0xff]  ;;  %v182_v10 = vld [vmem:[%s8246_s30 + $0x8] sm:$0xff] }
  0x16   :  { %v91_v6 = vld [vmem:[%s8245_s4] sm:$0xff]  ;;  %v6885_v7 = vpack.c.bf16 %v98_v4, %v97_v2  ;;  %v92_v11 = vld [vmem:[%s8245_s4 + $0x8] sm:$0xff]  ;;  %v262_v14 = vld [vmem:[%s8247_s2 + $0x10] sm:$0xff] }
  0x17   :  { %v7414_v8 = vadd.f32 %v91_v6, %v90_v5  ;;  %v181_v9 = vld [vmem:[%s8246_s30] sm:$0xff]  ;;  %6882 = vmatprep.subr.bf16.mxu1 %v6881_v3  ;;  %v261_v13 = vld [vmem:[%s8247_s2 + $0x8] sm:$0xff]  ;;  %v263_v15 = vld [vmem:[%s8247_s2 + $0x18] sm:$0xff] }
  0x18   :  { %v260_v12 = vld [vmem:[%s8247_s2] sm:$0xff]  ;;  %6884 = vmatpush3.bf16.msra.mxu1 %v6881_v3  ;;  %v6889_v16 = vpack.c.bf16 %v182_v10, %v181_v9  ;;  %v6901_v18 = vpack.c.bf16 %v263_v15, %v262_v14 }
  0x19   :  { %6365 = vmatprep.mubr.msk.f32.mxu1 %vm99_vm0, %v7414_v8  ;;  %6886 = vmatprep.subr.bf16.mxu1 %v6885_v7  ;;  %v6897_v17 = vpack.c.bf16 %v261_v13, %v260_v12 }
  0x1a   :  { %6387 = vmatprep.mubr.msk.f32.mxu0 %vm99_vm0, %v7414_v8 }
  0x1b   :  { %33 = vsyncpa [#allocation3], 0  ;;  %v183_v19 = vld [vmem:[%s8246_s30 + $0x10] sm:$0xff]  ;;  %v184_v20 = vld [vmem:[%s8246_s30 + $0x18] sm:$0xff]  ;;  %v7447_v21 = vadd.f32 %v92_v11, %v90_v5  ;;  %6898 = vmatprep.subr.bf16.mxu0 %v6897_v17  ;;  %v7246_v23 = vmov 0.0   ;;  %vm7247_vm1 = vmmov 0  }
  0x1c   :  { %6888 = vmatpush3.bf16.msra.mxu1 %v6885_v7  ;;  %6900 = vmatpush3.bf16.msra.mxu0 %v6897_v17  ;;  %v6893_v22 = vpack.c.bf16 %v184_v20, %v183_v19  ;;  %vm339_vm2 = vcmask 64512   ;;  %v5893_v46 = vld [vmem:[%s8243_s9 + $0x20] sm:$0xff]  ;;  %v5894_v47 = vld [vmem:[%s8243_s9 + $0x28] sm:$0xff]  ;;  %v5895_v49 = vld [vmem:[%s8243_s9 + $0x30] sm:$0xff]  ;;  %s8248_s7 = sld [smem:[#allocation10_spill]]  ;;  %s8249_s0 = sld [smem:[#allocation13_spill]] }
  0x1d   :  { %6890 = vmatprep.subr.bf16.mxu1 %v6889_v16  ;;  %6902 = vmatprep.subr.bf16.mxu0 %v6901_v18  ;;  %v6905_v48 = vpack.c.bf16 %v5894_v47, %v5893_v46  ;;  %v5896_v50 = vld [vmem:[%s8243_s9 + $0x38] sm:$0xff]  ;;  %v5905_v52 = vld [vmem:[%s8247_s2 + $0x20] sm:$0xff]  ;;  %v5906_v53 = vld [vmem:[%s8247_s2 + $0x28] sm:$0xff]  ;;  %s8250_s3 = sld [smem:[#allocation15_spill]]  ;;  %s8253_s12 = sld [smem:[#allocation14_spill]]  ;;  %vm2831_vm3 = vcmask 523264  }
  0x1e   :  { %v6909_v51 = vpack.c.bf16 %v5896_v50, %v5895_v49  ;;  %v6921_v54 = vpack.c.bf16 %v5906_v53, %v5905_v52  ;;  %v5899_v57 = vld [vmem:[%s8246_s30 + $0x20] sm:$0xff]  ;;  %v5900_v58 = vld [vmem:[%s8246_s30 + $0x28] sm:$0xff]  ;;  %v5901_v62 = vld [vmem:[%s8246_s30 + $0x30] sm:$0xff]  ;;  %s8254_s8 = sld [smem:[#allocation16_spill]]  ;;  %s8255_s10 = sld [smem:[#allocation17_spill]] }
  0x1f   :  { %6366 = vmatmul.mubr.msk.f32.vlgmr.msra.gmra.mrb[0].mxu1 %vm99_vm0, %v7447_v21  ;;  %v6913_v61 = vpack.c.bf16 %v5900_v58, %v5899_v57  ;;  %v5902_v63 = vld [vmem:[%s8246_s30 + $0x38] sm:$0xff]  ;;  %v5907_v3 = vld [vmem:[%s8247_s2 + $0x30] sm:$0xff]  ;;  %v5928_v50 = vld [vmem:[%s8246_s30 + $0x40] sm:$0xff] }
  0x20   :  { %6892 = vmatpush3.bf16.msra.mxu1 %v6889_v16  ;;  %6376 = vmatprep.mubr.msk.f32.mxu1 %vm99_vm0, %v7414_v8  ;;  %v6917_v2 = vpack.c.bf16 %v5902_v63, %v5901_v62  ;;  %v5908_v4 = vld [vmem:[%s8247_s2 + $0x38] sm:$0xff]  ;;  %v5924_v46 = vld [vmem:[%s8243_s9 + $0x50] sm:$0xff]  ;;  %v5934_v63 = vld [vmem:[%s8247_s2 + $0x40] sm:$0xff] }
  0x21   :  { %6894 = vmatprep.subr.bf16.mxu1 %v6893_v22  ;;  %6904 = vmatpush3.bf16.msra.mxu0 %v6901_v18  ;;  %v6925_v5 = vpack.c.bf16 %v5908_v4, %v5907_v3  ;;  %v5925_v47 = vld [vmem:[%s8243_s9 + $0x58] sm:$0xff] }
  0x22   :  { %6400 = vmatprep.subr.mxu0 %v7246_v23  ;;  %v5931_v57 = vld [vmem:[%s8246_s30 + $0x58] sm:$0xff] }
  0x23   :  { %v5937_v3 = vld [vmem:[%s8247_s2 + $0x58] sm:$0xff] }
  0x24   :  { %6896 = vmatpush3.bf16.msra.mxu1 %v6893_v22  ;;  %6388 = vmatmul.mubr.msk.f32.vlgmr.msra.gmra.mrb[0].mxu0 %vm99_vm0, %v7447_v21 }
  0x25   :  { %6390 = vmatprep.subr.mxu1 %v7246_v23  ;;  %6402 = vmatprep.mubr.msk.f32.mxu0 %vm7247_vm1, %v7246_v23 }
  0x27   :  { %6377 = vmatmul.mubr.msk.f32.vlgmr.msra.gmra.mrb[2].mxu1 %vm99_vm0, %v7447_v21 }
  0x28   :  { %6392 = vmatprep.mubr.msk.f32.mxu1 %vm7247_vm1, %v7246_v23 }
  0xf2   :  { %v6367_v24 = vpop.f32.mrb[0].mxu1 }
  0xf3   :  { %v172_v25 = vpop.f32.mrb[1].mxu1 }
  0xf7   :  { %v7463_v26 = vpop.f32.mrb[0].mxu0 }
  0xf8   :  { %v330_v27 = vpop.f32.mrb[1].mxu0 }
  0xfa   :  { %v6378_v28 = vpop.f32.mrb[2].mxu1 }
  0xfb   :  { %v251_v29 = vpop.f32.mrb[3].mxu1  ;;  %6401 = vmatpush3.xpose.msk.msra.mxu0 %vm339_vm2, %v6378_v28 }
  0xfc   :  { %6391 = vmatpush3.xpose.msk.msra.mxu1 %vm339_vm2, %v251_v29  ;;  %6906 = vmatprep.subr.bf16.mxu0 %v6905_v48 }
  0xfd   :  { %6395 = vmatprep.subr.mxu1 %v7246_v23 }
  0xfe   :  { %6403 = vmatmul.mubr.msk.f32.vlgmr.msra.gmra.mrb[2].mxu0 %vm339_vm2, %v6367_v24 }
  0xff   :  { %6393 = vmatmul.mubr.msk.f32.vlgmr.msra.gmra.mrb[4].mxu1 %vm339_vm2, %v172_v25  ;;  %6418 = vmatprep.mubr.msk.f32.mxu0 %vm99_vm0, %v7414_v8 }
 0x100   :  { %6396 = vmatpush3.msra.mxu1 %v330_v27  ;;  %6397 = vmatprep.mubr.msk.f32.mxu1 %vm7247_vm1, %v7246_v23 }
 0x101   :  { %6405 = vmatprep.subr.mxu1 %v7246_v23  ;;  %6908 = vmatpush3.bf16.msra.mxu0 %v6905_v48  ;;  %v6933_v48 = vpack.c.bf16 %v5925_v47, %v5924_v46  ;;  %v5964_v46 = vld [vmem:[%s8247_s2 + $0x78] sm:$0xff] }
 0x102   :  { %6910 = vmatprep.subr.bf16.mxu0 %v6909_v51 }
 0x105   :  { %6912 = vmatpush3.bf16.msra.mxu0 %v6909_v51  ;;  %v5929_v51 = vld [vmem:[%s8246_s30 + $0x48] sm:$0xff] }
 0x106   :  { %6922 = vmatprep.subr.bf16.mxu0 %v6921_v54  ;;  %v6937_v53 = vpack.c.bf16 %v5929_v51, %v5928_v50  ;;  %v5958_v50 = vld [vmem:[%s8246_s30 + $0x78] sm:$0xff] }
 0x108   :  { %6419 = vmatmul.mubr.msk.f32.vlgmr.msra.gmra.mrb[4].mxu0 %vm99_vm0, %v7447_v21 }
 0x109   :  { %6440 = vmatprep.mubr.msk.f32.mxu0 %vm99_vm0, %v7414_v8  ;;  %6924 = vmatpush3.bf16.msra.mxu0 %v6921_v54 }
 0x10a   :  { %6926 = vmatprep.subr.bf16.mxu0 %v6925_v5 }
 0x10d   :  { %6928 = vmatpush3.bf16.msra.mxu0 %v6925_v5 }
 0x10e   :  { %6453 = vmatprep.subr.mxu0 %v7246_v23 }
 0x110   :  { %6441 = vmatmul.mubr.msk.f32.vlgmr.msra.gmra.mrb[6].mxu0 %vm99_vm0, %v7447_v21 }
 0x111   :  { %6455 = vmatprep.mubr.msk.f32.mxu0 %vm7247_vm1, %v7246_v23 }
 0x1d1   :  { %v572_v30 = vpop.f32.mrb[2].mxu0 }
 0x1d2   :  { %v412_v31 = vpop.f32.mrb[4].mxu1  ;;  %v6404_v32 = vpop.f32.mrb[3].mxu0  ;;  %v576_v35 = vsel %vm339_vm2, %v572_v30, -inf }
 0x1d3   :  { %v6394_v33 = vpop.f32.mrb[5].mxu1  ;;  %v416_v34 = vsel %vm339_vm2, %v412_v31, -inf }
 0x1d4   :  { %417 = vmax.xlane.f32.xlu0 %v416_v34 }
 0x1d8   :  { %577 = vmax.xlane.f32.xlu0 %v576_v35 }
 0x1db   :  { %v6420_v6 = vpop.f32.mrb[4].mxu0 }
 0x1dc   :  { %v732_v7 = vpop.f32.mrb[5].mxu0 }
 0x1e3   :  { %v6442_v15 = vpop.f32.mrb[6].mxu0 }
 0x1e4   :  { %v892_v16 = vpop.f32.mrb[7].mxu0 }
 0x261   :  { %v418_v36 = vpop.xlane.xlu0 %417 }
 0x262   :  { %v419_v37 = vsub.f32 %v412_v31, %v418_v36 }
 0x264   :  { %v420_v38 = vmul.f32 1.442695, %v419_v37 }
 0x265   :  { %v578_v39 = vpop.xlane.xlu0 %577 }
 0x266   :  { %7138 = vpow2.f32 %v420_v38  ;;  %v579_v40 = vsub.f32 %v572_v30, %v578_v39 }
 0x268   :  { %v580_v41 = vmul.f32 1.442695, %v579_v40 }
 0x26a   :  { %7140 = vpow2.f32 %v580_v41  ;;  %v5917_v41 = vld [vmem:[%s8248_s7 + $0x8] sm:$0xff] }
 0x270   :  { %v7139_v42 = vpop.eup %7138 }
 0x271   :  { %v422_v43 = vsel %vm339_vm2, %v7139_v42, 0.0 }
 0x272   :  { %423 = vadd.xlane.f32.xlu1 %v422_v43  ;;  %v5922_v43 = vld [vmem:[%s8243_s9 + $0x40] sm:$0xff] }
 0x274   :  { %v7141_v44 = vpop.eup %7140 }
 0x275   :  { %v582_v45 = vsel %vm339_vm2, %v7141_v44, 0.0 }
 0x276   :  { %583 = vadd.xlane.f32.xlu1 %v582_v45 }
 0x2ff   :  { %v424_v55 = vpop.xlane.xlu1 %423 }
 0x300   :  { %7142 = vrcp.f32 %v424_v55 }
 0x303   :  { %v584_v56 = vpop.xlane.xlu1 %583 }
 0x304   :  { %7144 = vrcp.f32 %v584_v56  ;;  %v5930_v56 = vld [vmem:[%s8246_s30 + $0x50] sm:$0xff] }
 0x305   :  { %v6941_v58 = vpack.c.bf16 %v5931_v57, %v5930_v56 }
 0x30a   :  { %v7143_v59 = vpop.eup %7142 }
 0x30b   :  { %v426_v60 = vmul.f32 %v7143_v59, %v7139_v42  ;;  %v660_v42 = vld [vmem:[%s8248_s7] sm:$0xff] }
 0x30d   :  { %6398 = vmatmul.mubr.msk.f32.vlgmr.msra.gmra.mrb[6].mxu1 %vm339_vm2, %v426_v60 }
 0x30e   :  { %v7145_v0 = vpop.eup %7144  ;;  %6406 = vmatpush3.msra.mxu1 %v7463_v26  ;;  %6407 = vmatprep.mubr.msk.f32.mxu1 %vm7247_vm1, %v7246_v23 }
 0x30f   :  { %v586_v1 = vmul.f32 %v7145_v0, %v7141_v44  ;;  %6914 = vmatprep.subr.bf16.mxu1 %v6913_v61  ;;  %v5923_v44 = vld [vmem:[%s8243_s9 + $0x48] sm:$0xff] }
 0x310   :  { %v6929_v45 = vpack.c.bf16 %v5923_v44, %v5922_v43  ;;  %v5935_v0 = vld [vmem:[%s8247_s2 + $0x48] sm:$0xff]  ;;  %v5963_v44 = vld [vmem:[%s8247_s2 + $0x70] sm:$0xff] }
 0x311   :  { %6408 = vmatmul.mubr.msk.f32.vlgmr.msra.gmra.mrb[8].mxu1 %vm339_vm2, %v586_v1  ;;  %v5936_v1 = vld [vmem:[%s8247_s2 + $0x50] sm:$0xff]  ;;  %v5962_v43 = vld [vmem:[%s8247_s2 + $0x68] sm:$0xff]  ;;  %v6973_v47 = vpack.c.bf16 %v5964_v46, %v5963_v44 }
 0x312   :  { %6916 = vmatpush3.bf16.msra.mxu1 %v6913_v61  ;;  %6429 = vmatprep.mubr.msk.f32.mxu1 %vm99_vm0, %v7414_v8  ;;  %v6949_v4 = vpack.c.bf16 %v5937_v3, %v5936_v1  ;;  %v2724_v44 = vld [vmem:[%s8249_s0 + $0x10] sm:$0xff] }
 0x313   :  { %6918 = vmatprep.subr.bf16.mxu1 %v6917_v2 }
 0x316   :  { %6920 = vmatpush3.bf16.msra.mxu1 %v6917_v2  ;;  %v6945_v2 = vpack.c.bf16 %v5935_v0, %v5934_v63 }
 0x317   :  { %6443 = vmatprep.subr.mxu1 %v7246_v23 }
 0x319   :  { %6430 = vmatmul.mubr.msk.f32.vlgmr.msra.gmra.mrb[10].mxu1 %vm99_vm0, %v7447_v21 }
 0x31a   :  { %6445 = vmatprep.mubr.msk.f32.mxu1 %vm7247_vm1, %v7246_v23 }
 0x3e0   :  { %v7536_v9 = vpop.f32.mrb[6].mxu1 }
 0x3e1   :  { %v6399_v10 = vpop.f32.mrb[7].mxu1 }
 0x3e4   :  { %v7538_v11 = vpop.f32.mrb[8].mxu1 }
 0x3e5   :  { %v6409_v12 = vpop.f32.mrb[9].mxu1 }
 0x3ec   :  { %v6431_v13 = vpop.f32.mrb[10].mxu1 }
 0x3ed   :  { %v812_v14 = vpop.f32.mrb[11].mxu1  ;;  %6454 = vmatpush3.xpose.msk.msra.mxu0 %vm339_vm2, %v6431_v13 }
 0x3ee   :  { %6444 = vmatpush3.xpose.msk.msra.mxu1 %vm339_vm2, %v812_v14  ;;  %6463 = vmatprep.subr.mxu0 %v5917_v41 }
 0x3ef   :  { %6448 = vmatprep.subr.mxu1 %v7246_v23 }
 0x3f0   :  { %6456 = vmatmul.mubr.msk.f32.vlgmr.msra.gmra.mrb[8].mxu0 %vm339_vm2, %v6420_v6 }
 0x3f1   :  { %6446 = vmatmul.mubr.msk.f32.vlgmr.msra.gmra.mrb[12].mxu1 %vm339_vm2, %v732_v7  ;;  %6464 = vmatpush3.msra.mxu0 %v5917_v41 }
 0x3f2   :  { %6450 = vmatprep.mubr.msk.f32.mxu1 %vm7247_vm1, %v7246_v23  ;;  %6449 = vmatpush3.msra.mxu1 %v892_v16 }
 0x3f3   :  { %6458 = vmatprep.subr.mxu1 %v7246_v23  ;;  %6468 = vmatprep.subr.mxu0 %v660_v42 }
 0x4c3   :  { %v1133_v17 = vpop.f32.mrb[8].mxu0 }
 0x4c4   :  { %v973_v18 = vpop.f32.mrb[12].mxu1  ;;  %v6457_v19 = vpop.f32.mrb[9].mxu0  ;;  %v1137_v20 = vsel %vm339_vm2, %v1133_v17, -inf }
 0x4c5   :  { %1138 = vmax.xlane.f32.xlu1 %v1137_v20  ;;  %v6447_v22 = vpop.f32.mrb[13].mxu1  ;;  %v977_v24 = vsel %vm339_vm2, %v973_v18, -inf }
 0x4c6   :  { %978 = vmax.xlane.f32.xlu0 %v977_v24 }
 0x552   :  { %v1139_v25 = vpop.xlane.xlu1 %1138 }
 0x553   :  { %v1140_v26 = vsub.f32 %v1133_v17, %v1139_v25  ;;  %v979_v27 = vpop.xlane.xlu0 %978 }
 0x554   :  { %v980_v28 = vsub.f32 %v973_v18, %v979_v27 }
 0x555   :  { %v1141_v29 = vmul.f32 1.442695, %v1140_v26 }
 0x556   :  { %v981_v30 = vmul.f32 1.442695, %v980_v28 }
 0x557   :  { %7146 = vpow2.f32 %v1141_v29 }
 0x558   :  { %7148 = vpow2.f32 %v981_v30 }
 0x561   :  { %v7147_v31 = vpop.eup %7146 }
 0x562   :  { %v7149_v32 = vpop.eup %7148  ;;  %v1143_v33 = vsel %vm339_vm2, %v7147_v31, 0.0 }
 0x563   :  { %1144 = vadd.xlane.f32.xlu1 %v1143_v33  ;;  %v983_v34 = vsel %vm339_vm2, %v7149_v32, 0.0  ;;  %v5955_v33 = vld [vmem:[%s8246_s30 + $0x60] sm:$0xff] }
 0x564   :  { %984 = vadd.xlane.f32.xlu0 %v983_v34  ;;  %v5956_v34 = vld [vmem:[%s8246_s30 + $0x68] sm:$0xff] }
 0x5f0   :  { %v1145_v35 = vpop.xlane.xlu1 %1144 }
 0x5f1   :  { %v985_v36 = vpop.xlane.xlu0 %984 }
 0x5f2   :  { %7150 = vrcp.f32 %v985_v36  ;;  %v5949_v36 = vld [vmem:[%s8243_s9 + $0x60] sm:$0xff] }
 0x5f3   :  { %7152 = vrcp.f32 %v1145_v35  ;;  %v6961_v35 = vpack.c.bf16 %v5956_v34, %v5955_v33 }
 0x5fc   :  { %v7151_v37 = vpop.eup %7150 }
 0x5fd   :  { %v987_v38 = vmul.f32 %v7151_v37, %v7149_v32  ;;  %v7153_v39 = vpop.eup %7152  ;;  %v5946_v32 = vld [vmem:[%s8248_s7 + $0x10] sm:$0xff]  ;;  %v5950_v37 = vld [vmem:[%s8243_s9 + $0x68] sm:$0xff] }
 0x5fe   :  { %v1147_v40 = vmul.f32 %v7153_v39, %v7147_v31  ;;  %v5951_v39 = vld [vmem:[%s8243_s9 + $0x70] sm:$0xff] }
 0x5ff   :  { %6451 = vmatmul.mubr.msk.f32.vlgmr.msra.gmra.mrb[14].mxu1 %vm339_vm2, %v987_v38  ;;  %v6953_v38 = vpack.c.bf16 %v5950_v37, %v5949_v36 }
 0x600   :  { %6459 = vmatpush3.msra.mxu1 %v6442_v15  ;;  %6460 = vmatprep.mubr.msk.f32.mxu1 %vm7247_vm1, %v7246_v23 }
 0x601   :  { %6930 = vmatprep.subr.bf16.mxu1 %v6929_v45 }
 0x603   :  { %6461 = vmatmul.mubr.msk.f32.vlgmr.msra.gmra.mrb[16].mxu1 %vm339_vm2, %v1147_v40  ;;  %v5952_v40 = vld [vmem:[%s8243_s9 + $0x78] sm:$0xff]  ;;  %s8251_s9 = sld [smem:[#allocation11_spill]] }
 0x604   :  { %6481 = vmatprep.mubr.msk.f32.mxu1 %vm99_vm0, %v7414_v8  ;;  %6932 = vmatpush3.bf16.msra.mxu1 %v6929_v45  ;;  %v6957_v41 = vpack.c.bf16 %v5952_v40, %v5951_v39 }
 0x605   :  { %6934 = vmatprep.subr.bf16.mxu1 %v6933_v48 }
 0x608   :  { %6936 = vmatpush3.bf16.msra.mxu1 %v6933_v48 }
 0x609   :  { %6946 = vmatprep.subr.bf16.mxu1 %v6945_v2 }
 0x60b   :  { %6482 = vmatmul.mubr.msk.f32.vlgmr.msra.gmra.mrb[18].mxu1 %vm99_vm0, %v7447_v21 }
 0x60c   :  { %6503 = vmatprep.mubr.msk.f32.mxu1 %vm99_vm0, %v7414_v8  ;;  %6948 = vmatpush3.bf16.msra.mxu1 %v6945_v2 }
 0x60d   :  { %6950 = vmatprep.subr.bf16.mxu1 %v6949_v4 }
 0x610   :  { %6952 = vmatpush3.bf16.msra.mxu1 %v6949_v4 }
 0x611   :  { %6511 = vmatprep.subr.mxu1 %v7246_v23 }
 0x613   :  { %6504 = vmatmul.mubr.msk.f32.vlgmr.msra.gmra.mrb[20].mxu1 %vm99_vm0, %v7447_v21 }
 0x614   :  { %6513 = vmatprep.mubr.msk.f32.mxu1 %vm7247_vm1, %v7246_v23 }
 0x6d2   :  { %v1057_v49 = vpop.f32.mrb[14].mxu1 }
 0x6d3   :  { %v6452_v52 = vpop.f32.mrb[15].mxu1  ;;  %6465 = vmatprep.mubr.msk.f32.mxu0 %vm339_vm2, %v1057_v49  ;;  %v5957_v49 = vld [vmem:[%s8246_s30 + $0x70] sm:$0xff]  ;;  %s8252_s30 = sld [smem:[#allocation12_spill]] }
 0x6d4   :  { %v6965_v52 = vpack.c.bf16 %v5958_v50, %v5957_v49  ;;  %v2818_v49 = vld [vmem:[%s8250_s3 + $0x10] sm:$0xff] }
 0x6d6   :  { %v1217_v54 = vpop.f32.mrb[16].mxu1 }
 0x6d7   :  { %v6462_v55 = vpop.f32.mrb[17].mxu1  ;;  %6466 = vmatmul.mubr.msk.f32.vlgmr.msra.gmra.mrb[10].mxu0 %vm339_vm2, %v1217_v54 }
 0x6d8   :  { %6469 = vmatpush3.msra.mxu0 %v660_v42  ;;  %6470 = vmatprep.mubr.msk.f32.mxu0 %vm339_vm2, %v7536_v9  ;;  %v5961_v42 = vld [vmem:[%s8247_s2 + $0x60] sm:$0xff] }
 0x6d9   :  { %6938 = vmatprep.subr.bf16.mxu0 %v6937_v53  ;;  %v6969_v45 = vpack.c.bf16 %v5962_v43, %v5961_v42  ;;  %v2723_v42 = vld [vmem:[%s8249_s0 + $0x8] sm:$0xff] }
 0x6de   :  { %v6483_v59 = vpop.f32.mrb[18].mxu1 }
 0x6df   :  { %6471 = vmatmul.mubr.msk.f32.vlgmr.msra.gmra.mrb[10].mxu0 %vm339_vm2, %v7538_v11  ;;  %v1456_v60 = vpop.f32.mrb[19].mxu1 }
 0x6e0   :  { %6940 = vmatpush3.bf16.msra.mxu0 %v6937_v53  ;;  %6492 = vmatprep.mubr.msk.f32.mxu0 %vm99_vm0, %v7414_v8 }
 0x6e1   :  { %6942 = vmatprep.subr.bf16.mxu0 %v6941_v58 }
 0x6e4   :  { %6944 = vmatpush3.bf16.msra.mxu0 %v6941_v58 }
 0x6e5   :  { %6506 = vmatprep.subr.mxu0 %v7246_v23 }
 0x6e6   :  { %v6505_v24 = vpop.f32.mrb[20].mxu1 }
 0x6e7   :  { %6493 = vmatmul.mubr.msk.f32.vlgmr.msra.gmra.mrb[12].mxu0 %vm99_vm0, %v7447_v21  ;;  %v1616_v25 = vpop.f32.mrb[21].mxu1 }
 0x6e8   :  { %6508 = vmatprep.mubr.msk.f32.mxu0 %vm7247_vm1, %v7246_v23  ;;  %6512 = vmatpush3.msra.mxu1 %v1616_v25 }
 0x6e9   :  { %6521 = vmatprep.subr.mxu1 %v7246_v23 }
 0x7ba   :  { %v6494_v61 = vpop.f32.mrb[12].mxu0 }
 0x7bb   :  { %v1536_v62 = vpop.f32.mrb[13].mxu0 }
 0x7bc   :  { %6507 = vmatpush3.xpose.msk.msra.mxu0 %vm339_vm2, %v1536_v62 }
 0x7bd   :  { %6516 = vmatprep.subr.mxu0 %v7246_v23 }
 0x7bf   :  { %6509 = vmatmul.mubr.msk.f32.vlgmr.msra.gmra.mrb[14].mxu0 %vm339_vm2, %v1456_v60 }
 0x7c0   :  { %6517 = vmatpush3.xpose.msk.msra.mxu0 %vm339_vm2, %v6494_v61  ;;  %6518 = vmatprep.mubr.msk.f32.mxu0 %vm7247_vm1, %v7246_v23 }
 0x7c1   :  { %6526 = vmatprep.subr.mxu0 %v5946_v32 }
 0x7c3   :  { %6519 = vmatmul.mubr.msk.f32.vlgmr.msra.gmra.mrb[16].mxu0 %vm339_vm2, %v6483_v59 }
 0x7c4   :  { %6527 = vmatpush3.msra.mxu0 %v5946_v32 }
 0x7c5   :  { %6962 = vmatprep.subr.bf16.mxu0 %v6961_v35 }
 0x892   :  { %v1697_v5 = vpop.f32.mrb[14].mxu0 }
 0x893   :  { %v6510_v6 = vpop.f32.mrb[15].mxu0  ;;  %v1701_v7 = vsel %vm339_vm2, %v1697_v5, -inf }
 0x894   :  { %1702 = vmax.xlane.f32.xlu0 %v1701_v7 }
 0x896   :  { %v1857_v9 = vpop.f32.mrb[16].mxu0 }
 0x897   :  { %v6520_v10 = vpop.f32.mrb[17].mxu0  ;;  %v1861_v11 = vsel %vm339_vm2, %v1857_v9, -inf }
 0x898   :  { %1862 = vmax.xlane.f32.xlu1 %v1861_v11 }
 0x921   :  { %v1703_v12 = vpop.xlane.xlu0 %1702 }
 0x922   :  { %v1704_v13 = vsub.f32 %v1697_v5, %v1703_v12 }
 0x924   :  { %v1705_v14 = vmul.f32 1.442695, %v1704_v13 }
 0x925   :  { %v1863_v15 = vpop.xlane.xlu1 %1862 }
 0x926   :  { %7154 = vpow2.f32 %v1705_v14  ;;  %v1864_v16 = vsub.f32 %v1857_v9, %v1863_v15 }
 0x928   :  { %v1865_v17 = vmul.f32 1.442695, %v1864_v16 }
 0x92a   :  { %7156 = vpow2.f32 %v1865_v17 }
 0x930   :  { %v7155_v18 = vpop.eup %7154 }
 0x931   :  { %v1707_v19 = vsel %vm339_vm2, %v7155_v18, 0.0 }
 0x932   :  { %1708 = vadd.xlane.f32.xlu0 %v1707_v19 }
 0x934   :  { %v7157_v20 = vpop.eup %7156 }
 0x935   :  { %v1867_v22 = vsel %vm339_vm2, %v7157_v20, 0.0 }
 0x936   :  { %1868 = vadd.xlane.f32.xlu1 %v1867_v22 }
 0x9bf   :  { %v1709_v26 = vpop.xlane.xlu0 %1708 }
 0x9c0   :  { %7158 = vrcp.f32 %v1709_v26 }
 0x9c3   :  { %v1869_v27 = vpop.xlane.xlu1 %1868 }
 0x9c4   :  { %7160 = vrcp.f32 %v1869_v27 }
 0x9ca   :  { %v7159_v28 = vpop.eup %7158 }
 0x9cb   :  { %v1711_v29 = vmul.f32 %v7159_v28, %v7155_v18 }
 0x9cd   :  { %6514 = vmatmul.mubr.msk.f32.vlgmr.msra.gmra.mrb[22].mxu1 %vm339_vm2, %v1711_v29 }
 0x9ce   :  { %v7161_v30 = vpop.eup %7160  ;;  %6522 = vmatpush3.msra.mxu1 %v6505_v24  ;;  %6523 = vmatprep.mubr.msk.f32.mxu1 %vm7247_vm1, %v7246_v23 }
 0x9cf   :  { %v1871_v31 = vmul.f32 %v7161_v30, %v7157_v20  ;;  %6954 = vmatprep.subr.bf16.mxu1 %v6953_v38  ;;  %v5973_v20 = vld [vmem:[%s8248_s7 + $0x18] sm:$0xff] }
 0x9d1   :  { %6524 = vmatmul.mubr.msk.f32.vlgmr.msra.gmra.mrb[24].mxu1 %vm339_vm2, %v1871_v31 }
 0x9d2   :  { %6539 = vmatprep.mubr.msk.f32.mxu1 %vm99_vm0, %v7414_v8  ;;  %6956 = vmatpush3.bf16.msra.mxu1 %v6953_v38 }
 0x9d3   :  { %6958 = vmatprep.subr.bf16.mxu1 %v6957_v41 }
 0x9d6   :  { %6960 = vmatpush3.bf16.msra.mxu1 %v6957_v41 }
 0x9d7   :  { %6970 = vmatprep.subr.bf16.mxu1 %v6969_v45 }
 0x9d9   :  { %6540 = vmatmul.mubr.msk.f32.vlgmr.msra.gmra.mrb[26].mxu1 %vm99_vm0, %v7447_v21 }
 0x9da   :  { %6561 = vmatprep.mubr.msk.f32.mxu1 %vm99_vm0, %v7414_v8  ;;  %6972 = vmatpush3.bf16.msra.mxu1 %v6969_v45  ;;  %v2725_v45 = vld [vmem:[%s8249_s0 + $0x18] sm:$0xff] }
 0x9db   :  { %6974 = vmatprep.subr.bf16.mxu1 %v6973_v47  ;;  %v6981_v46 = vpack.c.bf16 %v2725_v45, %v2724_v44  ;;  %v2961_v44 = vld [vmem:[%s8208_s14 + $0x10] sm:$0xff]  ;;  %v2962_v45 = vld [vmem:[%s8208_s14 + $0x18] sm:$0xff] }
 0x9de   :  { %6976 = vmatpush3.bf16.msra.mxu1 %v6973_v47  ;;  %v2816_v47 = vld [vmem:[%s8250_s3] sm:$0xff] }
 0x9df   :  { %6574 = vmatprep.subr.mxu1 %v7246_v23 }
 0x9e1   :  { %6562 = vmatmul.mubr.msk.f32.vlgmr.msra.gmra.mrb[28].mxu1 %vm99_vm0, %v7447_v21 }
 0x9e2   :  { %6576 = vmatprep.mubr.msk.f32.mxu1 %vm7247_vm1, %v7246_v23 }
 0xaa0   :  { %v1781_v48 = vpop.f32.mrb[22].mxu1 }
 0xaa1   :  { %v6515_v51 = vpop.f32.mrb[23].mxu1  ;;  %6528 = vmatprep.mubr.msk.f32.mxu0 %vm339_vm2, %v1781_v48  ;;  %v2817_v48 = vld [vmem:[%s8250_s3 + $0x8] sm:$0xff] }
 0xaa2   :  { %v6985_v50 = vpack.c.bf16 %v2817_v48, %v2816_v47  ;;  %v2819_v51 = vld [vmem:[%s8250_s3 + $0x18] sm:$0xff]  ;;  %v3125_v47 = vld [vmem:[%s8210_s16 + $0x10] sm:$0xff] }
 0xaa3   :  { %v3126_v48 = vld [vmem:[%s8210_s16 + $0x18] sm:$0xff] }
 0xaa4   :  { %v1941_v53 = vpop.f32.mrb[24].mxu1 }
 0xaa5   :  { %v6525_v54 = vpop.f32.mrb[25].mxu1  ;;  %6529 = vmatmul.mubr.msk.f32.vlgmr.msra.gmra.mrb[10].mxu0 %vm339_vm2, %v1941_v53  ;;  %v2820_v53 = vld [vmem:[%s8250_s3 + $0x20] sm:$0xff] }
 0xaa6   :  { %6964 = vmatpush3.bf16.msra.mxu0 %v6961_v35  ;;  %6550 = vmatprep.mubr.msk.f32.mxu0 %vm99_vm0, %v7414_v8  ;;  %v2821_v54 = vld [vmem:[%s8250_s3 + $0x28] sm:$0xff] }
 0xaa7   :  { %6966 = vmatprep.subr.bf16.mxu0 %v6965_v52 }
 0xaaa   :  { %6968 = vmatpush3.bf16.msra.mxu0 %v6965_v52  ;;  %v6989_v52 = vpack.c.bf16 %v2819_v51, %v2818_v49  ;;  %v7021_v49 = vpack.c.bf16 %v3126_v48, %v3125_v47  ;;  %v3045_v51 = vld [vmem:[%s8209_s15 + $0x8] sm:$0xff] }
 0xaab   :  { %6564 = vmatprep.subr.mxu0 %v7246_v23 }
 0xaac   :  { %v6541_v55 = vpop.f32.mrb[26].mxu1 }
 0xaad   :  { %6551 = vmatmul.mubr.msk.f32.vlgmr.msra.gmra.mrb[18].mxu0 %vm99_vm0, %v7447_v21  ;;  %v2101_v56 = vpop.f32.mrb[27].mxu1 }
 0xaae   :  { %6566 = vmatprep.mubr.msk.f32.mxu0 %vm7247_vm1, %v7246_v23 }
 0xab4   :  { %v6563_v57 = vpop.f32.mrb[28].mxu1 }
 0xab5   :  { %v2261_v58 = vpop.f32.mrb[29].mxu1 }
 0xb80   :  { %v6552_v59 = vpop.f32.mrb[18].mxu0 }
 0xb81   :  { %v2181_v60 = vpop.f32.mrb[19].mxu0  ;;  %6575 = vmatpush3.xpose.msk.msra.mxu1 %vm339_vm2, %v6552_v59 }
 0xb82   :  { %6565 = vmatpush3.xpose.msk.msra.mxu0 %vm339_vm2, %v2181_v60 }
 0xb83   :  { %6569 = vmatprep.subr.mxu0 %v7246_v23 }
 0xb84   :  { %6577 = vmatmul.mubr.msk.f32.vlgmr.msra.gmra.mrb[30].mxu1 %vm339_vm2, %v6541_v55  ;;  %v6993_v55 = vpack.c.bf16 %v2821_v54, %v2820_v53 }
 0xb85   :  { %6567 = vmatmul.mubr.msk.f32.vlgmr.msra.gmra.mrb[20].mxu0 %vm339_vm2, %v2101_v56 }
 0xb86   :  { %6570 = vmatpush3.msra.mxu0 %v2261_v58  ;;  %6571 = vmatprep.mubr.msk.f32.mxu0 %vm7247_vm1, %v7246_v23 }
 0xb87   :  { %6579 = vmatprep.subr.mxu0 %v7246_v23 }
 0xc57   :  { %v2502_v61 = vpop.f32.mrb[30].mxu1 }
 0xc58   :  { %v2342_v62 = vpop.f32.mrb[20].mxu0  ;;  %v6578_v63 = vpop.f32.mrb[31].mxu1  ;;  %v2506_v0 = vsel %vm339_vm2, %v2502_v61, -inf }
 0xc59   :  { %v6568_v1 = vpop.f32.mrb[21].mxu0  ;;  %2507 = vmax.xlane.f32.xlu1 %v2506_v0  ;;  %v2346_v2 = vsel %vm339_vm2, %v2342_v62, -inf  ;;  %v5976_v63 = vld [vmem:[%s8251_s9] ss:$0 sm:$0xff] }
 0xc5a   :  { %2347 = vmax.xlane.f32.xlu0 %v2346_v2 }
 0xce6   :  { %v2508_v3 = vpop.xlane.xlu1 %2507 }
 0xce7   :  { %v2509_v4 = vsub.f32 %v2502_v61, %v2508_v3  ;;  %v2348_v5 = vpop.xlane.xlu0 %2347  ;;  %v5977_v3 = vld [vmem:[%s8252_s30] ss:$0 sm:$0xff]  ;;  %s7248_s30 = smov [#allocation2]  }
 0xce8   :  { %v2349_v6 = vsub.f32 %v2342_v62, %v2348_v5  ;;  %s5870_s6 = sshll.u32 %s7248_s30, 4  ;;  %s5871_s6 = int_to_ptr.vmem [resolvable:$true] %s5870_s6 }
 0xce9   :  { %v2510_v7 = vmul.f32 1.442695, %v2509_v4  ;;  %s7222_s7 = scalar_lea.vmem %s5871_s6, 256  ;;  %p7227_p1 = scmp.lt.s32.totalorder %s5871_s6, %s5871_s6 }
 0xcea   :  { %v2350_v9 = vmul.f32 1.442695, %v2349_v6  ;;  %p7223_p0 = scmp.ne.s32.totalorder %s5871_s6, %s7222_s7  ;;  %p7228_p2 = scmp.lt.s32.totalorder %s7222_s7, %s7222_s7 }
 0xceb   :  { %7162 = vpow2.f32 %v2510_v7 }
 0xcec   :  { %7164 = vpow2.f32 %v2350_v9  ;;  %v2822_v9 = vld [vmem:[%s8250_s3 + $0x30] sm:$0xff]  ;;  %p7229_p3 = por %p7228_p2, %p7227_p1 }
 0xcee   :  { %p7230_p4 = pnand %p7229_p3, %p7223_p0 }
 0xcf5   :  { %v7163_v10 = vpop.eup %7162 }
 0xcf6   :  { %v7165_v11 = vpop.eup %7164  ;;  %v2512_v12 = vsel %vm339_vm2, %v7163_v10, 0.0 }
 0xcf7   :  { %2513 = vadd.xlane.f32.xlu1 %v2512_v12  ;;  %v2352_v13 = vsel %vm339_vm2, %v7165_v11, 0.0  ;;  %v5978_v12 = vld [vmem:[%s8253_s12] ss:$0 sm:$0xff] }
 0xcf8   :  { %2353 = vadd.xlane.f32.xlu0 %v2352_v13 }
 0xd84   :  { %v2514_v14 = vpop.xlane.xlu1 %2513 }
 0xd85   :  { %v2354_v15 = vpop.xlane.xlu0 %2353 }
 0xd86   :  { %7166 = vrcp.f32 %v2354_v15 }
 0xd87   :  { %7168 = vrcp.f32 %v2514_v14 }
 0xd90   :  { %v7167_v16 = vpop.eup %7166 }
 0xd91   :  { %v2356_v17 = vmul.f32 %v7167_v16, %v7165_v11  ;;  %v7169_v18 = vpop.eup %7168 }
 0xd92   :  { %v2516_v19 = vmul.f32 %v7169_v18, %v7163_v10  ;;  %v2823_v10 = vld [vmem:[%s8250_s3 + $0x38] sm:$0xff] }
 0xd93   :  { %6572 = vmatmul.mubr.msk.f32.vlgmr.msra.gmra.mrb[22].mxu0 %vm339_vm2, %v2356_v17  ;;  %v6997_v11 = vpack.c.bf16 %v2823_v10, %v2822_v9 }
 0xd94   :  { %6580 = vmatpush3.msra.mxu0 %v6563_v57  ;;  %6581 = vmatprep.mubr.msk.f32.mxu0 %vm7247_vm1, %v7246_v23 }
 0xd95   :  { %6584 = vmatprep.subr.mxu0 %v5973_v20 }
 0xd97   :  { %6582 = vmatmul.mubr.msk.f32.vlgmr.msra.gmra.mrb[24].mxu0 %vm339_vm2, %v2516_v19  ;;  %v5981_v19 = vld [vmem:[%s8254_s8] ss:$0 sm:$0xff] }
 0xd98   :  { %6585 = vmatpush3.msra.mxu0 %v5973_v20 }
 0xd99   :  { %6986 = vmatprep.subr.bf16.mxu0 %v6985_v50 }
 0xe66   :  { %v2426_v22 = vpop.f32.mrb[22].mxu0 }
 0xe67   :  { %v6573_v24 = vpop.f32.mrb[23].mxu0  ;;  %6586 = vmatprep.mubr.msk.f32.mxu0 %vm339_vm2, %v2426_v22 }
 0xe6a   :  { %v2586_v25 = vpop.f32.mrb[24].mxu0 }
 0xe6b   :  { %v6583_v26 = vpop.f32.mrb[25].mxu0  ;;  %6587 = vmatmul.mubr.msk.f32.vlgmr.msra.gmra.mrb[10].mxu0 %vm339_vm2, %v2586_v25 }
 0xe6c   :  { %6988 = vmatpush3.bf16.msra.mxu0 %v6985_v50  ;;  %v3044_v50 = vld [vmem:[%s8209_s15] sm:$0xff] }
 0xe6d   :  { %6990 = vmatprep.subr.bf16.mxu0 %v6989_v52 }
 0xe70   :  { %6992 = vmatpush3.bf16.msra.mxu0 %v6989_v52  ;;  %v7009_v52 = vpack.c.bf16 %v3045_v51, %v3044_v50  ;;  %v6005_v50 = vld [vmem:[%s8209_s15 + $0x28] sm:$0xff] }
 0xe71   :  { %6994 = vmatprep.subr.bf16.mxu0 %v6993_v55 }
 0xe74   :  { %6996 = vmatpush3.bf16.msra.mxu0 %v6993_v55 }
 0xe75   :  { %6998 = vmatprep.subr.bf16.mxu0 %v6997_v11 }
 0xe78   :  { %7000 = vmatpush3.bf16.msra.mxu0 %v6997_v11 }
 0xf3e   :  { %v6588_v27 = vpop.f32.mrb[10].mxu0 }
 0xf3f   :  { %v2676_v28 = vadd.f32 %v6588_v27, %v7447_v21  ;;  %v2664_v29 = vpop.f32.mrb[11].mxu0 }
 0xf40   :  { %v2675_v30 = vadd.f32 %v2664_v29, %v7414_v8  ;;  %v2722_v8 = vld [vmem:[%s8249_s0] sm:$0xff] }
 0xf41   :  { %v2682_v31 = vsel %vm99_vm0, %v2676_v28, 0.0  ;;  %v6977_v43 = vpack.c.bf16 %v2723_v42, %v2722_v8  ;;  %v3123_v8 = vld [vmem:[%s8210_s16] sm:$0xff]  ;;  %v3124_v42 = vld [vmem:[%s8210_s16 + $0x8] sm:$0xff] }
 0xf42   :  { %2683 = vadd.xlane.f32.xlu1 %v2682_v31  ;;  %v2679_v32 = vsel %vm99_vm0, %v2675_v30, 0.0 }
 0xf43   :  { %2680 = vadd.xlane.f32.xlu0 %v2679_v32  ;;  %6978 = vmatprep.subr.bf16.mxu1 %v6977_v43 }
 0xf44   :  { %6980 = vmatpush3.bf16.msra.mxu1 %v6977_v43  ;;  %v7017_v43 = vpack.c.bf16 %v3124_v42, %v3123_v8 }
 0xf45   :  { %6982 = vmatprep.subr.bf16.mxu1 %v6981_v46 }
 0xf46   :  { %7018 = vmatprep.subr.bf16.mxu0 %v7017_v43 }
 0xf48   :  { %6984 = vmatpush3.bf16.msra.mxu1 %v6981_v46  ;;  %v7005_v46 = vpack.c.bf16 %v2962_v45, %v2961_v44 }
 0xfcf   :  { %v2684_v33 = vpop.xlane.xlu1 %2683 }
 0xfd0   :  { %v2687_v34 = vmul.f32 0.03125, %v2684_v33  ;;  %v2681_v35 = vpop.xlane.xlu0 %2680 }
 0xfd1   :  { %v2686_v36 = vmul.f32 0.03125, %v2681_v35 }
 0xfd2   :  { %v2689_v37 = vsub.f32 %v2676_v28, %v2687_v34 }
 0xfd3   :  { %v2688_v38 = vsub.f32 %v2675_v30, %v2686_v36 }
 0xfd4   :  { %v2691_v39 = vmul.f32 %v2689_v37, %v2689_v37 }
 0xfd5   :  { %v2690_v40 = vmul.f32 %v2688_v38, %v2688_v38 }
 0xfd6   :  { %v2695_v41 = vsel %vm99_vm0, %v2691_v39, 0.0 }
 0xfd7   :  { %2696 = vadd.xlane.f32.xlu1 %v2695_v41  ;;  %v2692_v21 = vsel %vm99_vm0, %v2690_v40, 0.0  ;;  %v2959_v40 = vld [vmem:[%s8208_s14] sm:$0xff]  ;;  %v2960_v41 = vld [vmem:[%s8208_s14 + $0x8] sm:$0xff] }
 0xfd8   :  { %2693 = vadd.xlane.f32.xlu0 %v2692_v21  ;;  %v7001_v21 = vpack.c.bf16 %v2960_v41, %v2959_v40 }
 0xfda   :  { %7002 = vmatprep.subr.bf16.mxu1 %v7001_v21 }
0x1064   :  { %v2697_v56 = vpop.xlane.xlu1 %2696 }
0x1065   :  { %v2699_v57 = vmul.f32 0.03125, %v2697_v56  ;;  %v2694_v58 = vpop.xlane.xlu0 %2693 }
0x1066   :  { %v2698_v59 = vmul.f32 0.03125, %v2694_v58 }
0x1067   :  { %v2701_v60 = vadd.f32 1e-06, %v2699_v57 }
0x1068   :  { %v2700_v61 = vadd.f32 1e-06, %v2698_v59 }
0x1069   :  { %7170 = vrsqrt.f32 %v2701_v60  ;;  %v5984_v60 = vld [vmem:[%s8255_s10] ss:$0 sm:$0xff] }
0x106a   :  { %7172 = vrsqrt.f32 %v2700_v61 }
0x1073   :  { %v7171_v62 = vpop.eup %7170 }
0x1074   :  { %v7173_v0 = vpop.eup %7172  ;;  %v2705_v1 = vmul.f32 %v7171_v62, %v2689_v37 }
0x1075   :  { %v2704_v2 = vmul.f32 %v7173_v0, %v2688_v38  ;;  %v5985_v0 = vld [vmem:[%s8207_s13] ss:$0 sm:$0xff] }
0x1076   :  { %v2713_v4 = vmul.f32 %v5976_v63, %v2705_v1 }
0x1077   :  { %v2712_v5 = vmul.f32 %v5976_v63, %v2704_v2 }
0x1078   :  { %v2721_v7 = vadd.f32 %v5977_v3, %v2713_v4  ;;  %v3047_v4 = vld [vmem:[%s8209_s15 + $0x18] sm:$0xff] }
0x1079   :  { %v2720_v6 = vadd.f32 %v5977_v3, %v2712_v5  ;;  %v3046_v3 = vld [vmem:[%s8209_s15 + $0x10] sm:$0xff] }
0x107b   :  { %6597 = vmatprep.mubr.msk.f32.mxu1 %vm99_vm0, %v2720_v6 }
0x107c   :  { %6598 = vmatmul.mubr.msk.f32.vlgmr.msra.gmra.mrb[32].mxu1 %vm99_vm0, %v2721_v7 }
0x107d   :  { %7004 = vmatpush3.bf16.msra.mxu1 %v7001_v21 }
0x107e   :  { %7006 = vmatprep.subr.bf16.mxu1 %v7005_v46 }
0x1081   :  { %7008 = vmatpush3.bf16.msra.mxu1 %v7005_v46 }
0x1082   :  { %7010 = vmatprep.subr.bf16.mxu1 %v7009_v52 }
0x114f   :  { %v6599_v13 = vpop.f32.mrb[32].mxu1 }
0x1150   :  { %v2811_v14 = vadd.f32 %v6599_v13, %v5978_v12  ;;  %v2805_v15 = vpop.f32.mrb[33].mxu1  ;;  %v5998_v13 = vld [vmem:[%s8208_s14 + $0x20] sm:$0xff] }
0x1151   :  { %v2806_v16 = vadd.f32 %v5978_v12, %v2805_v15 }
0x1152   :  { %v2815_v18 = vmax.f32 %v2811_v14, 0.0  ;;  %v5999_v14 = vld [vmem:[%s8208_s14 + $0x28] sm:$0xff] }
0x1153   :  { %v2814_v17 = vmax.f32 %v2806_v16, 0.0  ;;  %v7025_v15 = vpack.c.bf16 %v5999_v14, %v5998_v13 }
0x1155   :  { %6616 = vmatprep.mubr.msk.f32.mxu0 %vm2831_vm3, %v2814_v17  ;;  %v6000_v17 = vld [vmem:[%s8208_s14 + $0x30] sm:$0xff] }
0x1156   :  { %6617 = vmatmul.mubr.msk.f32.vlgmr.msra.gmra.mrb[26].mxu0 %vm2831_vm3, %v2815_v18  ;;  %v6001_v18 = vld [vmem:[%s8208_s14 + $0x38] sm:$0xff] }
0x1157   :  { %7020 = vmatpush3.bf16.msra.mxu0 %v7017_v43 }
0x1158   :  { %7022 = vmatprep.subr.bf16.mxu0 %v7021_v49 }
0x115b   :  { %7024 = vmatpush3.bf16.msra.mxu0 %v7021_v49  ;;  %v6004_v49 = vld [vmem:[%s8209_s15 + $0x20] sm:$0xff] }
0x115c   :  { %6662 = vmatprep.subr.mxu0 %v7246_v23 }
0x1229   :  { %v6618_v20 = vpop.f32.mrb[26].mxu0 }
0x122a   :  { %v2910_v22 = vadd.f32 %v6618_v20, %v5981_v19  ;;  %v2904_v24 = vpop.f32.mrb[27].mxu0  ;;  %v7029_v20 = vpack.c.bf16 %v6001_v18, %v6000_v17 }
0x122b   :  { %v2905_v25 = vadd.f32 %v5981_v19, %v2904_v24  ;;  %v6011_v24 = vld [vmem:[%s8210_s16 + $0x28] sm:$0xff] }
0x122c   :  { %v2914_v26 = vadd.f32 %v2910_v22, %v2721_v7  ;;  %v7013_v7 = vpack.c.bf16 %v3047_v4, %v3046_v3  ;;  %v6010_v22 = vld [vmem:[%s8210_s16 + $0x20] sm:$0xff] }
0x122d   :  { %v2913_v27 = vadd.f32 %v2905_v25, %v2720_v6  ;;  %v7041_v25 = vpack.c.bf16 %v6011_v24, %v6010_v22  ;;  %v6027_v24 = vld [vmem:[%s8208_s14 + $0x40] sm:$0xff] }
0x122e   :  { %v2920_v28 = vsel %vm99_vm0, %v2914_v26, 0.0 }
0x122f   :  { %2921 = vadd.xlane.f32.xlu1 %v2920_v28  ;;  %v2917_v29 = vsel %vm99_vm0, %v2913_v27, 0.0 }
0x1230   :  { %2918 = vadd.xlane.f32.xlu0 %v2917_v29 }
0x12bc   :  { %v2922_v30 = vpop.xlane.xlu1 %2921 }
0x12bd   :  { %v2924_v31 = vmul.f32 0.03125, %v2922_v30  ;;  %v2919_v32 = vpop.xlane.xlu0 %2918 }
0x12be   :  { %v2923_v33 = vmul.f32 0.03125, %v2919_v32 }
0x12bf   :  { %v2926_v34 = vsub.f32 %v2914_v26, %v2924_v31  ;;  %v6012_v26 = vld [vmem:[%s8210_s16 + $0x30] sm:$0xff] }
0x12c0   :  { %v2925_v35 = vsub.f32 %v2913_v27, %v2923_v33  ;;  %v6013_v27 = vld [vmem:[%s8210_s16 + $0x38] sm:$0xff] }
0x12c1   :  { %v2928_v36 = vmul.f32 %v2926_v34, %v2926_v34  ;;  %v7045_v28 = vpack.c.bf16 %v6013_v27, %v6012_v26 }
0x12c2   :  { %v2927_v37 = vmul.f32 %v2925_v35, %v2925_v35 }
0x12c3   :  { %v2932_v38 = vsel %vm99_vm0, %v2928_v36, 0.0 }
0x12c4   :  { %2933 = vadd.xlane.f32.xlu1 %v2932_v38  ;;  %v2929_v39 = vsel %vm99_vm0, %v2927_v37, 0.0 }
0x12c5   :  { %2930 = vadd.xlane.f32.xlu0 %v2929_v39 }
0x1351   :  { %v2934_v53 = vpop.xlane.xlu1 %2933 }
0x1352   :  { %v2936_v54 = vmul.f32 0.03125, %v2934_v53  ;;  %v2931_v55 = vpop.xlane.xlu0 %2930  ;;  %v7033_v53 = vpack.c.bf16 %v6005_v50, %v6004_v49 }
0x1353   :  { %v2935_v56 = vmul.f32 0.03125, %v2931_v55  ;;  %v6006_v55 = vld [vmem:[%s8209_s15 + $0x30] sm:$0xff] }
0x1354   :  { %v2938_v57 = vadd.f32 1e-06, %v2936_v54 }
0x1355   :  { %v2937_v58 = vadd.f32 1e-06, %v2935_v56  ;;  %v6007_v56 = vld [vmem:[%s8209_s15 + $0x38] sm:$0xff] }
0x1356   :  { %7174 = vrsqrt.f32 %v2938_v57 }
0x1357   :  { %7176 = vrsqrt.f32 %v2937_v58  ;;  %v7037_v58 = vpack.c.bf16 %v6007_v56, %v6006_v55 }
0x1360   :  { %v7175_v59 = vpop.eup %7174 }
0x1361   :  { %v7177_v61 = vpop.eup %7176  ;;  %v2942_v62 = vmul.f32 %v7175_v59, %v2926_v34 }
0x1362   :  { %v2941_v63 = vmul.f32 %v7177_v61, %v2925_v35 }
0x1363   :  { %v2950_v1 = vmul.f32 %v5984_v60, %v2942_v62 }
0x1364   :  { %v2949_v2 = vmul.f32 %v5984_v60, %v2941_v63 }
0x1365   :  { %v7825_v6 = vadd.f32 %v5985_v0, %v2950_v1 }
0x1366   :  { %v7823_v5 = vadd.f32 %v5985_v0, %v2949_v2 }
0x1368   :  { %6627 = vmatprep.mubr.msk.f32.mxu1 %vm99_vm0, %v7823_v5  ;;  %6649 = vmatprep.mubr.msk.f32.mxu0 %vm99_vm0, %v7823_v5 }
0x1369   :  { %6628 = vmatmul.mubr.msk.f32.vlgmr.msra.gmra.mrb[34].mxu1 %vm99_vm0, %v7825_v6  ;;  %6650 = vmatmul.mubr.msk.f32.vlgmr.msra.gmra.mrb[28].mxu0 %vm99_vm0, %v7825_v6 }
0x136a   :  { %7012 = vmatpush3.bf16.msra.mxu1 %v7009_v52  ;;  %6638 = vmatprep.mubr.msk.f32.mxu1 %vm99_vm0, %v7823_v5 }
0x136b   :  { %7014 = vmatprep.subr.bf16.mxu1 %v7013_v7  ;;  %6664 = vmatprep.mubr.msk.f32.mxu0 %vm7247_vm1, %v7246_v23 }
0x136e   :  { %7016 = vmatpush3.bf16.msra.mxu1 %v7013_v7 }
0x136f   :  { %6652 = vmatprep.subr.mxu1 %v7246_v23 }
0x1371   :  { %6639 = vmatmul.mubr.msk.f32.vlgmr.msra.gmra.mrb[36].mxu1 %vm99_vm0, %v7825_v6 }
0x1372   :  { %6654 = vmatprep.mubr.msk.f32.mxu1 %vm7247_vm1, %v7246_v23 }
0x143c   :  { %v6629_v9 = vpop.f32.mrb[34].mxu1  ;;  %v7844_v10 = vpop.f32.mrb[28].mxu0 }
0x143d   :  { %v3035_v11 = vpop.f32.mrb[35].mxu1  ;;  %v3193_v12 = vpop.f32.mrb[29].mxu0 }
0x1444   :  { %v6640_v16 = vpop.f32.mrb[36].mxu1 }
0x1445   :  { %v3114_v19 = vpop.f32.mrb[37].mxu1  ;;  %6663 = vmatpush3.xpose.msk.msra.mxu0 %vm339_vm2, %v6640_v16 }
0x1446   :  { %6653 = vmatpush3.xpose.msk.msra.mxu1 %vm339_vm2, %v3114_v19  ;;  %7026 = vmatprep.subr.bf16.mxu0 %v7025_v15 }
0x1447   :  { %6657 = vmatprep.subr.mxu1 %v7246_v23 }
0x1448   :  { %6665 = vmatmul.mubr.msk.f32.vlgmr.msra.gmra.mrb[30].mxu0 %vm339_vm2, %v6629_v9 }
0x1449   :  { %6655 = vmatmul.mubr.msk.f32.vlgmr.msra.gmra.mrb[38].mxu1 %vm339_vm2, %v3035_v11  ;;  %7028 = vmatpush3.bf16.msra.mxu0 %v7025_v15 }
0x144a   :  { %6680 = vmatprep.mubr.msk.f32.mxu0 %vm99_vm0, %v7823_v5  ;;  %6658 = vmatpush3.msra.mxu1 %v3193_v12 }
0x144b   :  { %7030 = vmatprep.subr.bf16.mxu0 %v7029_v20  ;;  %6659 = vmatprep.mubr.msk.f32.mxu1 %vm7247_vm1, %v7246_v23 }
0x144c   :  { %6667 = vmatprep.subr.mxu1 %v7246_v23 }
0x144d   :  { %7032 = vmatpush3.bf16.msra.mxu0 %v7029_v20 }
0x144e   :  { %7042 = vmatprep.subr.bf16.mxu0 %v7041_v25 }
0x1450   :  { %6681 = vmatmul.mubr.msk.f32.vlgmr.msra.gmra.mrb[32].mxu0 %vm99_vm0, %v7825_v6 }
0x1451   :  { %7044 = vmatpush3.bf16.msra.mxu0 %v7041_v25  ;;  %6702 = vmatprep.mubr.msk.f32.mxu0 %vm99_vm0, %v7823_v5  ;;  %v6028_v25 = vld [vmem:[%s8208_s14 + $0x48] sm:$0xff] }
0x1452   :  { %7046 = vmatprep.subr.bf16.mxu0 %v7045_v28 }
0x1455   :  { %7048 = vmatpush3.bf16.msra.mxu0 %v7045_v28  ;;  %v7049_v28 = vpack.c.bf16 %v6028_v25, %v6027_v24  ;;  %v6066_v25 = vld [vmem:[%s8210_s16 + $0x60] sm:$0xff] }
0x1456   :  { %6715 = vmatprep.subr.mxu0 %v7246_v23 }
0x1458   :  { %6703 = vmatmul.mubr.msk.f32.vlgmr.msra.gmra.mrb[34].mxu0 %vm99_vm0, %v7825_v6 }
0x1459   :  { %6717 = vmatprep.mubr.msk.f32.mxu0 %vm7247_vm1, %v7246_v23 }
0x151b   :  { %v3434_v29 = vpop.f32.mrb[30].mxu0 }
0x151c   :  { %v3274_v30 = vpop.f32.mrb[38].mxu1  ;;  %v6666_v31 = vpop.f32.mrb[31].mxu0  ;;  %v3438_v32 = vsel %vm339_vm2, %v3434_v29, -inf }
0x151d   :  { %3439 = vmax.xlane.f32.xlu1 %v3438_v32  ;;  %v6656_v33 = vpop.f32.mrb[39].mxu1  ;;  %v3278_v34 = vsel %vm339_vm2, %v3274_v30, -inf  ;;  %v6030_v31 = vld [vmem:[%s8208_s14 + $0x58] sm:$0xff] }
0x151e   :  { %3279 = vmax.xlane.f32.xlu0 %v3278_v34  ;;  %v6039_v34 = vld [vmem:[%s8210_s16 + $0x40] sm:$0xff] }
0x1523   :  { %v6682_v35 = vpop.f32.mrb[32].mxu0 }
0x1524   :  { %v3594_v36 = vpop.f32.mrb[33].mxu0 }
0x152b   :  { %v7891_v37 = vpop.f32.mrb[34].mxu0 }
0x152c   :  { %v3754_v38 = vpop.f32.mrb[35].mxu0 }
0x15aa   :  { %v3440_v39 = vpop.xlane.xlu1 %3439 }
0x15ab   :  { %v3441_v40 = vsub.f32 %v3434_v29, %v3440_v39  ;;  %v3280_v41 = vpop.xlane.xlu0 %3279 }
0x15ac   :  { %v3281_v21 = vsub.f32 %v3274_v30, %v3280_v41  ;;  %v6029_v30 = vld [vmem:[%s8208_s14 + $0x50] sm:$0xff]  ;;  %v3522_v41 = vld [vmem:[%s8211_s17] sm:$0xff] }
0x15ad   :  { %v3442_v8 = vmul.f32 1.442695, %v3441_v40  ;;  %v7053_v33 = vpack.c.bf16 %v6030_v31, %v6029_v30  ;;  %v6022_v40 = vld [vmem:[%s8211_s17 + $0x8] sm:$0xff]  ;;  %v6051_v31 = vld [vmem:[%s8211_s17 + $0x10] sm:$0xff] }
0x15ae   :  { %v3282_v42 = vmul.f32 1.442695, %v3281_v21 }
0x15af   :  { %7178 = vpow2.f32 %v3442_v8  ;;  %v6033_v8 = vld [vmem:[%s8209_s15 + $0x40] sm:$0xff] }
0x15b0   :  { %7180 = vpow2.f32 %v3282_v42  ;;  %v6034_v42 = vld [vmem:[%s8209_s15 + $0x48] sm:$0xff] }
0x15b9   :  { %v7179_v43 = vpop.eup %7178 }
0x15ba   :  { %v7181_v44 = vpop.eup %7180  ;;  %v3444_v45 = vsel %vm339_vm2, %v7179_v43, 0.0 }
0x15bb   :  { %3445 = vadd.xlane.f32.xlu1 %v3444_v45  ;;  %v3284_v46 = vsel %vm339_vm2, %v7181_v44, 0.0 }
0x15bc   :  { %3285 = vadd.xlane.f32.xlu0 %v3284_v46 }
0x1648   :  { %v3446_v47 = vpop.xlane.xlu1 %3445 }
0x1649   :  { %v3286_v48 = vpop.xlane.xlu0 %3285 }
0x164a   :  { %7182 = vrcp.f32 %v3286_v48  ;;  %v6036_v48 = vld [vmem:[%s8209_s15 + $0x58] sm:$0xff] }
0x164b   :  { %7184 = vrcp.f32 %v3446_v47  ;;  %v6035_v47 = vld [vmem:[%s8209_s15 + $0x50] sm:$0xff] }
0x164c   :  { %v7061_v49 = vpack.c.bf16 %v6036_v48, %v6035_v47 }
0x1654   :  { %v7183_v51 = vpop.eup %7182 }
0x1655   :  { %v3288_v52 = vmul.f32 %v7183_v51, %v7181_v44  ;;  %v7185_v54 = vpop.eup %7184  ;;  %v7057_v44 = vpack.c.bf16 %v6034_v42, %v6033_v8 }
0x1656   :  { %v3448_v57 = vmul.f32 %v7185_v54, %v7179_v43 }
0x1657   :  { %6660 = vmatmul.mubr.msk.f32.vlgmr.msra.gmra.mrb[40].mxu1 %vm339_vm2, %v3288_v52 }
0x1658   :  { %6668 = vmatpush3.msra.mxu1 %v7844_v10  ;;  %6669 = vmatprep.mubr.msk.f32.mxu1 %vm7247_vm1, %v7246_v23 }
0x1659   :  { %7034 = vmatprep.subr.bf16.mxu1 %v7033_v53 }
0x165b   :  { %6670 = vmatmul.mubr.msk.f32.vlgmr.msra.gmra.mrb[42].mxu1 %vm339_vm2, %v3448_v57 }
0x165c   :  { %7036 = vmatpush3.bf16.msra.mxu1 %v7033_v53  ;;  %6691 = vmatprep.mubr.msk.f32.mxu1 %vm99_vm0, %v7823_v5 }
0x165d   :  { %7038 = vmatprep.subr.bf16.mxu1 %v7037_v58 }
0x1660   :  { %7040 = vmatpush3.bf16.msra.mxu1 %v7037_v58 }
0x1661   :  { %6705 = vmatprep.subr.mxu1 %v7246_v23 }
0x1663   :  { %6692 = vmatmul.mubr.msk.f32.vlgmr.msra.gmra.mrb[44].mxu1 %vm99_vm0, %v7825_v6 }
0x1664   :  { %6707 = vmatprep.mubr.msk.f32.mxu1 %vm7247_vm1, %v7246_v23 }
0x172a   :  { %v7919_v59 = vpop.f32.mrb[40].mxu1 }
0x172b   :  { %v6661_v60 = vpop.f32.mrb[41].mxu1 }
0x172e   :  { %v7921_v61 = vpop.f32.mrb[42].mxu1 }
0x172f   :  { %v6671_v62 = vpop.f32.mrb[43].mxu1 }
0x1736   :  { %v6693_v63 = vpop.f32.mrb[44].mxu1 }
0x1737   :  { %v3674_v0 = vpop.f32.mrb[45].mxu1  ;;  %6716 = vmatpush3.xpose.msk.msra.mxu0 %vm339_vm2, %v6693_v63 }
0x1738   :  { %6706 = vmatpush3.xpose.msk.msra.mxu1 %vm339_vm2, %v3674_v0  ;;  %6725 = vmatprep.subr.mxu0 %v6022_v40 }
0x1739   :  { %6710 = vmatprep.subr.mxu1 %v7246_v23 }
0x173a   :  { %6718 = vmatmul.mubr.msk.f32.vlgmr.msra.gmra.mrb[36].mxu0 %vm339_vm2, %v6682_v35  ;;  %v6040_v35 = vld [vmem:[%s8210_s16 + $0x48] sm:$0xff] }
0x173b   :  { %6708 = vmatmul.mubr.msk.f32.vlgmr.msra.gmra.mrb[46].mxu1 %vm339_vm2, %v3594_v36  ;;  %v7065_v36 = vpack.c.bf16 %v6040_v35, %v6039_v34  ;;  %6726 = vmatpush3.msra.mxu0 %v6022_v40 }
0x173c   :  { %6711 = vmatpush3.msra.mxu1 %v3754_v38  ;;  %6712 = vmatprep.mubr.msk.f32.mxu1 %vm7247_vm1, %v7246_v23  ;;  %v6042_v38 = vld [vmem:[%s8210_s16 + $0x58] sm:$0xff] }
0x173d   :  { %6720 = vmatprep.subr.mxu1 %v7246_v23  ;;  %6730 = vmatprep.subr.mxu0 %v3522_v41 }
0x180d   :  { %v3995_v1 = vpop.f32.mrb[36].mxu0 }
0x180e   :  { %v3835_v2 = vpop.f32.mrb[46].mxu1  ;;  %v6719_v3 = vpop.f32.mrb[37].mxu0  ;;  %v3999_v4 = vsel %vm339_vm2, %v3995_v1, -inf }
0x180f   :  { %4000 = vmax.xlane.f32.xlu1 %v3999_v4  ;;  %v6709_v7 = vpop.f32.mrb[47].mxu1  ;;  %v3839_v9 = vsel %vm339_vm2, %v3835_v2, -inf }
0x1810   :  { %3840 = vmax.xlane.f32.xlu0 %v3839_v9 }
0x189c   :  { %v4001_v10 = vpop.xlane.xlu1 %4000 }
0x189d   :  { %v4002_v11 = vsub.f32 %v3995_v1, %v4001_v10  ;;  %v3841_v12 = vpop.xlane.xlu0 %3840 }
0x189e   :  { %v3842_v13 = vsub.f32 %v3835_v2, %v3841_v12 }
0x189f   :  { %v4003_v14 = vmul.f32 1.442695, %v4002_v11 }
0x18a0   :  { %v3843_v15 = vmul.f32 1.442695, %v3842_v13  ;;  %v6054_v13 = vld [vmem:[%s8208_s14 + $0x60] sm:$0xff] }
0x18a1   :  { %7186 = vpow2.f32 %v4003_v14  ;;  %v6055_v14 = vld [vmem:[%s8208_s14 + $0x68] sm:$0xff] }
0x18a2   :  { %7188 = vpow2.f32 %v3843_v15 }
0x18ab   :  { %v7187_v16 = vpop.eup %7186 }
0x18ac   :  { %v7189_v17 = vpop.eup %7188  ;;  %v4005_v18 = vsel %vm339_vm2, %v7187_v16, 0.0 }
0x18ad   :  { %4006 = vadd.xlane.f32.xlu1 %v4005_v18  ;;  %v3845_v19 = vsel %vm339_vm2, %v7189_v17, 0.0  ;;  %v6056_v18 = vld [vmem:[%s8208_s14 + $0x70] sm:$0xff] }
0x18ae   :  { %3846 = vadd.xlane.f32.xlu0 %v3845_v19  ;;  %v6057_v19 = vld [vmem:[%s8208_s14 + $0x78] sm:$0xff] }
0x18af   :  { %v7077_v24 = vpack.c.bf16 %v6057_v19, %v6056_v18 }
0x193a   :  { %v4007_v20 = vpop.xlane.xlu1 %4006 }
0x193b   :  { %v3847_v22 = vpop.xlane.xlu0 %3846 }
0x193c   :  { %7190 = vrcp.f32 %v3847_v22 }
0x193d   :  { %7192 = vrcp.f32 %v4007_v20 }
0x1946   :  { %v7191_v26 = vpop.eup %7190 }
0x1947   :  { %v3849_v27 = vmul.f32 %v7191_v26, %v7189_v17  ;;  %v7193_v29 = vpop.eup %7192  ;;  %v7073_v17 = vpack.c.bf16 %v6055_v14, %v6054_v13  ;;  %v6067_v26 = vld [vmem:[%s8210_s16 + $0x68] sm:$0xff] }
0x1948   :  { %v4009_v32 = vmul.f32 %v7193_v29, %v7187_v16  ;;  %v6069_v29 = vld [vmem:[%s8210_s16 + $0x78] sm:$0xff] }
0x1949   :  { %6713 = vmatmul.mubr.msk.f32.vlgmr.msra.gmra.mrb[48].mxu1 %vm339_vm2, %v3849_v27  ;;  %v7089_v27 = vpack.c.bf16 %v6067_v26, %v6066_v25 }
0x194a   :  { %6721 = vmatpush3.msra.mxu1 %v7891_v37  ;;  %6722 = vmatprep.mubr.msk.f32.mxu1 %vm7247_vm1, %v7246_v23  ;;  %v6041_v37 = vld [vmem:[%s8210_s16 + $0x50] sm:$0xff] }
0x194b   :  { %7050 = vmatprep.subr.bf16.mxu1 %v7049_v28  ;;  %v7069_v39 = vpack.c.bf16 %v6042_v38, %v6041_v37  ;;  %v6063_v37 = vld [vmem:[%s8209_s15 + $0x78] sm:$0xff] }
0x194d   :  { %6723 = vmatmul.mubr.msk.f32.vlgmr.msra.gmra.mrb[50].mxu1 %vm339_vm2, %v4009_v32  ;;  %v6060_v32 = vld [vmem:[%s8209_s15 + $0x60] sm:$0xff] }
0x194e   :  { %7052 = vmatpush3.bf16.msra.mxu1 %v7049_v28  ;;  %6743 = vmatprep.mubr.msk.f32.mxu1 %vm99_vm0, %v7823_v5  ;;  %v6068_v28 = vld [vmem:[%s8210_s16 + $0x70] sm:$0xff] }
0x194f   :  { %7054 = vmatprep.subr.bf16.mxu1 %v7053_v33  ;;  %v7093_v30 = vpack.c.bf16 %v6069_v29, %v6068_v28  ;;  %v5584_v28 = vld [vmem:[%s8214_s20 + $0x8] sm:$0xff] }
0x1952   :  { %7056 = vmatpush3.bf16.msra.mxu1 %v7053_v33  ;;  %v6061_v33 = vld [vmem:[%s8209_s15 + $0x68] sm:$0xff] }
0x1953   :  { %7066 = vmatprep.subr.bf16.mxu1 %v7065_v36  ;;  %v7081_v34 = vpack.c.bf16 %v6061_v33, %v6060_v32  ;;  %v5677_v33 = vld [vmem:[%s8216_s22] sm:$0xff] }
0x1955   :  { %6744 = vmatmul.mubr.msk.f32.vlgmr.msra.gmra.mrb[52].mxu1 %vm99_vm0, %v7825_v6 }
0x1956   :  { %7068 = vmatpush3.bf16.msra.mxu1 %v7065_v36  ;;  %6765 = vmatprep.mubr.msk.f32.mxu1 %vm99_vm0, %v7823_v5  ;;  %v6062_v36 = vld [vmem:[%s8209_s15 + $0x70] sm:$0xff] }
0x1957   :  { %7070 = vmatprep.subr.bf16.mxu1 %v7069_v39 }
0x195a   :  { %7072 = vmatpush3.bf16.msra.mxu1 %v7069_v39  ;;  %v7085_v39 = vpack.c.bf16 %v6063_v37, %v6062_v36  ;;  %v5680_v37 = vld [vmem:[%s8216_s22 + $0x18] sm:$0xff] }
0x195b   :  { %6773 = vmatprep.subr.mxu1 %v7246_v23 }
0x195d   :  { %6766 = vmatmul.mubr.msk.f32.vlgmr.msra.gmra.mrb[54].mxu1 %vm99_vm0, %v7825_v6 }
0x195e   :  { %6775 = vmatprep.mubr.msk.f32.mxu1 %vm7247_vm1, %v7246_v23 }
0x1a1c   :  { %v3919_v21 = vpop.f32.mrb[48].mxu1 }
0x1a1d   :  { %v6714_v43 = vpop.f32.mrb[49].mxu1  ;;  %6727 = vmatprep.mubr.msk.f32.mxu0 %vm339_vm2, %v3919_v21 }
0x1a20   :  { %v4079_v45 = vpop.f32.mrb[50].mxu1 }
0x1a21   :  { %v6724_v46 = vpop.f32.mrb[51].mxu1  ;;  %6728 = vmatmul.mubr.msk.f32.vlgmr.msra.gmra.mrb[38].mxu0 %vm339_vm2, %v4079_v45 }
0x1a22   :  { %6731 = vmatpush3.msra.mxu0 %v3522_v41  ;;  %6732 = vmatprep.mubr.msk.f32.mxu0 %vm339_vm2, %v7919_v59 }
0x1a23   :  { %7058 = vmatprep.subr.bf16.mxu0 %v7057_v44 }
0x1a28   :  { %v6745_v50 = vpop.f32.mrb[52].mxu1 }
0x1a29   :  { %v4318_v51 = vpop.f32.mrb[53].mxu1  ;;  %6733 = vmatmul.mubr.msk.f32.vlgmr.msra.gmra.mrb[38].mxu0 %vm339_vm2, %v7921_v61 }
0x1a2a   :  { %7060 = vmatpush3.bf16.msra.mxu0 %v7057_v44  ;;  %6754 = vmatprep.mubr.msk.f32.mxu0 %vm99_vm0, %v7823_v5 }
0x1a2b   :  { %7062 = vmatprep.subr.bf16.mxu0 %v7061_v49 }
0x1a2e   :  { %7064 = vmatpush3.bf16.msra.mxu0 %v7061_v49 }
0x1a2f   :  { %6768 = vmatprep.subr.mxu0 %v7246_v23 }
0x1a30   :  { %v6767_v52 = vpop.f32.mrb[54].mxu1 }
0x1a31   :  { %6755 = vmatmul.mubr.msk.f32.vlgmr.msra.gmra.mrb[40].mxu0 %vm99_vm0, %v7825_v6  ;;  %v4478_v53 = vpop.f32.mrb[55].mxu1 }
0x1a32   :  { %6774 = vmatpush3.msra.mxu1 %v4478_v53  ;;  %6770 = vmatprep.mubr.msk.f32.mxu0 %vm7247_vm1, %v7246_v23 }
0x1a33   :  { %6783 = vmatprep.subr.mxu1 %v7246_v23 }
0x1b04   :  { %v6756_v54 = vpop.f32.mrb[40].mxu0 }
0x1b05   :  { %v4398_v55 = vpop.f32.mrb[41].mxu0 }
0x1b06   :  { %6769 = vmatpush3.xpose.msk.msra.mxu0 %vm339_vm2, %v4398_v55 }
0x1b07   :  { %6778 = vmatprep.subr.mxu0 %v7246_v23 }
0x1b09   :  { %6771 = vmatmul.mubr.msk.f32.vlgmr.msra.gmra.mrb[42].mxu0 %vm339_vm2, %v4318_v51 }
0x1b0a   :  { %6779 = vmatpush3.xpose.msk.msra.mxu0 %vm339_vm2, %v6756_v54  ;;  %6780 = vmatprep.mubr.msk.f32.mxu0 %vm7247_vm1, %v7246_v23 }
0x1b0b   :  { %6788 = vmatprep.subr.mxu0 %v6051_v31 }
0x1b0d   :  { %6781 = vmatmul.mubr.msk.f32.vlgmr.msra.gmra.mrb[44].mxu0 %vm339_vm2, %v6745_v50 }
0x1b0e   :  { %6789 = vmatpush3.msra.mxu0 %v6051_v31  ;;  %v5586_v31 = vld [vmem:[%s8214_s20 + $0x18] sm:$0xff] }
0x1b0f   :  { %7082 = vmatprep.subr.bf16.mxu0 %v7081_v34 }
0x1bdc   :  { %v4559_v56 = vpop.f32.mrb[42].mxu0 }
0x1bdd   :  { %v6772_v57 = vpop.f32.mrb[43].mxu0  ;;  %v4563_v58 = vsel %vm339_vm2, %v4559_v56, -inf }
0x1bde   :  { %4564 = vmax.xlane.f32.xlu0 %v4563_v58 }
0x1be0   :  { %v4719_v59 = vpop.f32.mrb[44].mxu0 }
0x1be1   :  { %v6782_v60 = vpop.f32.mrb[45].mxu0  ;;  %v4723_v61 = vsel %vm339_vm2, %v4719_v59, -inf }
0x1be2   :  { %4724 = vmax.xlane.f32.xlu1 %v4723_v61 }
0x1c6b   :  { %v4565_v62 = vpop.xlane.xlu0 %4564 }
0x1c6c   :  { %v4566_v63 = vsub.f32 %v4559_v56, %v4565_v62 }
0x1c6e   :  { %v4567_v0 = vmul.f32 1.442695, %v4566_v63 }
0x1c6f   :  { %v4725_v1 = vpop.xlane.xlu1 %4724 }
0x1c70   :  { %7194 = vpow2.f32 %v4567_v0  ;;  %v4726_v2 = vsub.f32 %v4719_v59, %v4725_v1 }
0x1c72   :  { %v4727_v3 = vmul.f32 1.442695, %v4726_v2 }
0x1c74   :  { %7196 = vpow2.f32 %v4727_v3 }
0x1c7a   :  { %v7195_v4 = vpop.eup %7194 }
0x1c7b   :  { %v4569_v7 = vsel %vm339_vm2, %v7195_v4, 0.0 }
0x1c7c   :  { %4570 = vadd.xlane.f32.xlu0 %v4569_v7 }
0x1c7e   :  { %v7197_v9 = vpop.eup %7196 }
0x1c7f   :  { %v4729_v10 = vsel %vm339_vm2, %v7197_v9, 0.0 }
0x1c80   :  { %4730 = vadd.xlane.f32.xlu1 %v4729_v10 }
0x1d09   :  { %v4571_v11 = vpop.xlane.xlu0 %4570 }
0x1d0a   :  { %7198 = vrcp.f32 %v4571_v11 }
0x1d0d   :  { %v4731_v12 = vpop.xlane.xlu1 %4730 }
0x1d0e   :  { %7200 = vrcp.f32 %v4731_v12 }
0x1d14   :  { %v7199_v15 = vpop.eup %7198 }
0x1d15   :  { %v4573_v16 = vmul.f32 %v7199_v15, %v7195_v4  ;;  %v6078_v4 = vld [vmem:[%s8211_s17 + $0x18] sm:$0xff] }
0x1d17   :  { %6776 = vmatmul.mubr.msk.f32.vlgmr.msra.gmra.mrb[56].mxu1 %vm339_vm2, %v4573_v16 }
0x1d18   :  { %v7201_v20 = vpop.eup %7200  ;;  %6784 = vmatpush3.msra.mxu1 %v6767_v52  ;;  %6785 = vmatprep.mubr.msk.f32.mxu1 %vm7247_vm1, %v7246_v23 }
0x1d19   :  { %v4733_v22 = vmul.f32 %v7201_v20, %v7197_v9  ;;  %7074 = vmatprep.subr.bf16.mxu1 %v7073_v17 }
0x1d1b   :  { %6786 = vmatmul.mubr.msk.f32.vlgmr.msra.gmra.mrb[58].mxu1 %vm339_vm2, %v4733_v22 }
0x1d1c   :  { %7076 = vmatpush3.bf16.msra.mxu1 %v7073_v17  ;;  %6801 = vmatprep.mubr.msk.f32.mxu1 %vm99_vm0, %v7823_v5 }
0x1d1d   :  { %7078 = vmatprep.subr.bf16.mxu1 %v7077_v24 }
0x1d20   :  { %7080 = vmatpush3.bf16.msra.mxu1 %v7077_v24 }
0x1d21   :  { %7090 = vmatprep.subr.bf16.mxu1 %v7089_v27 }
0x1d23   :  { %6802 = vmatmul.mubr.msk.f32.vlgmr.msra.gmra.mrb[60].mxu1 %vm99_vm0, %v7825_v6 }
0x1d24   :  { %7092 = vmatpush3.bf16.msra.mxu1 %v7089_v27  ;;  %6823 = vmatprep.mubr.msk.f32.mxu1 %vm99_vm0, %v7823_v5 }
0x1d25   :  { %7094 = vmatprep.subr.bf16.mxu1 %v7093_v30 }
0x1d28   :  { %7096 = vmatpush3.bf16.msra.mxu1 %v7093_v30  ;;  %v5585_v30 = vld [vmem:[%s8214_s20 + $0x10] sm:$0xff] }
0x1d29   :  { %6836 = vmatprep.subr.mxu1 %v7246_v23  ;;  %v7101_v32 = vpack.c.bf16 %v5586_v31, %v5585_v30  ;;  %v6089_v30 = vld [vmem:[%s8218_s24] ss:$0 sm:$0xff] }
0x1d2b   :  { %6824 = vmatmul.mubr.msk.f32.vlgmr.msra.gmra.mrb[62].mxu1 %vm99_vm0, %v7825_v6 }
0x1d2c   :  { %6838 = vmatprep.mubr.msk.f32.mxu1 %vm7247_vm1, %v7246_v23 }
0x1dea   :  { %v4643_v35 = vpop.f32.mrb[56].mxu1 }
0x1deb   :  { %v6777_v38 = vpop.f32.mrb[57].mxu1  ;;  %6790 = vmatprep.mubr.msk.f32.mxu0 %vm339_vm2, %v4643_v35  ;;  %v5679_v35 = vld [vmem:[%s8216_s22 + $0x10] sm:$0xff] }
0x1dec   :  { %v7109_v38 = vpack.c.bf16 %v5680_v37, %v5679_v35 }
0x1dee   :  { %v4803_v40 = vpop.f32.mrb[58].mxu1 }
0x1def   :  { %v6787_v41 = vpop.f32.mrb[59].mxu1  ;;  %6791 = vmatmul.mubr.msk.f32.vlgmr.msra.gmra.mrb[38].mxu0 %vm339_vm2, %v4803_v40  ;;  %v5682_v40 = vld [vmem:[%s8216_s22 + $0x28] sm:$0xff] }
0x1df0   :  { %7084 = vmatpush3.bf16.msra.mxu0 %v7081_v34  ;;  %6812 = vmatprep.mubr.msk.f32.mxu0 %vm99_vm0, %v7823_v5  ;;  %v5678_v34 = vld [vmem:[%s8216_s22 + $0x8] sm:$0xff] }
0x1df1   :  { %7086 = vmatprep.subr.bf16.mxu0 %v7085_v39  ;;  %v7105_v36 = vpack.c.bf16 %v5678_v34, %v5677_v33  ;;  %v6090_v33 = vld [vmem:[%s8219_s25] ss:$0 sm:$0xff] }
0x1df4   :  { %7088 = vmatpush3.bf16.msra.mxu0 %v7085_v39  ;;  %v5681_v39 = vld [vmem:[%s8216_s22 + $0x20] sm:$0xff] }
0x1df5   :  { %6826 = vmatprep.subr.mxu0 %v7246_v23  ;;  %v7113_v41 = vpack.c.bf16 %v5682_v40, %v5681_v39 }
0x1df6   :  { %v6803_v21 = vpop.f32.mrb[60].mxu1 }
0x1df7   :  { %v4963_v8 = vpop.f32.mrb[61].mxu1  ;;  %6813 = vmatmul.mubr.msk.f32.vlgmr.msra.gmra.mrb[46].mxu0 %vm99_vm0, %v7825_v6 }
0x1df8   :  { %6828 = vmatprep.mubr.msk.f32.mxu0 %vm7247_vm1, %v7246_v23 }
0x1dfe   :  { %v6825_v42 = vpop.f32.mrb[62].mxu1 }
0x1dff   :  { %v5123_v43 = vpop.f32.mrb[63].mxu1 }
0x1eca   :  { %v6814_v44 = vpop.f32.mrb[46].mxu0 }
0x1ecb   :  { %v5043_v45 = vpop.f32.mrb[47].mxu0  ;;  %6837 = vmatpush3.xpose.msk.msra.mxu1 %vm339_vm2, %v6814_v44 }
0x1ecc   :  { %6827 = vmatpush3.xpose.msk.msra.mxu0 %vm339_vm2, %v5043_v45 }
0x1ecd   :  { %6831 = vmatprep.subr.mxu0 %v7246_v23 }
0x1ece   :  { %6839 = vmatmul.mubr.msk.f32.vlgmr.msra.gmra.mrb[64].mxu1 %vm339_vm2, %v6803_v21 }
0x1ecf   :  { %6829 = vmatmul.mubr.msk.f32.vlgmr.msra.gmra.mrb[48].mxu0 %vm339_vm2, %v4963_v8 }
0x1ed0   :  { %6832 = vmatpush3.msra.mxu0 %v5123_v43  ;;  %6833 = vmatprep.mubr.msk.f32.mxu0 %vm7247_vm1, %v7246_v23 }
0x1ed1   :  { %6841 = vmatprep.subr.mxu0 %v7246_v23 }
0x1fa1   :  { %v5364_v46 = vpop.f32.mrb[64].mxu1 }
0x1fa2   :  { %v5204_v47 = vpop.f32.mrb[48].mxu0  ;;  %v6840_v48 = vpop.f32.mrb[65].mxu1  ;;  %v5368_v49 = vsel %vm339_vm2, %v5364_v46, -inf }
0x1fa3   :  { %v6830_v50 = vpop.f32.mrb[49].mxu0  ;;  %5369 = vmax.xlane.f32.xlu1 %v5368_v49  ;;  %v5208_v51 = vsel %vm339_vm2, %v5204_v47, -inf }
0x1fa4   :  { %5209 = vmax.xlane.f32.xlu0 %v5208_v51  ;;  %v6082_v51 = vld [vmem:[%s8213_s19] ss:$0 sm:$0xff] }
0x2030   :  { %v5370_v52 = vpop.xlane.xlu1 %5369 }
0x2031   :  { %v5371_v53 = vsub.f32 %v5364_v46, %v5370_v52  ;;  %v5210_v54 = vpop.xlane.xlu0 %5209 }
0x2032   :  { %v5211_v55 = vsub.f32 %v5204_v47, %v5210_v54  ;;  %v6081_v47 = vld [vmem:[%s8212_s18] ss:$0 sm:$0xff] }
0x2033   :  { %v5372_v56 = vmul.f32 1.442695, %v5371_v53 }
0x2034   :  { %v5212_v57 = vmul.f32 1.442695, %v5211_v55 }
0x2035   :  { %7202 = vpow2.f32 %v5372_v56  ;;  %v5683_v56 = vld [vmem:[%s8216_s22 + $0x30] sm:$0xff] }
0x2036   :  { %7204 = vpow2.f32 %v5212_v57  ;;  %v5684_v57 = vld [vmem:[%s8216_s22 + $0x38] sm:$0xff] }
0x203f   :  { %v7203_v58 = vpop.eup %7202 }
0x2040   :  { %v7205_v59 = vpop.eup %7204  ;;  %v5374_v60 = vsel %vm339_vm2, %v7203_v58, 0.0 }
0x2041   :  { %5375 = vadd.xlane.f32.xlu1 %v5374_v60  ;;  %v5214_v61 = vsel %vm339_vm2, %v7205_v59, 0.0 }
0x2042   :  { %5215 = vadd.xlane.f32.xlu0 %v5214_v61 }
0x20ce   :  { %v5376_v62 = vpop.xlane.xlu1 %5375 }
0x20cf   :  { %v5216_v63 = vpop.xlane.xlu0 %5215 }
0x20d0   :  { %7206 = vrcp.f32 %v5216_v63 }
0x20d1   :  { %7208 = vrcp.f32 %v5376_v62 }
0x20da   :  { %v7207_v0 = vpop.eup %7206 }
0x20db   :  { %v5218_v1 = vmul.f32 %v7207_v0, %v7205_v59  ;;  %v7209_v2 = vpop.eup %7208  ;;  %v6083_v59 = vld [vmem:[%s8215_s21] ss:$0 sm:$0xff] }
0x20dc   :  { %v5378_v3 = vmul.f32 %v7209_v2, %v7203_v58  ;;  %v7117_v58 = vpack.c.bf16 %v5684_v57, %v5683_v56  ;;  %v6086_v2 = vld [vmem:[%s8217_s23] ss:$0 sm:$0xff] }
0x20dd   :  { %6834 = vmatmul.mubr.msk.f32.vlgmr.msra.gmra.mrb[50].mxu0 %vm339_vm2, %v5218_v1  ;;  %v6091_v56 = vld [vmem:[%s8220_s26] ss:$0 sm:$0xff] }
0x20de   :  { %6842 = vmatpush3.msra.mxu0 %v6825_v42  ;;  %6843 = vmatprep.mubr.msk.f32.mxu0 %vm7247_vm1, %v7246_v23 }
0x20df   :  { %6846 = vmatprep.subr.mxu0 %v6078_v4 }
0x20e1   :  { %6844 = vmatmul.mubr.msk.f32.vlgmr.msra.gmra.mrb[52].mxu0 %vm339_vm2, %v5378_v3 }
0x20e2   :  { %6847 = vmatpush3.msra.mxu0 %v6078_v4 }
0x20e3   :  { %7106 = vmatprep.subr.bf16.mxu0 %v7105_v36 }
0x21b0   :  { %v5288_v7 = vpop.f32.mrb[50].mxu0 }
0x21b1   :  { %v6835_v9 = vpop.f32.mrb[51].mxu0  ;;  %6848 = vmatprep.mubr.msk.f32.mxu0 %vm339_vm2, %v5288_v7 }
0x21b4   :  { %v5448_v10 = vpop.f32.mrb[52].mxu0 }
0x21b5   :  { %v6845_v11 = vpop.f32.mrb[53].mxu0  ;;  %6849 = vmatmul.mubr.msk.f32.vlgmr.msra.gmra.mrb[38].mxu0 %vm339_vm2, %v5448_v10 }
0x21b6   :  { %7108 = vmatpush3.bf16.msra.mxu0 %v7105_v36 }
0x21b7   :  { %7110 = vmatprep.subr.bf16.mxu0 %v7109_v38 }
0x21ba   :  { %7112 = vmatpush3.bf16.msra.mxu0 %v7109_v38 }
0x21bb   :  { %7114 = vmatprep.subr.bf16.mxu0 %v7113_v41 }
0x21be   :  { %7116 = vmatpush3.bf16.msra.mxu0 %v7113_v41 }
0x21bf   :  { %7118 = vmatprep.subr.bf16.mxu0 %v7117_v58 }
0x21c2   :  { %7120 = vmatpush3.bf16.msra.mxu0 %v7117_v58 }
0x2288   :  { %v6850_v12 = vpop.f32.mrb[38].mxu0 }
0x2289   :  { %v5538_v23 = vadd.f32 %v6850_v12, %v7825_v6  ;;  %v5526_v13 = vpop.f32.mrb[39].mxu0 }
0x228a   :  { %v5537_v14 = vadd.f32 %v5526_v13, %v7823_v5  ;;  %v5583_v5 = vld [vmem:[%s8214_s20] sm:$0xff] }
0x228b   :  { %v5544_v15 = vsel %vm99_vm0, %v5538_v23, 0.0  ;;  %v7097_v29 = vpack.c.bf16 %v5584_v28, %v5583_v5 }
0x228c   :  { %5545 = vadd.xlane.f32.xlu1 %v5544_v15  ;;  %v5541_v16 = vsel %vm99_vm0, %v5537_v14, 0.0 }
0x228d   :  { %5542 = vadd.xlane.f32.xlu0 %v5541_v16  ;;  %7098 = vmatprep.subr.bf16.mxu1 %v7097_v29 }
0x228e   :  { %7100 = vmatpush3.bf16.msra.mxu1 %v7097_v29 }
0x228f   :  { %7102 = vmatprep.subr.bf16.mxu1 %v7101_v32 }
0x2292   :  { %7104 = vmatpush3.bf16.msra.mxu1 %v7101_v32 }
0x2319   :  { %v5546_v17 = vpop.xlane.xlu1 %5545 }
0x231a   :  { %v5548_v18 = vmul.f32 0.03125, %v5546_v17  ;;  %v5543_v19 = vpop.xlane.xlu0 %5542 }
0x231b   :  { %v5547_v20 = vmul.f32 0.03125, %v5543_v19 }
0x231c   :  { %v5550_v22 = vsub.f32 %v5538_v23, %v5548_v18 }
0x231d   :  { %v5549_v24 = vsub.f32 %v5537_v14, %v5547_v20 }
0x231e   :  { %v5552_v25 = vmul.f32 %v5550_v22, %v5550_v22 }
0x231f   :  { %v5551_v26 = vmul.f32 %v5549_v24, %v5549_v24 }
0x2320   :  { %v5556_v27 = vsel %vm99_vm0, %v5552_v25, 0.0 }
0x2321   :  { %5557 = vadd.xlane.f32.xlu1 %v5556_v27  ;;  %v5553_v6 = vsel %vm99_vm0, %v5551_v26, 0.0 }
0x2322   :  { %5554 = vadd.xlane.f32.xlu0 %v5553_v6 }
0x23ae   :  { %v5558_v21 = vpop.xlane.xlu1 %5557 }
0x23af   :  { %v5560_v8 = vmul.f32 0.03125, %v5558_v21  ;;  %v5555_v42 = vpop.xlane.xlu0 %5554 }
0x23b0   :  { %v5559_v43 = vmul.f32 0.03125, %v5555_v42 }
0x23b1   :  { %v5562_v44 = vadd.f32 1e-06, %v5560_v8 }
0x23b2   :  { %v5561_v45 = vadd.f32 1e-06, %v5559_v43 }
0x23b3   :  { %7210 = vrsqrt.f32 %v5562_v44 }
0x23b4   :  { %7212 = vrsqrt.f32 %v5561_v45 }
0x23bd   :  { %v7211_v46 = vpop.eup %7210 }
0x23be   :  { %v7213_v48 = vpop.eup %7212  ;;  %v5566_v49 = vmul.f32 %v7211_v46, %v5550_v22 }
0x23bf   :  { %v5565_v50 = vmul.f32 %v7213_v48, %v5549_v24 }
0x23c0   :  { %v5574_v52 = vmul.f32 %v6081_v47, %v5566_v49 }
0x23c1   :  { %v5573_v53 = vmul.f32 %v6081_v47, %v5565_v50 }
0x23c2   :  { %v5582_v55 = vadd.f32 %v6082_v51, %v5574_v52 }
0x23c3   :  { %v5581_v54 = vadd.f32 %v6082_v51, %v5573_v53 }
0x23c5   :  { %6859 = vmatprep.mubr.msk.f32.mxu1 %vm99_vm0, %v5581_v54 }
0x23c6   :  { %6860 = vmatmul.mubr.msk.f32.vlgmr.msra.gmra.mrb[66].mxu1 %vm99_vm0, %v5582_v55 }
0x2499   :  { %v6861_v60 = vpop.f32.mrb[66].mxu1 }
0x249a   :  { %v5672_v61 = vadd.f32 %v6861_v60, %v6083_v59  ;;  %v5666_v62 = vpop.f32.mrb[67].mxu1  ;;  %v6092_v60 = vld [vmem:[%s8221_s27] ss:$0 sm:$0xff] }
0x249b   :  { %v5667_v63 = vadd.f32 %v6083_v59, %v5666_v62 }
0x249c   :  { %v5676_v1 = vmax.f32 %v5672_v61, 0.0 }
0x249d   :  { %v5675_v0 = vmax.f32 %v5667_v63, 0.0 }
0x249f   :  { %6878 = vmatprep.mubr.msk.f32.mxu0 %vm2831_vm3, %v5675_v0 }
0x24a0   :  { %6879 = vmatmul.mubr.msk.f32.vlgmr.msra.gmra.mrb[54].mxu0 %vm2831_vm3, %v5676_v1 }
0x2573   :  { %v6880_v3 = vpop.f32.mrb[54].mxu0 }
0x2574   :  { %v5770_v4 = vadd.f32 %v6880_v3, %v6086_v2  ;;  %v5764_v7 = vpop.f32.mrb[55].mxu0 }
0x2575   :  { %v5765_v9 = vadd.f32 %v6086_v2, %v5764_v7 }
0x2576   :  { %v5774_v10 = vadd.f32 %v5770_v4, %v5582_v55 }
0x2577   :  { %v5773_v11 = vadd.f32 %v5765_v9, %v5581_v54 }
0x2578   :  { %v5780_v12 = vsel %vm99_vm0, %v5774_v10, 0.0 }
0x2579   :  { %5781 = vadd.xlane.f32.xlu1 %v5780_v12  ;;  %v5777_v23 = vsel %vm99_vm0, %v5773_v11, 0.0 }
0x257a   :  { %5778 = vadd.xlane.f32.xlu0 %v5777_v23 }
0x2606   :  { %v5782_v13 = vpop.xlane.xlu1 %5781 }
0x2607   :  { %v5784_v14 = vmul.f32 0.03125, %v5782_v13  ;;  %v5779_v15 = vpop.xlane.xlu0 %5778 }
0x2608   :  { %v5783_v16 = vmul.f32 0.03125, %v5779_v15 }
0x2609   :  { %v5786_v17 = vsub.f32 %v5774_v10, %v5784_v14 }
0x260a   :  { %v5785_v18 = vsub.f32 %v5773_v11, %v5783_v16 }
0x260b   :  { %v5788_v19 = vmul.f32 %v5786_v17, %v5786_v17 }
0x260c   :  { %v5787_v20 = vmul.f32 %v5785_v18, %v5785_v18 }
0x260d   :  { %v5792_v22 = vsel %vm99_vm0, %v5788_v19, 0.0 }
0x260e   :  { %5793 = vadd.xlane.f32.xlu1 %v5792_v22  ;;  %v5789_v24 = vsel %vm99_vm0, %v5787_v20, 0.0 }
0x260f   :  { %5790 = vadd.xlane.f32.xlu0 %v5789_v24 }
0x269b   :  { %v5794_v25 = vpop.xlane.xlu1 %5793 }
0x269c   :  { %v5796_v26 = vmul.f32 0.03125, %v5794_v25  ;;  %v5791_v27 = vpop.xlane.xlu0 %5790 }
0x269d   :  { %v5795_v6 = vmul.f32 0.03125, %v5791_v27 }
0x269e   :  { %v5798_v5 = vadd.f32 1e-06, %v5796_v26 }
0x269f   :  { %v5797_v28 = vadd.f32 1e-06, %v5795_v6 }
0x26a0   :  { %7214 = vrsqrt.f32 %v5798_v5 }
0x26a1   :  { %7216 = vrsqrt.f32 %v5797_v28 }
0x26aa   :  { %v7215_v29 = vpop.eup %7214 }
0x26ab   :  { %v7217_v31 = vpop.eup %7216  ;;  %v5802_v32 = vmul.f32 %v7215_v29, %v5786_v17 }
0x26ac   :  { %v5801_v34 = vmul.f32 %v7217_v31, %v5785_v18 }
0x26ad   :  { %v5810_v35 = vmul.f32 %v6089_v30, %v5802_v32 }
0x26ae   :  { %v5809_v36 = vmul.f32 %v6089_v30, %v5801_v34 }
0x26af   :  { %v5818_v37 = vadd.f32 %v6090_v33, %v5810_v35 }
0x26b0   :  { %v5817_v38 = vadd.f32 %v6090_v33, %v5809_v36 }
0x26b1   :  { %v5824_v39 = vsel %vm99_vm0, %v5818_v37, 0.0 }
0x26b2   :  { %5825 = vadd.xlane.f32.xlu1 %v5824_v39  ;;  %v5821_v40 = vsel %vm99_vm0, %v5817_v38, 0.0 }
0x26b3   :  { %5822 = vadd.xlane.f32.xlu0 %v5821_v40 }
0x273f   :  { %v5826_v41 = vpop.xlane.xlu1 %5825 }
0x2740   :  { %v5828_v21 = vmul.f32 0.03125, %v5826_v41  ;;  %v5823_v8 = vpop.xlane.xlu0 %5822 }
0x2741   :  { %v5827_v42 = vmul.f32 0.03125, %v5823_v8 }
0x2742   :  { %v5830_v43 = vsub.f32 %v5818_v37, %v5828_v21 }
0x2743   :  { %v5829_v44 = vsub.f32 %v5817_v38, %v5827_v42 }
0x2744   :  { %v5832_v45 = vmul.f32 %v5830_v43, %v5830_v43 }
0x2745   :  { %v5831_v46 = vmul.f32 %v5829_v44, %v5829_v44 }
0x2746   :  { %v5836_v47 = vsel %vm99_vm0, %v5832_v45, 0.0 }
0x2747   :  { %5837 = vadd.xlane.f32.xlu1 %v5836_v47  ;;  %v5833_v48 = vsel %vm99_vm0, %v5831_v46, 0.0 }
0x2748   :  { %5834 = vadd.xlane.f32.xlu0 %v5833_v48 }
0x27d4   :  { %v5838_v49 = vpop.xlane.xlu1 %5837 }
0x27d5   :  { %v5840_v50 = vmul.f32 0.03125, %v5838_v49  ;;  %v5835_v51 = vpop.xlane.xlu0 %5834 }
0x27d6   :  { %v5839_v52 = vmul.f32 0.03125, %v5835_v51 }
0x27d7   :  { %v5842_v53 = vadd.f32 1e-06, %v5840_v50 }
0x27d8   :  { %v5841_v54 = vadd.f32 1e-06, %v5839_v52 }
0x27d9   :  { %7218 = vrsqrt.f32 %v5842_v53 }
0x27da   :  { %7220 = vrsqrt.f32 %v5841_v54 }
0x27e3   :  { %v7219_v55 = vpop.eup %7218 }
0x27e4   :  { %v7221_v57 = vpop.eup %7220  ;;  %v5846_v58 = vmul.f32 %v7219_v55, %v5830_v43 }
0x27e5   :  { %v5845_v59 = vmul.f32 %v7221_v57, %v5829_v44 }
0x27e6   :  { %v5854_v61 = vmul.f32 %v6091_v56, %v5846_v58 }
0x27e7   :  { %v5853_v62 = vmul.f32 %v6091_v56, %v5845_v59 }
0x27e8   :  { %v5862_v63 = vadd.f32 %v6092_v60, %v5854_v61 }
0x27e9   :  { %v5861_v0 = vadd.f32 %v6092_v60, %v5853_v62 }
0x27ea   :  { %5864 = vst.msk [vmem:[#allocation2 + $0x8] sm:$0xff] %vm99_vm0, %v5862_v63 }
0x27eb   :  { %5863 = vst.msk [vmem:[#allocation2] sm:$0xff] %vm99_vm0, %v5861_v0 }
0x27ec   :  { %7233 = shalt.err (!%p7230_p4)
}
0x27ed   :  { %s7234_s20 = scalar_lea.hbm %s8222_s28, 256 }
0x27ee   :  { %p7235_p5 = scmp.ne.s32.totalorder %s8222_s28, %s7234_s20  ;;  %p7238_p6 = scmp.lt.u32.totalorder %s7234_s20, %s8222_s28 }
0x27f0   :  { %p7240_p7 = pnand %p7238_p6, %p7235_p5 }
0x27f2   :  { %7243 = shalt.err (!%p7240_p7)
}
0x27f3   :  { %s7249_s29 = smov 128   ;;  %s7250_s17 = smov 8  }
0x27f4   :  { %5876 = dma.vmem_to_hbm [thread:$0]  %s5871_s6, 256, %s8222_s28, [#allocation3], %s7249_s29, %s7249_s29, %s7250_s17  }
0x27f5   :  { %7244 = dma.done.wait [#allocation3], 256  }
0x27f6   :  { %7245 = vsyncadd [#allocation3], 4294967040 }
0x27f7   :  { %5880 = vsyncpa [#allocation3], 1 }

</bundles_post_ra>
